<compile_context>
chip_gen: v5e
topology: v5e:2x2
jax: 0.10.0
libtpu: 0.0.40
codegen_flags: <defaults>
</compile_context>

<pallas_src>
import functools

import jax
import jax.numpy as jnp
from jax import lax
from jax.experimental import pallas as pl
from jax.experimental.pallas import tpu as pltpu


def basic_block_kernel(x_ref, w1_ref, w2_ref, b1_ref, b2_ref, mask_ref,
                       out_ref, *, taps):
    """taps: 9 static row offsets (dy-1)*(W+2) + (dx-1), dy/dx in {0,1,2}."""
    xv = x_ref[...]                                        # (R, Cp) bf16

    def shift_rows(v, d):
        # s[r, :] = v[r + d, :], zero-filled where r + d is out of range.
        # Only discarded halo rows ever depend on the zero fill.
        if d == 0:
            return v
        z = jnp.zeros((abs(d), v.shape[1]), v.dtype)
        if d > 0:
            return jnp.concatenate([v[d:, :], z], axis=0)
        return jnp.concatenate([z, v[:d, :]], axis=0)

    # ---- conv1 (BN1 scale folded into weight columns): 9 MXU matmuls ----
    acc1 = jnp.dot(shift_rows(xv, taps[0]), w1_ref[0],
                   preferred_element_type=jnp.float32)
    for t in range(1, 9):
        acc1 += jnp.dot(shift_rows(xv, taps[t]), w1_ref[t],
                        preferred_element_type=jnp.float32)
    # BN1 shift + ReLU; zero the halo/pad rows: this IS conv2's SAME padding
    # and removes cross-image garbage from the (discarded) halo rows.
    y1 = (jnp.maximum(acc1 + b1_ref[...], 0.0) * mask_ref[...]).astype(jnp.bfloat16)

    # ---- conv2 (BN2 scale folded): taps formed from the in-vreg activation ----
    acc2 = jnp.dot(shift_rows(y1, taps[0]), w2_ref[0],
                   preferred_element_type=jnp.float32)
    for t in range(1, 9):
        acc2 += jnp.dot(shift_rows(y1, taps[t]), w2_ref[t],
                        preferred_element_type=jnp.float32)

    # BN2 shift + residual + ReLU. Identity = the padded input rows (bf16);
    # halo rows hold garbage and are sliced off in the wrapper.
    out = jnp.maximum(acc2 + b2_ref[...] + xv.astype(jnp.float32), 0.0)
    out_ref[...] = out.astype(out_ref.dtype)


def _round_up(n, m):
    return ((n + m - 1) // m) * m


def _fold_bn(gamma, beta, mean, var, eps=1e-5):
    scale = gamma / jnp.sqrt(var + eps)
    shift = beta - mean * scale
    return scale, shift


def _prep_taps(w_oihw, scale, cin_p, cout_p):
    """torch OIHW 3x3 weight -> (9, cin_p, cout_p) bf16, BN scale folded in."""
    w = jnp.transpose(w_oihw, (2, 3, 1, 0)) * scale[None, None, None, :]  # HWIO
    kh, kw, cin, cout = w.shape
    wp = jnp.zeros((kh * kw, cin_p, cout_p), jnp.float32)
    wp = wp.at[:, :cin, :cout].set(w.reshape(kh * kw, cin, cout))
    return wp.astype(jnp.bfloat16)


def basic_block_forward(x_nchw, params, block_b=8):
    w1, w2 = params['conv1_w'], params['conv2_w']
    s1, b1 = _fold_bn(*params['bn1'])
    s2, b2 = _fold_bn(*params['bn2'])

    B, cin, H, W = x_nchw.shape
    cmid = w1.shape[0]
    cout = w2.shape[0]
    assert cin == cout, "identity add requires in_planes == planes here"

    LANES = 128
    cin_p, cmid_p, cout_p = (_round_up(c, LANES) for c in (cin, cmid, cout))
    assert cin_p == cout_p

    Hp, Wp = H + 2, W + 2
    P = Hp * Wp                        # spatial positions per padded image
    P_pad = _round_up(P, 8)            # sublane-align the per-image row count

    # Batch tile: >= 2 grid steps so v7x megacore has work, plus a rough VMEM
    # cap sized for the smallest generation (v7x, 64 MiB physical VMEM).
    Bt = max(1, min(block_b, B // 2 if B >= 2 else 1))
    while B % Bt:
        Bt -= 1

    def _block_bytes(bt):
        r = bt * P_pad
        return (2 * r * cin_p * 2 + 2 * r * cout_p * 2        # dbl-buffered bf16 in/out
                + r * (cin_p + cmid_p + 2 * cout_p) * 4)       # live f32 intermediates

    while Bt > 1 and _block_bytes(Bt) > (12 << 20):
        Bt //= 2
        while B % Bt:
            Bt -= 1
    R = Bt * P_pad

    # Input: NCHW -> NHWC, zero-pad H/W (SAME) and channels (lane density),
    # flatten spatial positions onto matmul rows, pad rows to a multiple of 8.
    x = jnp.transpose(x_nchw, (0, 2, 3, 1)).astype(jnp.float32)
    xp = jnp.pad(x, ((0, 0), (1, 1), (1, 1), (0, cin_p - cin)))
    xf = jnp.pad(xp.reshape(B, P, cin_p), ((0, 0), (0, P_pad - P), (0, 0)))
    xf = xf.reshape(B * P_pad, cin_p).astype(jnp.bfloat16)

    # 9 small tap weights per conv, BN scales folded into output columns.
    w1_t = _prep_taps(w1, s1, cin_p, cmid_p)           # (9, cin_p, cmid_p)
    w2_t = _prep_taps(w2, s2, cmid_p, cout_p)          # (9, cmid_p, cout_p)
    b1_p = jnp.zeros((1, cmid_p), jnp.float32).at[0, :cmid].set(b1)
    b2_p = jnp.zeros((1, cout_p), jnp.float32).at[0, :cout].set(b2)

    # Row-validity mask: 1 on real interior positions, 0 on halo / pad rows.
    p = jnp.arange(P_pad)
    i, j = p // Wp, p % Wp
    valid = (i >= 1) & (i <= H) & (j >= 1) & (j <= W) & (p < P)
    mask = jnp.tile(valid.astype(jnp.float32)[:, None], (Bt, 1))   # (R, 1)

    taps = tuple((dy - 1) * Wp + (dx - 1) for dy in range(3) for dx in range(3))
    kern = functools.partial(basic_block_kernel, taps=taps)

    out_flat = pl.pallas_call(
        kern,
        out_shape=jax.ShapeDtypeStruct((B * P_pad, cout_p), jnp.bfloat16),
        grid_spec=pltpu.PrefetchScalarGridSpec(
            num_scalar_prefetch=0,
            grid=(B // Bt,),
            in_specs=[
                pl.BlockSpec((R, cin_p), lambda g: (g, 0)),
                pl.BlockSpec((9, cin_p, cmid_p), lambda g: (0, 0, 0)),
                pl.BlockSpec((9, cmid_p, cout_p), lambda g: (0, 0, 0)),
                pl.BlockSpec((1, cmid_p), lambda g: (0, 0)),
                pl.BlockSpec((1, cout_p), lambda g: (0, 0)),
                pl.BlockSpec((R, 1), lambda g: (0, 0)),
            ],
            out_specs=pl.BlockSpec((R, cout_p), lambda g: (g, 0)),
        ),
        compiler_params=pltpu.CompilerParams(
            dimension_semantics=("parallel",),        # batch axis -> megacore
            vmem_limit_bytes=48 * 1024 * 1024,        # under v7x's 64 MiB VMEM
        ),
    )(xf, w1_t, w2_t, b1_p, b2_p, mask)

    # Drop pad rows / halo ring / pad channels, back to NCHW f32.
    out = out_flat.reshape(B, P_pad, cout_p)[:, :P, :cout]
    out = out.reshape(B, Hp, Wp, cout)[:, 1:H + 1, 1:W + 1, :]
    return jnp.transpose(out, (0, 3, 1, 2)).astype(jnp.float32)


def basic_block_reference(x_nchw, params):
    """Plain-JAX f32 reference (same eval-mode BN semantics)."""
    w1, w2 = params['conv1_w'], params['conv2_w']
    s1, b1 = _fold_bn(*params['bn1'])
    s2, b2 = _fold_bn(*params['bn2'])
    x = jnp.transpose(x_nchw, (0, 2, 3, 1)).astype(jnp.float32)
    dn = ('NHWC', 'HWIO', 'NHWC')
    w1h = jnp.transpose(w1, (2, 3, 1, 0))
    w2h = jnp.transpose(w2, (2, 3, 1, 0))
    y = lax.conv_general_dilated(x, w1h, (1, 1), 'SAME', dimension_numbers=dn)
    y = jnp.maximum(y * s1 + b1, 0.0)
    y = lax.conv_general_dilated(y, w2h, (1, 1), 'SAME', dimension_numbers=dn)
    y = y * s2 + b2
    y = jnp.maximum(y + x, 0.0)
    return jnp.transpose(y, (0, 3, 1, 2))


if __name__ == "__main__":
    key = jax.random.PRNGKey(0)
    ks = jax.random.split(key, 12)

    B, Cin, H, W = 2, 4, 16, 16
    planes = 4  # expansion = 1, stride = 1, downsample = None

    x = jax.random.normal(ks[0], (B, Cin, H, W), jnp.float32)
    params = {
        'conv1_w': 0.1 * jax.random.normal(ks[1], (planes, Cin, 3, 3), jnp.float32),
        'conv2_w': 0.1 * jax.random.normal(ks[2], (planes, planes, 3, 3), jnp.float32),
        'bn1': (1.0 + 0.1 * jax.random.normal(ks[3], (planes,), jnp.float32),
                0.1 * jax.random.normal(ks[4], (planes,), jnp.float32),
                0.1 * jax.random.normal(ks[5], (planes,), jnp.float32),
                0.5 + jax.random.uniform(ks[6], (planes,), jnp.float32)),
        'bn2': (1.0 + 0.1 * jax.random.normal(ks[7], (planes,), jnp.float32),
                0.1 * jax.random.normal(ks[8], (planes,), jnp.float32),
                0.1 * jax.random.normal(ks[9], (planes,), jnp.float32),
                0.5 + jax.random.uniform(ks[10], (planes,), jnp.float32)),
    }

    out = basic_block_forward(x, params)
    out = jax.block_until_ready(out)

    ref = jax.block_until_ready(basic_block_reference(x, params))
    assert out.shape == (B, planes, H, W)
    # bf16 MXU inputs + bf16 output vs f32 reference -> normalized tolerance
    err = jnp.max(jnp.abs(out - ref) / (1.0 + jnp.abs(ref)))
    assert err < 5e-2, f"mismatch vs. JAX reference: {err}"

    print("KERNEL_OK")
</pallas_src>

<mosaic_0001>
module attributes {stable_mosaic.version = 11 : i64} {
  func.func @basic_block_kernel(%arg0: i32, %arg1: memref<328x128xbf16, #tpu.memory_space<vmem>>, %arg2: memref<9x128x128xbf16, #tpu.memory_space<vmem>>, %arg3: memref<9x128x128xbf16, #tpu.memory_space<vmem>>, %arg4: memref<1x128xf32, #tpu.memory_space<vmem>>, %arg5: memref<1x128xf32, #tpu.memory_space<vmem>>, %arg6: memref<328x1xf32, #tpu.memory_space<vmem>>, %arg7: memref<328x128xbf16, #tpu.memory_space<vmem>>) attributes {dimension_semantics = [#tpu.dimension_semantics<parallel>], iteration_bounds = array<i64: 2>, scalar_prefetch = 0 : i64, scratch_operands = 0 : i64, tpu.core_type = #tpu.core_type<tc>, window_params = [{transform_indices = @transform_0, window_bounds = array<i64: 328, 128>}, {pipeline_mode = #tpu.pipeline_mode<synchronous>, transform_indices = @transform_1, window_bounds = array<i64: 9, 128, 128>}, {pipeline_mode = #tpu.pipeline_mode<synchronous>, transform_indices = @transform_2, window_bounds = array<i64: 9, 128, 128>}, {pipeline_mode = #tpu.pipeline_mode<synchronous>, transform_indices = @transform_3, window_bounds = array<i64: 1, 128>}, {pipeline_mode = #tpu.pipeline_mode<synchronous>, transform_indices = @transform_4, window_bounds = array<i64: 1, 128>}, {pipeline_mode = #tpu.pipeline_mode<synchronous>, transform_indices = @transform_5, window_bounds = array<i64: 328, 1>}, {transform_indices = @transform_6, window_bounds = array<i64: 328, 128>}]} {
    %c0 = arith.constant 0 : index
    %c0_0 = arith.constant 0 : index
    %0 = vector.load %arg1[%c0, %c0_0] : memref<328x128xbf16, #tpu.memory_space<vmem>>, vector<328x128xbf16>
    %cst = arith.constant 0.000000e+00 : bf16
    %1 = vector.broadcast %cst : bf16 to vector<19x128xbf16>
    %2 = vector.extract_strided_slice %0 {offsets = [0, 0], sizes = [309, 128], strides = [1, 1]} : vector<328x128xbf16> to vector<309x128xbf16>
    %3 = tpu.concatenate %1, %2 in 0 : vector<19x128xbf16>, vector<309x128xbf16> -> vector<328x128xbf16>
    %c0_1 = arith.constant 0 : index
    %c0_2 = arith.constant 0 : index
    %c0_3 = arith.constant 0 : index
    %4 = vector.load %arg2[%c0_1, %c0_2, %c0_3] : memref<9x128x128xbf16, #tpu.memory_space<vmem>>, vector<1x128x128xbf16>
    %5 = vector.shape_cast %4 : vector<1x128x128xbf16> to vector<128x128xbf16>
    %cst_4 = arith.constant dense<0.000000e+00> : vector<328x128xf32>
    %6 = tpu.matmul %3, %5, %cst_4 {dimension_numbers = #tpu.dot_dimension_numbers<[1], [0], [0], [1], [0, 0, 1, 1], [], []>} : vector<328x128xbf16>, vector<128x128xbf16>, vector<328x128xf32> -> vector<328x128xf32>
    %cst_5 = arith.constant 0.000000e+00 : bf16
    %7 = vector.broadcast %cst_5 : bf16 to vector<18x128xbf16>
    %8 = vector.extract_strided_slice %0 {offsets = [0, 0], sizes = [310, 128], strides = [1, 1]} : vector<328x128xbf16> to vector<310x128xbf16>
    %9 = tpu.concatenate %7, %8 in 0 : vector<18x128xbf16>, vector<310x128xbf16> -> vector<328x128xbf16>
    %c1 = arith.constant 1 : index
    %c0_6 = arith.constant 0 : index
    %c0_7 = arith.constant 0 : index
    %10 = vector.load %arg2[%c1, %c0_6, %c0_7] : memref<9x128x128xbf16, #tpu.memory_space<vmem>>, vector<1x128x128xbf16>
    %11 = vector.shape_cast %10 : vector<1x128x128xbf16> to vector<128x128xbf16>
    %cst_8 = arith.constant dense<0.000000e+00> : vector<328x128xf32>
    %12 = tpu.matmul %9, %11, %cst_8 {dimension_numbers = #tpu.dot_dimension_numbers<[1], [0], [0], [1], [0, 0, 1, 1], [], []>} : vector<328x128xbf16>, vector<128x128xbf16>, vector<328x128xf32> -> vector<328x128xf32>
    %13 = arith.addf %6, %12 : vector<328x128xf32>
    %cst_9 = arith.constant 0.000000e+00 : bf16
    %14 = vector.broadcast %cst_9 : bf16 to vector<17x128xbf16>
    %15 = vector.extract_strided_slice %0 {offsets = [0, 0], sizes = [311, 128], strides = [1, 1]} : vector<328x128xbf16> to vector<311x128xbf16>
    %16 = tpu.concatenate %14, %15 in 0 : vector<17x128xbf16>, vector<311x128xbf16> -> vector<328x128xbf16>
    %c2 = arith.constant 2 : index
    %c0_10 = arith.constant 0 : index
    %c0_11 = arith.constant 0 : index
    %17 = vector.load %arg2[%c2, %c0_10, %c0_11] : memref<9x128x128xbf16, #tpu.memory_space<vmem>>, vector<1x128x128xbf16>
    %18 = vector.shape_cast %17 : vector<1x128x128xbf16> to vector<128x128xbf16>
    %cst_12 = arith.constant dense<0.000000e+00> : vector<328x128xf32>
    %19 = tpu.matmul %16, %18, %cst_12 {dimension_numbers = #tpu.dot_dimension_numbers<[1], [0], [0], [1], [0, 0, 1, 1], [], []>} : vector<328x128xbf16>, vector<128x128xbf16>, vector<328x128xf32> -> vector<328x128xf32>
    %20 = arith.addf %13, %19 : vector<328x128xf32>
    %cst_13 = arith.constant 0.000000e+00 : bf16
    %21 = vector.broadcast %cst_13 : bf16 to vector<1x128xbf16>
    %22 = vector.extract_strided_slice %0 {offsets = [0, 0], sizes = [327, 128], strides = [1, 1]} : vector<328x128xbf16> to vector<327x128xbf16>
    %23 = tpu.concatenate %21, %22 in 0 : vector<1x128xbf16>, vector<327x128xbf16> -> vector<328x128xbf16>
    %c3 = arith.constant 3 : index
    %c0_14 = arith.constant 0 : index
    %c0_15 = arith.constant 0 : index
    %24 = vector.load %arg2[%c3, %c0_14, %c0_15] : memref<9x128x128xbf16, #tpu.memory_space<vmem>>, vector<1x128x128xbf16>
    %25 = vector.shape_cast %24 : vector<1x128x128xbf16> to vector<128x128xbf16>
    %cst_16 = arith.constant dense<0.000000e+00> : vector<328x128xf32>
    %26 = tpu.matmul %23, %25, %cst_16 {dimension_numbers = #tpu.dot_dimension_numbers<[1], [0], [0], [1], [0, 0, 1, 1], [], []>} : vector<328x128xbf16>, vector<128x128xbf16>, vector<328x128xf32> -> vector<328x128xf32>
    %27 = arith.addf %20, %26 : vector<328x128xf32>
    %c4 = arith.constant 4 : index
    %c0_17 = arith.constant 0 : index
    %c0_18 = arith.constant 0 : index
    %28 = vector.load %arg2[%c4, %c0_17, %c0_18] : memref<9x128x128xbf16, #tpu.memory_space<vmem>>, vector<1x128x128xbf16>
    %29 = vector.shape_cast %28 : vector<1x128x128xbf16> to vector<128x128xbf16>
    %cst_19 = arith.constant dense<0.000000e+00> : vector<328x128xf32>
    %30 = tpu.matmul %0, %29, %cst_19 {dimension_numbers = #tpu.dot_dimension_numbers<[1], [0], [0], [1], [0, 0, 1, 1], [], []>} : vector<328x128xbf16>, vector<128x128xbf16>, vector<328x128xf32> -> vector<328x128xf32>
    %31 = arith.addf %27, %30 : vector<328x128xf32>
    %cst_20 = arith.constant 0.000000e+00 : bf16
    %32 = vector.broadcast %cst_20 : bf16 to vector<1x128xbf16>
    %33 = vector.extract_strided_slice %0 {offsets = [1, 0], sizes = [327, 128], strides = [1, 1]} : vector<328x128xbf16> to vector<327x128xbf16>
    %34 = tpu.concatenate %33, %32 in 0 : vector<327x128xbf16>, vector<1x128xbf16> -> vector<328x128xbf16>
    %c5 = arith.constant 5 : index
    %c0_21 = arith.constant 0 : index
    %c0_22 = arith.constant 0 : index
    %35 = vector.load %arg2[%c5, %c0_21, %c0_22] : memref<9x128x128xbf16, #tpu.memory_space<vmem>>, vector<1x128x128xbf16>
    %36 = vector.shape_cast %35 : vector<1x128x128xbf16> to vector<128x128xbf16>
    %cst_23 = arith.constant dense<0.000000e+00> : vector<328x128xf32>
    %37 = tpu.matmul %34, %36, %cst_23 {dimension_numbers = #tpu.dot_dimension_numbers<[1], [0], [0], [1], [0, 0, 1, 1], [], []>} : vector<328x128xbf16>, vector<128x128xbf16>, vector<328x128xf32> -> vector<328x128xf32>
    %38 = arith.addf %31, %37 : vector<328x128xf32>
    %cst_24 = arith.constant 0.000000e+00 : bf16
    %39 = vector.broadcast %cst_24 : bf16 to vector<17x128xbf16>
    %40 = vector.extract_strided_slice %0 {offsets = [17, 0], sizes = [311, 128], strides = [1, 1]} : vector<328x128xbf16> to vector<311x128xbf16>
    %41 = tpu.concatenate %40, %39 in 0 : vector<311x128xbf16>, vector<17x128xbf16> -> vector<328x128xbf16>
    %c6 = arith.constant 6 : index
    %c0_25 = arith.constant 0 : index
    %c0_26 = arith.constant 0 : index
    %42 = vector.load %arg2[%c6, %c0_25, %c0_26] : memref<9x128x128xbf16, #tpu.memory_space<vmem>>, vector<1x128x128xbf16>
    %43 = vector.shape_cast %42 : vector<1x128x128xbf16> to vector<128x128xbf16>
    %cst_27 = arith.constant dense<0.000000e+00> : vector<328x128xf32>
    %44 = tpu.matmul %41, %43, %cst_27 {dimension_numbers = #tpu.dot_dimension_numbers<[1], [0], [0], [1], [0, 0, 1, 1], [], []>} : vector<328x128xbf16>, vector<128x128xbf16>, vector<328x128xf32> -> vector<328x128xf32>
    %45 = arith.addf %38, %44 : vector<328x128xf32>
    %cst_28 = arith.constant 0.000000e+00 : bf16
    %46 = vector.broadcast %cst_28 : bf16 to vector<18x128xbf16>
    %47 = vector.extract_strided_slice %0 {offsets = [18, 0], sizes = [310, 128], strides = [1, 1]} : vector<328x128xbf16> to vector<310x128xbf16>
    %48 = tpu.concatenate %47, %46 in 0 : vector<310x128xbf16>, vector<18x128xbf16> -> vector<328x128xbf16>
    %c7 = arith.constant 7 : index
    %c0_29 = arith.constant 0 : index
    %c0_30 = arith.constant 0 : index
    %49 = vector.load %arg2[%c7, %c0_29, %c0_30] : memref<9x128x128xbf16, #tpu.memory_space<vmem>>, vector<1x128x128xbf16>
    %50 = vector.shape_cast %49 : vector<1x128x128xbf16> to vector<128x128xbf16>
    %cst_31 = arith.constant dense<0.000000e+00> : vector<328x128xf32>
    %51 = tpu.matmul %48, %50, %cst_31 {dimension_numbers = #tpu.dot_dimension_numbers<[1], [0], [0], [1], [0, 0, 1, 1], [], []>} : vector<328x128xbf16>, vector<128x128xbf16>, vector<328x128xf32> -> vector<328x128xf32>
    %52 = arith.addf %45, %51 : vector<328x128xf32>
    %cst_32 = arith.constant 0.000000e+00 : bf16
    %53 = vector.broadcast %cst_32 : bf16 to vector<19x128xbf16>
    %54 = vector.extract_strided_slice %0 {offsets = [19, 0], sizes = [309, 128], strides = [1, 1]} : vector<328x128xbf16> to vector<309x128xbf16>
    %55 = tpu.concatenate %54, %53 in 0 : vector<309x128xbf16>, vector<19x128xbf16> -> vector<328x128xbf16>
    %c8 = arith.constant 8 : index
    %c0_33 = arith.constant 0 : index
    %c0_34 = arith.constant 0 : index
    %56 = vector.load %arg2[%c8, %c0_33, %c0_34] : memref<9x128x128xbf16, #tpu.memory_space<vmem>>, vector<1x128x128xbf16>
    %57 = vector.shape_cast %56 : vector<1x128x128xbf16> to vector<128x128xbf16>
    %cst_35 = arith.constant dense<0.000000e+00> : vector<328x128xf32>
    %58 = tpu.matmul %55, %57, %cst_35 {dimension_numbers = #tpu.dot_dimension_numbers<[1], [0], [0], [1], [0, 0, 1, 1], [], []>} : vector<328x128xbf16>, vector<128x128xbf16>, vector<328x128xf32> -> vector<328x128xf32>
    %59 = arith.addf %52, %58 : vector<328x128xf32>
    %c0_36 = arith.constant 0 : index
    %c0_37 = arith.constant 0 : index
    %60 = vector.load %arg4[%c0_36, %c0_37] : memref<1x128xf32, #tpu.memory_space<vmem>>, vector<1x128xf32>
    %61 = vector.broadcast %60 : vector<1x128xf32> to vector<328x128xf32>
    %62 = arith.addf %59, %61 : vector<328x128xf32>
    %cst_38 = arith.constant 0.000000e+00 : f32
    %63 = vector.broadcast %cst_38 : f32 to vector<328x128xf32>
    %64 = arith.maximumf %62, %63 : vector<328x128xf32>
    %c0_39 = arith.constant 0 : index
    %c0_40 = arith.constant 0 : index
    %65 = vector.load %arg6[%c0_39, %c0_40] : memref<328x1xf32, #tpu.memory_space<vmem>>, vector<328x1xf32>
    %66 = vector.broadcast %65 : vector<328x1xf32> to vector<328x128xf32>
    %67 = arith.mulf %64, %66 : vector<328x128xf32>
    %68 = arith.truncf %67 : vector<328x128xf32> to vector<328x128xbf16>
    %cst_41 = arith.constant 0.000000e+00 : bf16
    %69 = vector.broadcast %cst_41 : bf16 to vector<19x128xbf16>
    %70 = vector.extract_strided_slice %68 {offsets = [0, 0], sizes = [309, 128], strides = [1, 1]} : vector<328x128xbf16> to vector<309x128xbf16>
    %71 = tpu.concatenate %69, %70 in 0 : vector<19x128xbf16>, vector<309x128xbf16> -> vector<328x128xbf16>
    %c0_42 = arith.constant 0 : index
    %c0_43 = arith.constant 0 : index
    %c0_44 = arith.constant 0 : index
    %72 = vector.load %arg3[%c0_42, %c0_43, %c0_44] : memref<9x128x128xbf16, #tpu.memory_space<vmem>>, vector<1x128x128xbf16>
    %73 = vector.shape_cast %72 : vector<1x128x128xbf16> to vector<128x128xbf16>
    %cst_45 = arith.constant dense<0.000000e+00> : vector<328x128xf32>
    %74 = tpu.matmul %71, %73, %cst_45 {dimension_numbers = #tpu.dot_dimension_numbers<[1], [0], [0], [1], [0, 0, 1, 1], [], []>} : vector<328x128xbf16>, vector<128x128xbf16>, vector<328x128xf32> -> vector<328x128xf32>
    %cst_46 = arith.constant 0.000000e+00 : bf16
    %75 = vector.broadcast %cst_46 : bf16 to vector<18x128xbf16>
    %76 = vector.extract_strided_slice %68 {offsets = [0, 0], sizes = [310, 128], strides = [1, 1]} : vector<328x128xbf16> to vector<310x128xbf16>
    %77 = tpu.concatenate %75, %76 in 0 : vector<18x128xbf16>, vector<310x128xbf16> -> vector<328x128xbf16>
    %c1_47 = arith.constant 1 : index
    %c0_48 = arith.constant 0 : index
    %c0_49 = arith.constant 0 : index
    %78 = vector.load %arg3[%c1_47, %c0_48, %c0_49] : memref<9x128x128xbf16, #tpu.memory_space<vmem>>, vector<1x128x128xbf16>
    %79 = vector.shape_cast %78 : vector<1x128x128xbf16> to vector<128x128xbf16>
    %cst_50 = arith.constant dense<0.000000e+00> : vector<328x128xf32>
    %80 = tpu.matmul %77, %79, %cst_50 {dimension_numbers = #tpu.dot_dimension_numbers<[1], [0], [0], [1], [0, 0, 1, 1], [], []>} : vector<328x128xbf16>, vector<128x128xbf16>, vector<328x128xf32> -> vector<328x128xf32>
    %81 = arith.addf %74, %80 : vector<328x128xf32>
    %cst_51 = arith.constant 0.000000e+00 : bf16
    %82 = vector.broadcast %cst_51 : bf16 to vector<17x128xbf16>
    %83 = vector.extract_strided_slice %68 {offsets = [0, 0], sizes = [311, 128], strides = [1, 1]} : vector<328x128xbf16> to vector<311x128xbf16>
    %84 = tpu.concatenate %82, %83 in 0 : vector<17x128xbf16>, vector<311x128xbf16> -> vector<328x128xbf16>
    %c2_52 = arith.constant 2 : index
    %c0_53 = arith.constant 0 : index
    %c0_54 = arith.constant 0 : index
    %85 = vector.load %arg3[%c2_52, %c0_53, %c0_54] : memref<9x128x128xbf16, #tpu.memory_space<vmem>>, vector<1x128x128xbf16>
    %86 = vector.shape_cast %85 : vector<1x128x128xbf16> to vector<128x128xbf16>
    %cst_55 = arith.constant dense<0.000000e+00> : vector<328x128xf32>
    %87 = tpu.matmul %84, %86, %cst_55 {dimension_numbers = #tpu.dot_dimension_numbers<[1], [0], [0], [1], [0, 0, 1, 1], [], []>} : vector<328x128xbf16>, vector<128x128xbf16>, vector<328x128xf32> -> vector<328x128xf32>
    %88 = arith.addf %81, %87 : vector<328x128xf32>
    %cst_56 = arith.constant 0.000000e+00 : bf16
    %89 = vector.broadcast %cst_56 : bf16 to vector<1x128xbf16>
    %90 = vector.extract_strided_slice %68 {offsets = [0, 0], sizes = [327, 128], strides = [1, 1]} : vector<328x128xbf16> to vector<327x128xbf16>
    %91 = tpu.concatenate %89, %90 in 0 : vector<1x128xbf16>, vector<327x128xbf16> -> vector<328x128xbf16>
    %c3_57 = arith.constant 3 : index
    %c0_58 = arith.constant 0 : index
    %c0_59 = arith.constant 0 : index
    %92 = vector.load %arg3[%c3_57, %c0_58, %c0_59] : memref<9x128x128xbf16, #tpu.memory_space<vmem>>, vector<1x128x128xbf16>
    %93 = vector.shape_cast %92 : vector<1x128x128xbf16> to vector<128x128xbf16>
    %cst_60 = arith.constant dense<0.000000e+00> : vector<328x128xf32>
    %94 = tpu.matmul %91, %93, %cst_60 {dimension_numbers = #tpu.dot_dimension_numbers<[1], [0], [0], [1], [0, 0, 1, 1], [], []>} : vector<328x128xbf16>, vector<128x128xbf16>, vector<328x128xf32> -> vector<328x128xf32>
    %95 = arith.addf %88, %94 : vector<328x128xf32>
    %c4_61 = arith.constant 4 : index
    %c0_62 = arith.constant 0 : index
    %c0_63 = arith.constant 0 : index
    %96 = vector.load %arg3[%c4_61, %c0_62, %c0_63] : memref<9x128x128xbf16, #tpu.memory_space<vmem>>, vector<1x128x128xbf16>
    %97 = vector.shape_cast %96 : vector<1x128x128xbf16> to vector<128x128xbf16>
    %cst_64 = arith.constant dense<0.000000e+00> : vector<328x128xf32>
    %98 = tpu.matmul %68, %97, %cst_64 {dimension_numbers = #tpu.dot_dimension_numbers<[1], [0], [0], [1], [0, 0, 1, 1], [], []>} : vector<328x128xbf16>, vector<128x128xbf16>, vector<328x128xf32> -> vector<328x128xf32>
    %99 = arith.addf %95, %98 : vector<328x128xf32>
    %cst_65 = arith.constant 0.000000e+00 : bf16
    %100 = vector.broadcast %cst_65 : bf16 to vector<1x128xbf16>
    %101 = vector.extract_strided_slice %68 {offsets = [1, 0], sizes = [327, 128], strides = [1, 1]} : vector<328x128xbf16> to vector<327x128xbf16>
    %102 = tpu.concatenate %101, %100 in 0 : vector<327x128xbf16>, vector<1x128xbf16> -> vector<328x128xbf16>
    %c5_66 = arith.constant 5 : index
    %c0_67 = arith.constant 0 : index
    %c0_68 = arith.constant 0 : index
    %103 = vector.load %arg3[%c5_66, %c0_67, %c0_68] : memref<9x128x128xbf16, #tpu.memory_space<vmem>>, vector<1x128x128xbf16>
    %104 = vector.shape_cast %103 : vector<1x128x128xbf16> to vector<128x128xbf16>
    %cst_69 = arith.constant dense<0.000000e+00> : vector<328x128xf32>
    %105 = tpu.matmul %102, %104, %cst_69 {dimension_numbers = #tpu.dot_dimension_numbers<[1], [0], [0], [1], [0, 0, 1, 1], [], []>} : vector<328x128xbf16>, vector<128x128xbf16>, vector<328x128xf32> -> vector<328x128xf32>
    %106 = arith.addf %99, %105 : vector<328x128xf32>
    %cst_70 = arith.constant 0.000000e+00 : bf16
    %107 = vector.broadcast %cst_70 : bf16 to vector<17x128xbf16>
    %108 = vector.extract_strided_slice %68 {offsets = [17, 0], sizes = [311, 128], strides = [1, 1]} : vector<328x128xbf16> to vector<311x128xbf16>
    %109 = tpu.concatenate %108, %107 in 0 : vector<311x128xbf16>, vector<17x128xbf16> -> vector<328x128xbf16>
    %c6_71 = arith.constant 6 : index
    %c0_72 = arith.constant 0 : index
    %c0_73 = arith.constant 0 : index
    %110 = vector.load %arg3[%c6_71, %c0_72, %c0_73] : memref<9x128x128xbf16, #tpu.memory_space<vmem>>, vector<1x128x128xbf16>
    %111 = vector.shape_cast %110 : vector<1x128x128xbf16> to vector<128x128xbf16>
    %cst_74 = arith.constant dense<0.000000e+00> : vector<328x128xf32>
    %112 = tpu.matmul %109, %111, %cst_74 {dimension_numbers = #tpu.dot_dimension_numbers<[1], [0], [0], [1], [0, 0, 1, 1], [], []>} : vector<328x128xbf16>, vector<128x128xbf16>, vector<328x128xf32> -> vector<328x128xf32>
    %113 = arith.addf %106, %112 : vector<328x128xf32>
    %cst_75 = arith.constant 0.000000e+00 : bf16
    %114 = vector.broadcast %cst_75 : bf16 to vector<18x128xbf16>
    %115 = vector.extract_strided_slice %68 {offsets = [18, 0], sizes = [310, 128], strides = [1, 1]} : vector<328x128xbf16> to vector<310x128xbf16>
    %116 = tpu.concatenate %115, %114 in 0 : vector<310x128xbf16>, vector<18x128xbf16> -> vector<328x128xbf16>
    %c7_76 = arith.constant 7 : index
    %c0_77 = arith.constant 0 : index
    %c0_78 = arith.constant 0 : index
    %117 = vector.load %arg3[%c7_76, %c0_77, %c0_78] : memref<9x128x128xbf16, #tpu.memory_space<vmem>>, vector<1x128x128xbf16>
    %118 = vector.shape_cast %117 : vector<1x128x128xbf16> to vector<128x128xbf16>
    %cst_79 = arith.constant dense<0.000000e+00> : vector<328x128xf32>
    %119 = tpu.matmul %116, %118, %cst_79 {dimension_numbers = #tpu.dot_dimension_numbers<[1], [0], [0], [1], [0, 0, 1, 1], [], []>} : vector<328x128xbf16>, vector<128x128xbf16>, vector<328x128xf32> -> vector<328x128xf32>
    %120 = arith.addf %113, %119 : vector<328x128xf32>
    %cst_80 = arith.constant 0.000000e+00 : bf16
    %121 = vector.broadcast %cst_80 : bf16 to vector<19x128xbf16>
    %122 = vector.extract_strided_slice %68 {offsets = [19, 0], sizes = [309, 128], strides = [1, 1]} : vector<328x128xbf16> to vector<309x128xbf16>
    %123 = tpu.concatenate %122, %121 in 0 : vector<309x128xbf16>, vector<19x128xbf16> -> vector<328x128xbf16>
    %c8_81 = arith.constant 8 : index
    %c0_82 = arith.constant 0 : index
    %c0_83 = arith.constant 0 : index
    %124 = vector.load %arg3[%c8_81, %c0_82, %c0_83] : memref<9x128x128xbf16, #tpu.memory_space<vmem>>, vector<1x128x128xbf16>
    %125 = vector.shape_cast %124 : vector<1x128x128xbf16> to vector<128x128xbf16>
    %cst_84 = arith.constant dense<0.000000e+00> : vector<328x128xf32>
    %126 = tpu.matmul %123, %125, %cst_84 {dimension_numbers = #tpu.dot_dimension_numbers<[1], [0], [0], [1], [0, 0, 1, 1], [], []>} : vector<328x128xbf16>, vector<128x128xbf16>, vector<328x128xf32> -> vector<328x128xf32>
    %127 = arith.addf %120, %126 : vector<328x128xf32>
    %c0_85 = arith.constant 0 : index
    %c0_86 = arith.constant 0 : index
    %128 = vector.load %arg5[%c0_85, %c0_86] : memref<1x128xf32, #tpu.memory_space<vmem>>, vector<1x128xf32>
    %129 = vector.broadcast %128 : vector<1x128xf32> to vector<328x128xf32>
    %130 = arith.addf %127, %129 : vector<328x128xf32>
    %131 = arith.extf %0 : vector<328x128xbf16> to vector<328x128xf32>
    %132 = arith.addf %130, %131 : vector<328x128xf32>
    %cst_87 = arith.constant 0.000000e+00 : f32
    %133 = vector.broadcast %cst_87 : f32 to vector<328x128xf32>
    %134 = arith.maximumf %132, %133 : vector<328x128xf32>
    %135 = arith.truncf %134 : vector<328x128xf32> to vector<328x128xbf16>
    %c0_88 = arith.constant 0 : index
    %c0_89 = arith.constant 0 : index
    %136 = vector.load %arg7[%c0_88, %c0_89] : memref<328x128xbf16, #tpu.memory_space<vmem>>, vector<328x128xbf16>
    tpu.vector_store %arg7[%c0_88, %c0_89], %135 {strides = array<i32>} : memref<328x128xbf16, #tpu.memory_space<vmem>>, vector<328x128xbf16>,
    return
  }
  func.func @transform_0(%arg0: i32) -> (i32, i32) {
    %c0_i32 = arith.constant 0 : i32
    %c0_i32_0 = arith.constant 0 : i32
    return %arg0, %c0_i32 : i32, i32
  }
  func.func @transform_1(%arg0: i32) -> (i32, i32, i32) {
    %c0_i32 = arith.constant 0 : i32
    %c0_i32_0 = arith.constant 0 : i32
    %c0_i32_1 = arith.constant 0 : i32
    %c0_i32_2 = arith.constant 0 : i32
    return %c0_i32, %c0_i32_0, %c0_i32_1 : i32, i32, i32
  }
  func.func @transform_2(%arg0: i32) -> (i32, i32, i32) {
    %c0_i32 = arith.constant 0 : i32
    %c0_i32_0 = arith.constant 0 : i32
    %c0_i32_1 = arith.constant 0 : i32
    %c0_i32_2 = arith.constant 0 : i32
    return %c0_i32, %c0_i32_0, %c0_i32_1 : i32, i32, i32
  }
  func.func @transform_3(%arg0: i32) -> (i32, i32) {
    %c0_i32 = arith.constant 0 : i32
    %c0_i32_0 = arith.constant 0 : i32
    %c0_i32_1 = arith.constant 0 : i32
    return %c0_i32, %c0_i32_0 : i32, i32
  }
  func.func @transform_4(%arg0: i32) -> (i32, i32) {
    %c0_i32 = arith.constant 0 : i32
    %c0_i32_0 = arith.constant 0 : i32
    %c0_i32_1 = arith.constant 0 : i32
    return %c0_i32, %c0_i32_0 : i32, i32
  }
  func.func @transform_5(%arg0: i32) -> (i32, i32) {
    %c0_i32 = arith.constant 0 : i32
    %c0_i32_0 = arith.constant 0 : i32
    %c0_i32_1 = arith.constant 0 : i32
    return %c0_i32, %c0_i32_0 : i32, i32
  }
  func.func @transform_6(%arg0: i32) -> (i32, i32) {
    %c0_i32 = arith.constant 0 : i32
    %c0_i32_0 = arith.constant 0 : i32
    return %arg0, %c0_i32 : i32, i32
  }
}

</mosaic_0001>

<bundles_post_ra>
// kernel: tpu_custom_call.1
= control target key start
LH: loop header
LB: loop body
LE: loop exit
PB: predicated region body
PF: predicated region fallthrough
CT: control target
= control target key end

     0   :  { %11 = vsyncpa [#allocation3], 0  ;;  %s10240_s0 = inlined_call_operand.vmem [shape: bf16[656,128], index: 0, kind: input, shape index: {}]   ;;  %s10241_s1 = inlined_call_operand.hbm [shape: bf16[9,128,128], index: 1, kind: input, shape index: {}]   ;;  %s10242_s2 = inlined_call_operand.hbm [shape: bf16[9,128,128], index: 2, kind: input, shape index: {}]   ;;  %s10243_s3 = inlined_call_operand.vmem [shape: f32[1,128], index: 3, kind: input, shape index: {}]   ;;  %s10244_s4 = inlined_call_operand.vmem [shape: f32[1,128], index: 4, kind: input, shape index: {}]   ;;  %s10245_s5 = inlined_call_operand.vmem [shape: f32[328,1], index: 5, kind: input, shape index: {}]   ;;  %s10246_s6 = inlined_call_operand.hbm [shape: bf16[656,128], index: 6, kind: output, shape index: {}]  }
   0x1   :  { %12 = vsyncpa [#allocation6], 0 }
   0x2   :  { %13 = vsyncpa [#allocation4], 0 }
   0x3   :  { %15 = vsyncpa [#allocation4 + $0x1], 0  ;;  %s7591_s21 = smov 0   ;;  %s7593_s22 = smov 0  }
   0x4   :  { %s7595_s23 = smov 0   ;;  %s7597_s24 = smov 0  }
   0x5 LB: > { %s7612_s25 = sadd.s32 4294967295, %s7547_s24   ;;  %s6345_s26 = sadd.s32 4294967294, %s7547_s24   ;;  %s7547_s24 = sphi %s7597_s24, %s10795_s24   ;;  %s7543_s23 = sphi %s7595_s23, %s10794_s23   ;;  %s7539_s22 = sphi %s7593_s22, %s10793_s22   ;;  %s7535_s21 = sphi %s7591_s21, %s10792_s21  }
   0x6   : > { %s7616_s27 = sadd.s32 1, %s7547_s24   ;;  %s159_s28 = sadd.s32 1, %s7543_s23 }
   0x7   : > { %s156_s29 = ssub.s32 %s7547_s24, %s7616_s27  ;;  %p169_p0 = scmp.ne.s32.totalorder %s7543_s23, %s7539_s22 }
   0x8   : > { %p157_p1 = scmp.eq.s32.totalorder %s156_s29, 0  ;;  %p170_p2 = scmp.eq.s32.totalorder %s7612_s25, 1 }
   0x9   : > { %p175_p3 = scmp.ne.s32.totalorder %s7539_s22, %s7535_s21  ;;  %p176_p4 = scmp.eq.s32.totalorder %s6345_s26, 1 }
   0xa   : > { %s7627_s30 = scalar_select %p157_p1, %s7543_s23, %s159_s28  }
   0xb   : > { %p7629_p5 = por %p170_p2, %p169_p0  ;;  %p7633_p6 = por %p176_p4, %p175_p3 }
   0xc   : > { %p6346_p7 = scmp.ge.s32.totalorder %s7547_s24, 1  ;;  %p183_p8 = scmp.lt.s32.totalorder %s7547_s24, 3 }
   0xd   : > { %p7336_p9 = scmp.eq.s32.totalorder %s7612_s25, 0  ;;  %s194_s12 = sshll.u32 %s10241_s1, 4  ;;  %s195_s12 = int_to_ptr.hbm [resolvable:$true] %s194_s12 }
   0xe   : > { %p7640_p10 = pnand %p6346_p7, %p183_p8  ;;  %s7549_s13 = smov [#allocation2]  }
   0xf   : > { %s196_s14 = sshll.u32 %s7549_s13, 4  ;;  %s208_s17 = sshll.u32 %s10242_s2, 4  ;;  %s197_s14 = int_to_ptr.vmem [resolvable:$true] %s196_s14  ;;  %s209_s17 = int_to_ptr.hbm [resolvable:$true] %s208_s17 }
  0x10   : > { %p7325_p11 = pneg %p7640_p10  ;;  %s7550_s18 = smov 64  }
  0x11   : > { %s7551_s19 = smov 4   ;;  %s7552_s20 = smov [#allocation5]  }
  0x12   : > { %p7326_p12 = pnand %p7336_p9, %p7325_p11  ;;  %s210_s26 = sshll.u32 %s7552_s20, 4  ;;  %s211_s26 = int_to_ptr.vmem [resolvable:$true] %s210_s26 }
  0x13   : > { %244 = sbr.rel (%p7640_p10) target bundleno = 1839 (0x72f), region = 44 }
  0x14   : > { %7328 = dma.hbm_to_vmem [thread:$0]  (!%p7326_p12), %s195_s12, 9216, %s197_s14, [#allocation3], %s7550_s18, %s7550_s18, %s7551_s19  }
  0x15   : > { %7331 = dma.hbm_to_vmem [thread:$0]  (!%p7326_p12), %s209_s17, 9216, %s211_s26, [#allocation6], %s7550_s18, %s7550_s18, %s7551_s19  }
  0x18   : > { %7522 = dma.done.wait (%p7336_p9), [#allocation3], 9216  }
  0x19   : > { %7524 = vsyncadd (%p7336_p9), [#allocation3], 4294958080 }
  0x1a   : > { %7526 = dma.done.wait (%p7336_p9), [#allocation6], 9216  }
  0x1b   : > { %7528 = vsyncadd (%p7336_p9), [#allocation6], 4294958080  ;;  %s280_s28 = smul.u32 41, %s7612_s25  ;;  %v7049_v0 = vld [vmem:[#allocation2 + $0x78] sm:$0xff]  ;;  %v10247_v2 = vmov 0   ;;  %v7048_v3 = vld [vmem:[#allocation2 + $0x70] sm:$0xff] }
  0x1c   : > { %v7041_v1 = vld [vmem:[#allocation2 + $0x38] sm:$0xff]  ;;  %7380 = vset.pattern.permute.xlu0 %v10247_v2  ;;  %7381 = vset.pattern.permute.xlu1 %v10247_v2  ;;  %v7040_v4 = vld [vmem:[#allocation2 + $0x30] sm:$0xff]  ;;  %v7047_v5 = vld [vmem:[#allocation2 + $0x68] sm:$0xff]  ;;  %vm646_vm0 = vcmask 1040384   ;;  %vm427_vm1 = vsmask.f32 1280 }
  0x1d   : > { %p281_p13 = scmp.lt.s32.totalorder %s280_s28, 81  ;;  %7382 = vset.pattern.permute.xlu2 %v10247_v2  ;;  %775 = vmatpush.bf16.msra.mxu0 %v7049_v0  ;;  %v7039_v6 = vld [vmem:[#allocation2 + $0x28] sm:$0xff]  ;;  %v7046_v7 = vld [vmem:[#allocation2 + $0x60] sm:$0xff]  ;;  %v7045_v9 = vld [vmem:[#allocation2 + $0x58] sm:$0xff]  ;;  %vm627_vm2 = vcmask 1041408   ;;  %v10390_v54 = vmov 0 }
  0x1e   : > { %7298 = vmatpush.bf16.msra.mxu2 %v7049_v0  ;;  %936 = vmatpush.bf16.msra.mxu1 %v7041_v1  ;;  %v7038_v8 = vld [vmem:[#allocation2 + $0x20] sm:$0xff]  ;;  %v7037_v10 = vld [vmem:[#allocation2 + $0x18] sm:$0xff]  ;;  %v7044_v13 = vld [vmem:[#allocation2 + $0x50] sm:$0xff]  ;;  %v10393_v56 = vmov 0  ;;  %vm1049_vm5 = vsmask.f32 256 }
  0x1f   : > { %7306 = vmatpush.bf16.msra.mxu3 %v7041_v1  ;;  %s10797_s28 = smov (!%p281_p13, %s280_s28), 81  ;;  %v7036_v14 = vld [vmem:[#allocation2 + $0x10] sm:$0xff]  ;;  %v7043_v19 = vld [vmem:[#allocation2 + $0x48] sm:$0xff]  ;;  %v7042_v25 = vld [vmem:[#allocation2 + $0x40] sm:$0xff]  ;;  %vm1833_vm7 = vsmask.f32 7424 }
  0x20   : > { %s6353_s29 = sshll.u32 %s10797_s28, 2  ;;  %v7035_v20 = vld [vmem:[#allocation2 + $0x8] sm:$0xff]  ;;  %v7034_v28 = vld [vmem:[#allocation2] sm:$0xff]  ;;  %v7073_v31 = vld [vmem:[#allocation2 + $0x138] sm:$0xff]  ;;  %vm1917_vm8 = vcmask 1043456   ;;  %vm2359_vm10 = vcmask 1046528  }
  0x21   : > { %776 = vmatpush.bf16.msra.mxu0 %v7048_v3  ;;  %s7671_s11 = scalar_lea.vmem %s10240_s0, %s6353_s29  ;;  %v7057_v32 = vld [vmem:[#allocation2 + $0xb8] sm:$0xff]  ;;  %v7072_v38 = vld [vmem:[#allocation2 + $0x130] sm:$0xff]  ;;  %v7071_v45 = vld [vmem:[#allocation2 + $0x128] sm:$0xff]  ;;  %vm1918_vm9 = vsmask.f32 3328  ;;  %vm2418_vm13 = vcmask 1042432  }
  0x22   : > { %7299 = vmatpush.bf16.msra.mxu2 %v7048_v3  ;;  %937 = vmatpush.bf16.msra.mxu1 %v7040_v4  ;;  %v7674_v11 = vld [vmem:[%s7671_s11 + $0x48] sm:$0xff]  ;;  %v7677_v12 = vld [vmem:[%s7671_s11 + $0x50] sm:$0xff]  ;;  %v7065_v35 = vld [vmem:[#allocation2 + $0xf8] sm:$0xff]  ;;  %vm2641_vm12 = vsmask.f32 6400  ;;  %s277_s16 = sand.u32 1, %s7539_s22  }
  0x23   : > { %7307 = vmatpush.bf16.msra.mxu3 %v7040_v4  ;;  %v7680_v15 = vshrl.u32 %v7674_v11, 16  ;;  %v7683_v16 = vshll.u32 %v7674_v11, 16  ;;  %v7686_v17 = vshrl.u32 %v7677_v12, 16  ;;  %v7689_v18 = vshll.u32 %v7677_v12, 16  ;;  %v7705_v36 = vld [vmem:[%s7671_s11] sm:$0xff]  ;;  %v7026_v37 = vld [vmem:[%s7671_s11 + $0x58] sm:$0xff]  ;;  %vm7725_vm3 = vmand %vm627_vm2, %vm427_vm1 }
  0x24   : > { %v10249_v26 = vrot.slane %v7674_v11, 7  ;;  %v666_v27 = vrot.slane %v7677_v12, 7  ;;  %v7056_v39 = vld [vmem:[#allocation2 + $0xb0] sm:$0xff]  ;;  %v7711_v40 = vshrl.u32 %v7705_v36, 16  ;;  %v7714_v41 = vshll.u32 %v7705_v36, 16  ;;  %v7055_v46 = vld [vmem:[#allocation2 + $0xa8] sm:$0xff]  ;;  %vm7731_vm4 = vmneg %vm646_vm0 }
  0x25   : > { %777 = vmatpush.bf16.msra.mxu0 %v7047_v5  ;;  %v511_v21 = vrot.slane %v7680_v15, 6  ;;  %v514_v22 = vrot.slane %v7683_v16, 7  ;;  %v520_v23 = vrot.slane %v7686_v17, 6  ;;  %v523_v24 = vrot.slane %v7689_v18, 7  ;;  %v7064_v44 = vld [vmem:[#allocation2 + $0xf0] sm:$0xff]  ;;  %v7740_v60 = vld [vmem:[%s7671_s11 + $0x8] sm:$0xff]  ;;  %vm7960_vm6 = vmand %vm646_vm0, %vm1049_vm5 }
  0x26   : > { %7300 = vmatpush.bf16.msra.mxu2 %v7047_v5  ;;  %938 = vmatpush.bf16.msra.mxu1 %v7039_v6  ;;  %v667_v33 = vsel %vm646_vm0, %v10249_v26, %v666_v27  ;;  %v7716_v42 = vshrl.u32 %v7026_v37, 16  ;;  %v7718_v43 = vshll.u32 %v7026_v37, 16  ;;  %v431_v47 = vrot.slane %v7711_v40, 6  ;;  %v7027_v61 = vld [vmem:[%s7671_s11 + $0x60] sm:$0xff]  ;;  %v7063_v62 = vld [vmem:[#allocation2 + $0xe8] sm:$0xff]  ;;  %v7888_v26 = vld [vmem:[%s7671_s11 + $0x90] sm:$0xff] }
  0x27   : > { %7308 = vmatpush.bf16.msra.mxu3 %v7039_v6  ;;  %v7697_v29 = vor.u32 %v514_v22, %v511_v21  ;;  %v524_v30 = vor.u32 %v523_v24, %v520_v23  ;;  %v434_v48 = vrot.slane %v7714_v41, 7  ;;  %v668_v51 = vrot.slane %v7026_v37, 7  ;;  %v7765_v21 = vld [vmem:[%s7671_s11 + $0x10] sm:$0xff]  ;;  %v7028_v22 = vld [vmem:[%s7671_s11 + $0x68] sm:$0xff]  ;;  %v7054_v23 = vld [vmem:[#allocation2 + $0xa0] sm:$0xff]  ;;  %s7314_s17 = smul.u32 164, %s277_s16 }
  0x28   : > { %v529_v49 = vrot.slane %v7716_v42, 6  ;;  %v532_v50 = vrot.slane %v7718_v43, 7  ;;  %v10391_v54 = vsel %vm7725_vm3, 4294967295, %v10390_v54  ;;  %v647_v55 = vrot.slane %v7705_v36, 7  ;;  %v7070_v24 = vld [vmem:[#allocation2 + $0x120] sm:$0xff]  ;;  %vm8441_vm11 = vmand %vm1917_vm8, %vm1918_vm9  ;;  %s7178_s19 = smul.u32 164, %s7612_s25 }
  0x29   : > { %778 = vmatpush.bf16.msra.mxu0 %v7046_v7  ;;  %v525_v34 = vsel %vm427_vm1, %v7697_v29, %v524_v30  ;;  %v435_v52 = vor.u32 %v434_v48, %v431_v47  ;;  %10392 = vst [vmem:[#allocation11_spill] sm:$0xff] %v10391_v54  ;;  %v10394_v56 = vsel %vm7731_vm4, 4294967295, %v10393_v56  ;;  %v669_v57 = vsel %vm646_vm0, %v666_v27, %v668_v51  ;;  %s9999_s18 = scalar_lea.vmem [#allocation7], %s7314_s17  ;;  %s6246_s25 = scalar_lea.sflag [#allocation4], %s277_s16 }
  0x2a   : > { %7301 = vmatpush.bf16.msra.mxu2 %v7046_v7  ;;  %939 = vmatpush.bf16.msra.mxu1 %v7038_v8  ;;  %v533_v53 = vor.u32 %v532_v50, %v529_v49  ;;  %10395 = vst [vmem:[#allocation12_spill] sm:$0xff] %v10394_v56  ;;  %v7746_v63 = vshrl.u32 %v7740_v60, 16  ;;  %v7749_v0 = vshll.u32 %v7740_v60, 16  ;;  %v7751_v1 = vshrl.u32 %v7027_v61, 16  ;;  %v7788_v49 = vld [vmem:[%s7671_s11 + $0x18] sm:$0xff]  ;;  %v7029_v50 = vld [vmem:[%s7671_s11 + $0x70] sm:$0xff]  ;;  %s6257_s28 = scalar_lea.hbm %s10246_s6, %s7178_s19 }
  0x2b   : > { %7309 = vmatpush.bf16.msra.mxu3 %v7038_v8  ;;  %v629_v58 = vsel %vm7725_vm3, 0, %v435_v52  ;;  %v7753_v3 = vshll.u32 %v7027_v61, 16  ;;  %v648_v8 = vrot.slane %v7740_v60, 7  ;;  %v7769_v27 = vshrl.u32 %v7765_v21, 16  ;;  %s6258_s29 = sshll.u32 %s9999_s18, 4  ;;  %s6260_s9 = sshll.u32 %s6257_s28, 4  ;;  %s6259_s29 = int_to_ptr.vmem [resolvable:$true] %s6258_s29  ;;  %s6261_s9 = int_to_ptr.hbm [resolvable:$true] %s6260_s9 }
  0x2c   : > { %v534_v59 = vsel %vm427_vm1, %v524_v30, %v533_v53  ;;  %v439_v4 = vrot.slane %v7746_v63, 6  ;;  %v442_v5 = vrot.slane %v7749_v0, 7  ;;  %v538_v6 = vrot.slane %v7751_v1, 6  ;;  %s7497_s14 = scalar_lea.hbm %s10246_s6, 328 }
  0x2d   : > { %779 = vmatpush.bf16.msra.mxu0 %v7045_v9  ;;  %10396 = vst [vmem:[#allocation13_spill] sm:$0xff] %v7753_v3  ;;  %v541_v7 = vrot.slane %v7753_v3, 7  ;;  %v7774_v30 = vshrl.u32 %v7028_v22, 16  ;;  %v650_v37 = vrot.slane %v7765_v21, 7  ;;  %vm2742_vm14 = vsmask.f32 2304 }
  0x2e   : > { %7302 = vmatpush.bf16.msra.mxu2 %v7045_v9  ;;  %940 = vmatpush.bf16.msra.mxu1 %v7037_v10  ;;  %v670_v9 = vrot.slane %v7027_v61, 7  ;;  %vm9020_vm15 = vmand %vm2418_vm13, %vm2742_vm14 }
  0x2f   : > { %7310 = vmatpush.bf16.msra.mxu3 %v7037_v10  ;;  %v443_v10 = vor.u32 %v442_v5, %v439_v4  ;;  %v542_v12 = vor.u32 %v541_v7, %v538_v6  ;;  %10397 = vst [vmem:[#allocation14_spill] sm:$0xff] %v7774_v30  ;;  %v652_v6 = vrot.slane %v7788_v49, 7  ;;  %v674_v7 = vrot.slane %v7029_v50, 7 }
  0x31   : > { %780 = vmatpush.bf16.msra.mxu0 %v7044_v13 }
  0x32   : > { %7303 = vmatpush.bf16.msra.mxu2 %v7044_v13  ;;  %941 = vmatpush.bf16.msra.mxu1 %v7036_v14  ;;  %v649_v13 = vsel %vm646_vm0, %v647_v55, %v648_v8 }
  0x33   : > { %7311 = vmatpush.bf16.msra.mxu3 %v7036_v14  ;;  %v671_v14 = vsel %vm646_vm0, %v668_v51, %v670_v9  ;;  %v7053_v51 = vld [vmem:[#allocation2 + $0x98] sm:$0xff] }
  0x35   : > { %781 = vmatpush.bf16.msra.mxu0 %v7043_v19 }
  0x36   : > { %7304 = vmatpush.bf16.msra.mxu2 %v7043_v19  ;;  %942 = vmatpush.bf16.msra.mxu1 %v7035_v20  ;;  %v444_v19 = vsel %vm427_vm1, %v435_v52, %v443_v10  ;;  %v7061_v52 = vld [vmem:[#allocation2 + $0xd8] sm:$0xff] }
  0x37   : > { %7312 = vmatpush.bf16.msra.mxu3 %v7035_v20  ;;  %v543_v20 = vsel %vm427_vm1, %v533_v53, %v542_v12  ;;  %v7069_v53 = vld [vmem:[#allocation2 + $0x118] sm:$0xff] }
  0x39   : > { %782 = vmatpush.bf16.msra.mxu0 %v7042_v25 }
  0x3a   : > { %7305 = vmatpush.bf16.msra.mxu2 %v7042_v25  ;;  %943 = vmatpush.bf16.msra.mxu1 %v7034_v28  ;;  %v7062_v25 = vld [vmem:[#allocation2 + $0xe0] sm:$0xff] }
  0x3b   : > { %7313 = vmatpush.bf16.msra.mxu3 %v7034_v28  ;;  %v7772_v28 = vshll.u32 %v7765_v21, 16 }
  0x3c   : > { %783 = vmatmul.bf16.vlgmr.msra.gmra.mxu0 %v10247_v2 }
  0x3d   : > { %1679 = vmatpush.bf16.msrb.mxu0 %v7073_v31  ;;  %838 = vmatmul.bf16.vlgmr.msra.gmra.mxu2 %v667_v33  ;;  %v7776_v31 = vshll.u32 %v7028_v22, 16  ;;  %v451_v33 = vrot.slane %v7772_v28, 7 }
  0x3e   : > { %1196 = vmatpush.bf16.msrb.mxu2 %v7057_v32  ;;  %944 = vmatmul.bf16.vlgmr.msra.gmra.mxu1 %v10247_v2  ;;  %v448_v32 = vrot.slane %v7769_v27, 6  ;;  %v7885_v2 = vld [vmem:[%s7671_s11 + $0x38] sm:$0xff] }
  0x3f   : > { %999 = vmatmul.bf16.vlgmr.msra.gmra.mxu3 %v525_v34  ;;  %10398 = vst [vmem:[#allocation15_spill] sm:$0xff] %v7776_v31  ;;  %v547_v34 = vrot.slane %v7774_v30, 6 }
  0x40   : > { %1439 = vmatpush.bf16.msrb.mxu3 %v7065_v35  ;;  %v550_v35 = vrot.slane %v7776_v31, 7 }
  0x41   : > { %1680 = vmatpush.bf16.msrb.mxu0 %v7072_v38  ;;  %v672_v38 = vrot.slane %v7028_v22, 7  ;;  %v7052_v22 = vld [vmem:[#allocation2 + $0x90] sm:$0xff] }
  0x42   : > { %1197 = vmatpush.bf16.msrb.mxu2 %v7056_v39  ;;  %v452_v39 = vor.u32 %v451_v33, %v448_v32 }
  0x44   : > { %1440 = vmatpush.bf16.msrb.mxu3 %v7064_v44  ;;  %v551_v44 = vor.u32 %v550_v35, %v547_v34  ;;  %v453_v47 = vsel %vm427_vm1, %v443_v10, %v452_v39  ;;  %v653_v10 = vsel %vm646_vm0, %v650_v37, %v652_v6 }
  0x45   : > { %1681 = vmatpush.bf16.msrb.mxu0 %v7071_v45  ;;  %v651_v45 = vsel %vm646_vm0, %v648_v8, %v650_v37 }
  0x46   : > { %1198 = vmatpush.bf16.msrb.mxu2 %v7055_v46  ;;  %v673_v46 = vsel %vm646_vm0, %v670_v9, %v672_v38  ;;  %v552_v48 = vsel %vm427_vm1, %v542_v12, %v551_v44  ;;  %v675_v12 = vsel %vm646_vm0, %v672_v38, %v674_v7 }
  0x48   : > { %1441 = vmatpush.bf16.msrb.mxu3 %v7063_v62 }
  0x49   : > { %1682 = vmatpush.bf16.msrb.mxu0 %v7070_v24  ;;  %v7068_v24 = vld [vmem:[#allocation2 + $0x110] sm:$0xff] }
  0x4a   : > { %1199 = vmatpush.bf16.msrb.mxu2 %v7054_v23  ;;  %v7060_v23 = vld [vmem:[#allocation2 + $0xd0] sm:$0xff] }
  0x4c   : > { %6463 = vmatmul.msk.bf16.gmra.mxu0 %vm7731_vm4, %v647_v55  ;;  %1442 = vmatpush.bf16.msrb.mxu3 %v7062_v25  ;;  %v7792_v55 = vshrl.u32 %v7788_v49, 16 }
  0x4d   : > { %843 = vmatmul.bf16.gmra.mxu2 %v669_v57  ;;  %v7795_v57 = vshll.u32 %v7788_v49, 16  ;;  %1683 = vmatpush.bf16.msrb.mxu0 %v7069_v53  ;;  %v7834_v53 = vld [vmem:[%s7671_s11 + $0x28] sm:$0xff] }
  0x4e   : > { %949 = vmatmul.bf16.gmra.mxu1 %v629_v58  ;;  %v7797_v58 = vshrl.u32 %v7029_v50, 16  ;;  %1200 = vmatpush.bf16.msrb.mxu2 %v7053_v51  ;;  %v457_v61 = vrot.slane %v7792_v55, 6 }
  0x4f   : > { %1004 = vmatmul.bf16.gmra.mxu3 %v534_v59  ;;  %10399 = vst [vmem:[#allocation16_spill] sm:$0xff] %v7795_v57  ;;  %v7799_v59 = vshll.u32 %v7029_v50, 16  ;;  %v460_v62 = vrot.slane %v7795_v57, 7 }
  0x50   : > { %10400 = vst [vmem:[#allocation17_spill] sm:$0xff] %v7797_v58  ;;  %1443 = vmatpush.bf16.msrb.mxu3 %v7061_v52  ;;  %v556_v4 = vrot.slane %v7797_v58, 6 }
  0x51   : > { %10401 = vst [vmem:[#allocation18_spill] sm:$0xff] %v7799_v59  ;;  %v559_v5 = vrot.slane %v7799_v59, 7  ;;  %v461_v8 = vor.u32 %v460_v62, %v457_v61  ;;  %1684 = vmatpush.bf16.msrb.mxu0 %v7068_v24  ;;  %v7031_v61 = vld [vmem:[%s7671_s11 + $0x80] sm:$0xff]  ;;  %v7838_v62 = vshrl.u32 %v7834_v53, 16  ;;  %v7075_v59 = vld [vmem:[#allocation2 + $0x148] sm:$0xff] }
  0x52   : > { %1201 = vmatpush.bf16.msrb.mxu2 %v7052_v22 }
  0x53   : > { %v560_v9 = vor.u32 %v559_v5, %v556_v4  ;;  %v7841_v4 = vshll.u32 %v7834_v53, 16  ;;  %v7843_v5 = vshrl.u32 %v7031_v61, 16 }
  0x54   : > { %1444 = vmatpush.bf16.msrb.mxu3 %v7060_v23 }
  0x55   : > { %10405 = vst [vmem:[#allocation22_spill] sm:$0xff] %v7841_v4 }
  0x56   : > { %10406 = vst [vmem:[#allocation23_spill] sm:$0xff] %v7843_v5 }
  0x5c   : > { %793 = vmatmul.bf16.gmra.mxu0 %v649_v13  ;;  %v462_v13 = vsel %vm427_vm1, %v452_v39, %v461_v8 }
  0x5d   : > { %848 = vmatmul.bf16.gmra.mxu2 %v671_v14  ;;  %v561_v14 = vsel %vm427_vm1, %v551_v44, %v560_v9 }
  0x5e   : > { %954 = vmatmul.bf16.gmra.mxu1 %v444_v19  ;;  %v7811_v19 = vld [vmem:[%s7671_s11 + $0x20] sm:$0xff] }
  0x5f   : > { %1009 = vmatmul.bf16.gmra.mxu3 %v543_v20  ;;  %v7030_v20 = vld [vmem:[%s7671_s11 + $0x78] sm:$0xff]  ;;  %v7815_v25 = vshrl.u32 %v7811_v19, 16  ;;  %v7818_v32 = vshll.u32 %v7811_v19, 16  ;;  %v654_v44 = vrot.slane %v7811_v19, 7 }
  0x60   : > { %v7820_v33 = vshrl.u32 %v7030_v20, 16  ;;  %v7822_v34 = vshll.u32 %v7030_v20, 16 }
  0x61   : > { %10402 = vst [vmem:[#allocation19_spill] sm:$0xff] %v7818_v32  ;;  %v466_v35 = vrot.slane %v7815_v25, 6  ;;  %v469_v37 = vrot.slane %v7818_v32, 7 }
  0x62   : > { %10403 = vst [vmem:[#allocation20_spill] sm:$0xff] %v7820_v33  ;;  %v565_v38 = vrot.slane %v7820_v33, 6  ;;  %v568_v39 = vrot.slane %v7822_v34, 7 }
  0x63   : > { %10404 = vst [vmem:[#allocation21_spill] sm:$0xff] %v7822_v34  ;;  %v7097_v34 = vld [vmem:[#allocation2 + $0x1f8] sm:$0xff] }
  0x6c   : > { %798 = vmatmul.bf16.gmra.mxu0 %v651_v45  ;;  %v676_v45 = vrot.slane %v7030_v20, 7 }
  0x6d   : > { %853 = vmatmul.bf16.gmra.mxu2 %v673_v46  ;;  %v470_v46 = vor.u32 %v469_v37, %v466_v35  ;;  %v7857_v37 = vld [vmem:[%s7671_s11 + $0x30] sm:$0xff] }
  0x6e   : > { %959 = vmatmul.bf16.gmra.mxu1 %v453_v47  ;;  %v569_v47 = vor.u32 %v568_v39, %v565_v38  ;;  %v677_v50 = vsel %vm646_vm0, %v674_v7, %v676_v45  ;;  %v475_v7 = vrot.slane %v7838_v62, 6  ;;  %v7860_v38 = vld [vmem:[%s7671_s11 + $0x88] sm:$0xff] }
  0x6f   : > { %1014 = vmatmul.bf16.gmra.mxu3 %v552_v48  ;;  %v655_v48 = vsel %vm646_vm0, %v652_v6, %v654_v44  ;;  %v471_v51 = vsel %vm427_vm1, %v461_v8, %v470_v46  ;;  %v7845_v6 = vshll.u32 %v7031_v61, 16  ;;  %v478_v8 = vrot.slane %v7841_v4, 7  ;;  %v7051_v39 = vld [vmem:[#allocation2 + $0x88] sm:$0xff] }
  0x70   : > { %v570_v52 = vsel %vm427_vm1, %v560_v9, %v569_v47  ;;  %v574_v9 = vrot.slane %v7843_v5, 6  ;;  %1202 = vmatpush.bf16.msrb.mxu2 %v7051_v39  ;;  %v7916_v5 = vld [vmem:[%s7671_s11 + $0x40] sm:$0xff] }
  0x71   : > { %10407 = vst [vmem:[#allocation24_spill] sm:$0xff] %v7845_v6 }
  0x7c   : > { %803 = vmatmul.bf16.gmra.mxu0 %v653_v10  ;;  %v577_v10 = vrot.slane %v7845_v6, 7 }
  0x7d   : > { %858 = vmatmul.bf16.gmra.mxu2 %v675_v12  ;;  %v656_v12 = vrot.slane %v7834_v53, 7 }
  0x7e   : > { %964 = vmatmul.bf16.gmra.mxu1 %v462_v13  ;;  %v678_v13 = vrot.slane %v7031_v61, 7  ;;  %v578_v20 = vor.u32 %v577_v10, %v574_v9  ;;  %v658_v9 = vrot.slane %v7857_v37, 7  ;;  %v680_v10 = vrot.slane %v7860_v38, 7 }
  0x7f   : > { %1019 = vmatmul.bf16.gmra.mxu3 %v561_v14  ;;  %v479_v14 = vor.u32 %v478_v8, %v475_v7  ;;  %v657_v22 = vsel %vm646_vm0, %v654_v44, %v656_v12  ;;  %v7866_v44 = vshll.u32 %v7857_v37, 16  ;;  %v7081_v8 = vld [vmem:[#allocation2 + $0x178] sm:$0xff] }
  0x80   : > { %v679_v23 = vsel %vm646_vm0, %v676_v45, %v678_v13  ;;  %v579_v35 = vsel %vm427_vm1, %v569_v47, %v578_v20  ;;  %v7869_v45 = vshrl.u32 %v7860_v38, 16  ;;  %v7067_v47 = vld [vmem:[#allocation2 + $0x108] sm:$0xff]  ;;  %1986 = vmatpush.bf16.msrb.mxu1 %v7081_v8  ;;  %v7080_v8 = vld [vmem:[#allocation2 + $0x170] sm:$0xff] }
  0x81   : > { %v480_v24 = vsel %vm427_vm1, %v470_v46, %v479_v14  ;;  %10408 = vst [vmem:[#allocation25_spill] sm:$0xff] %v7866_v44  ;;  %v7872_v46 = vshll.u32 %v7860_v38, 16  ;;  %1685 = vmatpush.bf16.msrb.mxu0 %v7067_v47  ;;  %v7050_v38 = vld [vmem:[#allocation2 + $0x80] sm:$0xff]  ;;  %v7891_v47 = vshrl.u32 %v7885_v2, 16 }
  0x82   : > { %10409 = vst [vmem:[#allocation26_spill] sm:$0xff] %v7869_v45  ;;  %v583_v61 = vrot.slane %v7869_v45, 6  ;;  %1203 = vmatpush.bf16.msrb.mxu2 %v7050_v38 }
  0x83   : > { %10410 = vst [vmem:[#allocation27_spill] sm:$0xff] %v7872_v46  ;;  %v586_v7 = vrot.slane %v7872_v46, 7  ;;  %v7079_v46 = vld [vmem:[#allocation2 + $0x168] sm:$0xff] }
  0x84   : > { %10411 = vst [vmem:[#allocation28_spill] sm:$0xff] %v7891_v47  ;;  %1987 = vmatpush.bf16.msrb.mxu1 %v7080_v8 }
  0x88   : > { %1988 = vmatpush.bf16.msrb.mxu1 %v7079_v46  ;;  %v7925_v46 = vshrl.u32 %v7916_v5, 16 }
  0x8c   : > { %808 = vmatmul.bf16.gmra.mxu0 %v655_v48  ;;  %v7059_v48 = vld [vmem:[#allocation2 + $0xc8] sm:$0xff] }
  0x8d   : > { %863 = vmatmul.bf16.gmra.mxu2 %v677_v50  ;;  %v7863_v50 = vshrl.u32 %v7857_v37, 16  ;;  %1445 = vmatpush.bf16.msrb.mxu3 %v7059_v48 }
  0x8e   : > { %969 = vmatmul.bf16.gmra.mxu1 %v471_v51 }
  0x8f   : > { %1024 = vmatmul.bf16.gmra.mxu3 %v570_v52  ;;  %v484_v51 = vrot.slane %v7863_v50, 6  ;;  %v487_v52 = vrot.slane %v7866_v44, 7 }
  0x9c   : > { %813 = vmatmul.bf16.gmra.mxu0 %v657_v22  ;;  %v488_v22 = vor.u32 %v487_v52, %v484_v51  ;;  %v493_v51 = vrot.slane %v7891_v47, 6 }
  0x9d   : > { %868 = vmatmul.bf16.gmra.mxu2 %v679_v23  ;;  %v587_v23 = vor.u32 %v586_v7, %v583_v61 }
  0x9e   : > { %974 = vmatmul.bf16.gmra.mxu1 %v480_v24  ;;  %v659_v24 = vsel %vm646_vm0, %v656_v12, %v658_v9  ;;  %v489_v39 = vsel %vm427_vm1, %v479_v14, %v488_v22  ;;  %v7894_v12 = vshll.u32 %v7885_v2, 16  ;;  %v7900_v14 = vshll.u32 %v7888_v26, 16 }
  0x9f   : > { %1029 = vmatmul.bf16.gmra.mxu3 %v579_v35  ;;  %v681_v35 = vsel %vm646_vm0, %v678_v13, %v680_v10  ;;  %v588_v48 = vsel %vm427_vm1, %v578_v20, %v587_v23  ;;  %v7897_v13 = vshrl.u32 %v7888_v26, 16  ;;  %v7058_v20 = vld [vmem:[#allocation2 + $0xc0] sm:$0xff] }
  0xa0   : > { %10412 = vst [vmem:[#allocation29_spill] sm:$0xff] %v7894_v12  ;;  %v496_v52 = vrot.slane %v7894_v12, 7  ;;  %v595_v7 = vrot.slane %v7900_v14, 7  ;;  %1446 = vmatpush.bf16.msrb.mxu3 %v7058_v20 }
  0xa1   : > { %10413 = vst [vmem:[#allocation30_spill] sm:$0xff] %v7897_v13  ;;  %v592_v61 = vrot.slane %v7897_v13, 6 }
  0xa2   : > { %10414 = vst [vmem:[#allocation31_spill] sm:$0xff] %v7900_v14  ;;  %v497_v38 = vor.u32 %v496_v52, %v493_v51  ;;  %v7078_v51 = vld [vmem:[#allocation2 + $0x160] sm:$0xff] }
  0xa3   : > { %v596_v54 = vor.u32 %v595_v7, %v592_v61  ;;  %1989 = vmatpush.bf16.msrb.mxu1 %v7078_v51 }
  0xa4   : > { %v498_v6 = vsel %vm427_vm1, %v488_v22, %v497_v38  ;;  %2487 = vmatpush.bf16.msra.mxu3 %v7097_v34 }
  0xa5   : > { %v597_v8 = vsel %vm427_vm1, %v587_v23, %v596_v54  ;;  %v7077_v23 = vld [vmem:[#allocation2 + $0x158] sm:$0xff] }
  0xa7   : > { %1990 = vmatpush.bf16.msrb.mxu1 %v7077_v23 }
  0xac   : > { %818 = vmatmul.bf16.gmra.mxu0 %v659_v24  ;;  %v326_v24 = vld [vmem:[%s7671_s11 + $0x98] sm:$0xf] }
  0xad   : > { %873 = vmatmul.bf16.gmra.mxu2 %v681_v35  ;;  %v7066_v35 = vld [vmem:[#allocation2 + $0x100] sm:$0xff]  ;;  %v7909_v56 = vunpack.c.l.b16 %v326_v24 }
  0xae   : > { %979 = vmatmul.bf16.gmra.mxu1 %v489_v39  ;;  %v660_v39 = vrot.slane %v7885_v2, 7  ;;  %1686 = vmatpush.bf16.msrb.mxu0 %v7066_v35 }
  0xaf   : > { %1034 = vmatmul.bf16.gmra.mxu3 %v588_v48  ;;  %v682_v48 = vrot.slane %v7888_v26, 7  ;;  %10415 = vst [vmem:[#allocation32_spill] sm:$0xff] %v7909_v56  ;;  %v7920_v26 = vpack.c.b16 %v7909_v56, %v7909_v56  ;;  %v7089_v56 = vld [vmem:[#allocation2 + $0x1b8] sm:$0xff] }
  0xb0   : > { %v661_v14 = vsel %vm646_vm0, %v658_v9, %v660_v39  ;;  %v7928_v9 = vshll.u32 %v7916_v5, 16  ;;  %2205 = vmatpush.bf16.msra.mxu2 %v7089_v56  ;;  %v7074_v56 = vld [vmem:[#allocation2 + $0x140] sm:$0xff] }
  0xb1   : > { %v683_v45 = vsel %vm646_vm0, %v680_v10, %v682_v48  ;;  %10416 = vst [vmem:[#allocation33_spill] sm:$0xff] %v7920_v26  ;;  %v10271_v10 = vshrl.u32 %v7920_v26, 16  ;;  %v10276_v22 = vshll.u32 %v7920_v26, 16 }
  0xb2   : > { %10417 = vst [vmem:[#allocation34_spill] sm:$0xff] %v7928_v9  ;;  %v505_v24 = vrot.slane %v7928_v9, 7 }
  0xb3   : > { %v601_v35 = vrot.slane %v10271_v10, 6 }
  0xb9   : > { %v784_v13 = vpop.f32.mrf.mxu0 }
  0xbb   : > { %v945_v20 = vpop.f32.mrf.mxu1 }
  0xbc   : > { %v7922_v52 = vadd.f32 %v945_v20, %v784_v13  ;;  %823 = vmatmul.bf16.gmra.mxu0 %v661_v14  ;;  %v604_v20 = vrot.slane %v10276_v22, 7 }
  0xbd   : > { %878 = vmatmul.bf16.gmra.mxu2 %v683_v45 }
  0xbe   : > { %984 = vmatmul.bf16.gmra.mxu1 %v498_v6  ;;  %v502_v6 = vrot.slane %v7925_v46, 6  ;;  %v605_v33 = vor.u32 %v604_v20, %v601_v35  ;;  %v10422_v20 = vrot.slane %v7674_v11, 7 }
  0xbf   : > { %1039 = vmatmul.bf16.gmra.mxu3 %v597_v8  ;;  %v7076_v8 = vld [vmem:[#allocation2 + $0x150] sm:$0xff] }
  0xc0   : > { %v839_v61 = vpop.f32.mrf.mxu2  ;;  %1991 = vmatpush.bf16.msrb.mxu1 %v7076_v8 }
  0xc1   : > { %v786_v14 = vpop.f32.mrf.mxu0 }
  0xc2   : > { %v1000_v7 = vpop.f32.mrf.mxu3 }
  0xc3   : > { %v7932_v13 = vadd.f32 %v1000_v7, %v839_v61  ;;  %v947_v45 = vpop.f32.mrf.mxu1  ;;  %v662_v61 = vrot.slane %v7916_v5, 7  ;;  %v684_v7 = vrot.slane %v7920_v26, 7  ;;  %v606_v26 = vsel %vm427_vm1, %v596_v54, %v605_v33 }
  0xc4   : > { %v7940_v51 = vadd.f32 %v947_v45, %v786_v14  ;;  %1992 = vmatpush.bf16.msrb.mxu1 %v7075_v59 }
  0xc5   : > { %10418 = vst [vmem:[#allocation35_spill] sm:$0xff] %v7932_v13  ;;  %v506_v13 = vor.u32 %v505_v24, %v502_v6  ;;  %v663_v14 = vsel %vm646_vm0, %v660_v39, %v662_v61  ;;  %v685_v45 = vsel %vm646_vm0, %v682_v48, %v684_v7  ;;  %v665_v8 = vsel %vm646_vm0, %v662_v61, %v10422_v20 }
  0xc7   : > { %v507_v30 = vsel %vm427_vm1, %v497_v38, %v506_v13  ;;  %v1050_v38 = vrot.slane %v7711_v40, 7 }
  0xc8   : > { %v841_v10 = vpop.f32.mrf.mxu2  ;;  %1993 = vmatpush.bf16.msrb.mxu1 %v7074_v56  ;;  %v10423_v56 = vmov 0  }
  0xc9   : > { %v789_v23 = vpop.f32.mrf.mxu0  ;;  %v1051_v59 = vor.u32 %v1050_v38, %v7714_v41 }
  0xca   : > { %v1002_v58 = vpop.f32.mrf.mxu3 }
  0xcb   : > { %v7944_v31 = vadd.f32 %v1002_v58, %v841_v10  ;;  %v950_v22 = vpop.f32.mrf.mxu1  ;;  %v7105_v58 = vld [vmem:[#allocation2 + $0x238] sm:$0xff] }
  0xcc   : > { %v7950_v34 = vadd.f32 %v950_v22, %v789_v23  ;;  %828 = vmatmul.bf16.gmra.mxu0 %v663_v14  ;;  %v516_v23 = vsel %vm427_vm1, %v506_v13, %v7697_v29  ;;  %v1130_v14 = vsel %vm7960_vm6, 0, %v1051_v59  ;;  %v1834_v29 = vrot.slane %v7714_v41, 1 }
  0xcd   : > { %883 = vmatmul.bf16.gmra.mxu2 %v685_v45  ;;  %2810 = vmatpush.bf16.msra.mxu0 %v7105_v58 }
  0xce   : > { %989 = vmatmul.bf16.gmra.mxu1 %v507_v30  ;;  %v10419_v30 = vmov 0  ;;  %v1835_v59 = vor.u32 %v1834_v29, %v7711_v40  ;;  %v7088_v40 = vld [vmem:[#allocation2 + $0x1b0] sm:$0xff] }
  0xcf   : > { %1044 = vmatmul.bf16.gmra.mxu3 %v606_v26  ;;  %v10420_v30 = vsel %vm7960_vm6, 4294967295, %v10419_v30  ;;  %2206 = vmatpush.bf16.msra.mxu2 %v7088_v40 }
  0xd0   : > { %v844_v10 = vpop.f32.mrf.mxu2  ;;  %10421 = vst [vmem:[#allocation36_spill] sm:$0xff] %v10420_v30 }
  0xd1   : > { %v791_v48 = vpop.f32.mrf.mxu0 }
  0xd2   : > { %v1005_v39 = vpop.f32.mrf.mxu3 }
  0xd3   : > { %v7952_v6 = vadd.f32 %v1005_v39, %v844_v10  ;;  %v952_v24 = vpop.f32.mrf.mxu1 }
  0xd4   : > { %v7955_v54 = vadd.f32 %v952_v24, %v791_v48  ;;  %v1052_v48 = vrot.slane %v7746_v63, 7 }
  0xd6   : > { %v1053_v24 = vor.u32 %v1052_v48, %v7749_v0 }
  0xd8   : > { %v846_v33 = vpop.f32.mrf.mxu2 }
  0xd9   : > { %v794_v35 = vpop.f32.mrf.mxu0 }
  0xda   : > { %v1007_v26 = vpop.f32.mrf.mxu3 }
  0xdb   : > { %v7964_v22 = vadd.f32 %v1007_v26, %v846_v33  ;;  %v955_v7 = vpop.f32.mrf.mxu1  ;;  %v1836_v33 = vrot.slane %v7749_v0, 1 }
  0xdc   : > { %v7973_v45 = vadd.f32 %v955_v7, %v794_v35  ;;  %833 = vmatmul.bf16.gmra.mxu0 %v665_v8 }
  0xdd   : > { %1204 = vmatmul.bf16.vlgmr.msrb.gmra.mxu2 %v10423_v56  ;;  %v1058_v56 = vrot.slane %v7792_v55, 7 }
  0xde   : > { %994 = vmatmul.bf16.gmra.mxu1 %v516_v23  ;;  %v1054_v23 = vsel %vm1049_vm5, %v1050_v38, %v1053_v24  ;;  %v1055_v38 = vrot.slane %v7769_v27, 7 }
  0xdf   : > { %1447 = vmatmul.bf16.vlgmr.msrb.gmra.mxu3 %v1130_v14 }
  0xe0   : > { %v849_v58 = vpop.f32.mrf.mxu2 }
  0xe1   : > { %v796_v11 = vpop.f32.mrf.mxu0 }
  0xe2   : > { %v1010_v10 = vpop.f32.mrf.mxu3 }
  0xe3   : > { %v7976_v39 = vadd.f32 %v1010_v10, %v849_v58  ;;  %v957_v61 = vpop.f32.mrf.mxu1  ;;  %v1837_v58 = vsel %vm1833_vm7, %v1835_v59, %v1836_v33  ;;  %v7096_v10 = vld [vmem:[#allocation2 + $0x1f0] sm:$0xff] }
  0xe4   : > { %v7980_v13 = vadd.f32 %v957_v61, %v796_v11  ;;  %2488 = vmatpush.bf16.msra.mxu3 %v7096_v10  ;;  %v7104_v59 = vld [vmem:[#allocation2 + $0x230] sm:$0xff] }
  0xe5   : > { %2811 = vmatpush.bf16.msra.mxu0 %v7104_v59 }
  0xe8   : > { %v851_v26 = vpop.f32.mrf.mxu2 }
  0xe9   : > { %v799_v8 = vpop.f32.mrf.mxu0 }
  0xea   : > { %v1012_v35 = vpop.f32.mrf.mxu3 }
  0xeb   : > { %v7985_v20 = vadd.f32 %v1012_v35, %v851_v26  ;;  %v960_v7 = vpop.f32.mrf.mxu1 }
  0xec   : > { %v7989_v41 = vadd.f32 %v960_v7, %v799_v8  ;;  %1687 = vmatmul.bf16.vlgmr.msrb.gmra.mxu0 %v7705_v36  ;;  %v1056_v36 = vor.u32 %v1055_v38, %v7772_v28  ;;  %v1839_v8 = vrot.slane %v7772_v28, 1 }
  0xed   : > { %1209 = vmatmul.bf16.gmra.mxu2 %v1130_v14  ;;  %v1838_v14 = vor.u32 %v1836_v33, %v7746_v63 }
  0xee   : > { %1994 = vmatmul.bf16.vlgmr.msrb.gmra.mxu1 %v1837_v58 }
  0xef   : > { %1452 = vmatmul.bf16.gmra.mxu3 %v1054_v23  ;;  %v8004_v30 = vsel %vm1833_vm7, %v1838_v14, %v1839_v8  ;;  %v1841_v14 = vor.u32 %v1839_v8, %v7769_v27 }
  0xf0   : > { %v854_v11 = vpop.f32.mrf.mxu2 }
  0xf1   : > { %v801_v26 = vpop.f32.mrf.mxu0 }
  0xf2   : > { %v1015_v61 = vpop.f32.mrf.mxu3 }
  0xf3   : > { %v7992_v29 = vadd.f32 %v1015_v61, %v854_v11  ;;  %v962_v35 = vpop.f32.mrf.mxu1  ;;  %v1057_v61 = vsel %vm1049_vm5, %v1052_v48, %v1056_v36  ;;  %v1059_v36 = vor.u32 %v1058_v56, %v7795_v57 }
  0xf4   : > { %v7995_v24 = vadd.f32 %v962_v35, %v801_v26 }
  0xf5   : > { %10424 = vst [vmem:[#allocation37_spill] sm:$0xff] %v7992_v29 }
  0xf8   : > { %v856_v7 = vpop.f32.mrf.mxu2 }
  0xf9   : > { %v804_v10 = vpop.f32.mrf.mxu0 }
  0xfa   : > { %v1017_v58 = vpop.f32.mrf.mxu3 }
  0xfb   : > { %v8000_v40 = vadd.f32 %v1017_v58, %v856_v7  ;;  %v965_v11 = vpop.f32.mrf.mxu1 }
  0xfc   : > { %v8006_v26 = vadd.f32 %v965_v11, %v804_v10  ;;  %1692 = vmatmul.bf16.gmra.mxu0 %v7740_v60 }
  0xfd   : > { %10425 = vst [vmem:[#allocation38_spill] sm:$0xff] %v8000_v40  ;;  %1214 = vmatmul.bf16.gmra.mxu2 %v1054_v23  ;;  %v1842_v23 = vrot.slane %v7795_v57, 1 }
  0xfe   : > { %1999 = vmatmul.bf16.gmra.mxu1 %v8004_v30 }
  0xff   : > { %1457 = vmatmul.bf16.gmra.mxu3 %v1057_v61 }
 0x100   : > { %v859_v33 = vpop.f32.mrf.mxu2 }
 0x101   : > { %v806_v7 = vpop.f32.mrf.mxu0 }
 0x102   : > { %v1020_v35 = vpop.f32.mrf.mxu3 }
 0x103   : > { %v8010_v59 = vadd.f32 %v1020_v35, %v859_v33  ;;  %v967_v58 = vpop.f32.mrf.mxu1  ;;  %v1060_v33 = vsel %vm1049_vm5, %v1055_v38, %v1059_v36  ;;  %v8022_v35 = vsel %vm1833_vm7, %v1841_v14, %v1842_v23  ;;  %v7087_v36 = vld [vmem:[#allocation2 + $0x1a8] sm:$0xff] }
 0x104   : > { %v8013_v48 = vadd.f32 %v967_v58, %v806_v7  ;;  %10428 = vst [vmem:[#allocation41_spill] sm:$0xff] %v8022_v35  ;;  %2207 = vmatpush.bf16.msra.mxu2 %v7087_v36 }
 0x105   : > { %10426 = vst [vmem:[#allocation39_spill] sm:$0xff] %v8010_v59 }
 0x108   : > { %v861_v60 = vpop.f32.mrf.mxu2 }
 0x109   : > { %v809_v40 = vpop.f32.mrf.mxu0 }
 0x10a   : > { %v1022_v10 = vpop.f32.mrf.mxu3 }
 0x10b   : > { %v8018_v11 = vadd.f32 %v1022_v10, %v861_v60  ;;  %v970_v29 = vpop.f32.mrf.mxu1 }
 0x10c   : > { %v8024_v59 = vadd.f32 %v970_v29, %v809_v40  ;;  %1697 = vmatmul.bf16.gmra.mxu0 %v7765_v21  ;;  %v1844_v40 = vor.u32 %v1842_v23, %v7792_v55  ;;  %v1845_v21 = vrot.slane %v7818_v32, 1 }
 0x10d   : > { %10427 = vst [vmem:[#allocation40_spill] sm:$0xff] %v8018_v11  ;;  %1219 = vmatmul.bf16.gmra.mxu2 %v1057_v61  ;;  %v1061_v11 = vrot.slane %v7815_v25, 7 }
 0x10e   : > { %2004 = vmatmul.bf16.gmra.mxu1 %v8022_v35 }
 0x10f   : > { %1462 = vmatmul.bf16.gmra.mxu3 %v1060_v33  ;;  %v1062_v29 = vor.u32 %v1061_v11, %v7818_v32 }
 0x110   : > { %v864_v8 = vpop.f32.mrf.mxu2 }
 0x111   : > { %v811_v60 = vpop.f32.mrf.mxu0  ;;  %v1063_v35 = vsel %vm1049_vm5, %v1058_v56, %v1062_v29  ;;  %v1064_v56 = vrot.slane %v7838_v62, 7 }
 0x112   : > { %v1025_v7 = vpop.f32.mrf.mxu3 }
 0x113   : > { %v8028_v58 = vadd.f32 %v1025_v7, %v864_v8  ;;  %v972_v10 = vpop.f32.mrf.mxu1  ;;  %v7095_v7 = vld [vmem:[#allocation2 + $0x1e8] sm:$0xff] }
 0x114   : > { %v8031_v38 = vadd.f32 %v972_v10, %v811_v60  ;;  %v8040_v60 = vsel %vm1833_vm7, %v1844_v40, %v1845_v21  ;;  %2489 = vmatpush.bf16.msra.mxu3 %v7095_v7 }
 0x115   : > { %10429 = vst [vmem:[#allocation42_spill] sm:$0xff] %v8028_v58 }
 0x116   : > { %10431 = vst [vmem:[#allocation44_spill] sm:$0xff] %v8040_v60 }
 0x118   : > { %v866_v61 = vpop.f32.mrf.mxu2 }
 0x119   : > { %v814_v8 = vpop.f32.mrf.mxu0 }
 0x11a   : > { %v1027_v14 = vpop.f32.mrf.mxu3 }
 0x11b   : > { %v8036_v57 = vadd.f32 %v1027_v14, %v866_v61  ;;  %v975_v58 = vpop.f32.mrf.mxu1 }
 0x11c   : > { %v8042_v10 = vadd.f32 %v975_v58, %v814_v8  ;;  %1702 = vmatmul.bf16.gmra.mxu0 %v7788_v49  ;;  %v1065_v58 = vor.u32 %v1064_v56, %v7841_v4  ;;  %v1848_v49 = vrot.slane %v7841_v4, 1 }
 0x11d   : > { %10430 = vst [vmem:[#allocation43_spill] sm:$0xff] %v8036_v57  ;;  %1224 = vmatmul.bf16.gmra.mxu2 %v1060_v33  ;;  %v7103_v57 = vld [vmem:[#allocation2 + $0x228] sm:$0xff]  ;;  %v1847_v33 = vor.u32 %v1845_v21, %v7815_v25 }
 0x11e   : > { %2009 = vmatmul.bf16.gmra.mxu1 %v8040_v60  ;;  %2812 = vmatpush.bf16.msra.mxu0 %v7103_v57 }
 0x11f   : > { %1467 = vmatmul.bf16.gmra.mxu3 %v1063_v35  ;;  %v8058_v60 = vsel %vm1833_vm7, %v1847_v33, %v1848_v49  ;;  %v1850_v33 = vor.u32 %v1848_v49, %v7838_v62 }
 0x120   : > { %v869_v23 = vpop.f32.mrf.mxu2  ;;  %10434 = vst [vmem:[#allocation47_spill] sm:$0xff] %v8058_v60 }
 0x121   : > { %v816_v14 = vpop.f32.mrf.mxu0 }
 0x122   : > { %v1030_v36 = vpop.f32.mrf.mxu3 }
 0x123   : > { %v8046_v61 = vadd.f32 %v1030_v36, %v869_v23  ;;  %v977_v32 = vpop.f32.mrf.mxu1 }
 0x124   : > { %v8049_v29 = vadd.f32 %v977_v32, %v816_v14 }
 0x125   : > { %10432 = vst [vmem:[#allocation45_spill] sm:$0xff] %v8046_v61  ;;  %v1066_v61 = vsel %vm1049_vm5, %v1061_v11, %v1065_v58 }
 0x128   : > { %v871_v40 = vpop.f32.mrf.mxu2 }
 0x129   : > { %v819_v23 = vpop.f32.mrf.mxu0 }
 0x12a   : > { %v1032_v8 = vpop.f32.mrf.mxu3 }
 0x12b   : > { %v8054_v7 = vadd.f32 %v1032_v8, %v871_v40  ;;  %v980_v36 = vpop.f32.mrf.mxu1 }
 0x12c   : > { %v8060_v32 = vadd.f32 %v980_v36, %v819_v23  ;;  %1707 = vmatmul.bf16.gmra.mxu0 %v7811_v19 }
 0x12d   : > { %10433 = vst [vmem:[#allocation46_spill] sm:$0xff] %v8054_v7  ;;  %1229 = vmatmul.bf16.gmra.mxu2 %v1063_v35  ;;  %v1067_v7 = vrot.slane %v7863_v50, 7  ;;  %v1851_v35 = vrot.slane %v7866_v44, 1 }
 0x12e   : > { %2014 = vmatmul.bf16.gmra.mxu1 %v8058_v60 }
 0x12f   : > { %1472 = vmatmul.bf16.gmra.mxu3 %v1066_v61  ;;  %v1068_v58 = vor.u32 %v1067_v7, %v7866_v44 }
 0x130   : > { %v874_v57 = vpop.f32.mrf.mxu2 }
 0x131   : > { %v821_v40 = vpop.f32.mrf.mxu0 }
 0x132   : > { %v1035_v21 = vpop.f32.mrf.mxu3 }
 0x133   : > { %v8064_v14 = vadd.f32 %v1035_v21, %v874_v57  ;;  %v982_v8 = vpop.f32.mrf.mxu1  ;;  %v1069_v57 = vsel %vm1049_vm5, %v1064_v56, %v1068_v58  ;;  %v8076_v21 = vsel %vm1833_vm7, %v1850_v33, %v1851_v35  ;;  %v7086_v56 = vld [vmem:[#allocation2 + $0x1a0] sm:$0xff] }
 0x134   : > { %v8067_v11 = vadd.f32 %v982_v8, %v821_v40  ;;  %10437 = vst [vmem:[#allocation50_spill] sm:$0xff] %v8076_v21  ;;  %v7094_v33 = vld [vmem:[#allocation2 + $0x1e0] sm:$0xff]  ;;  %2208 = vmatpush.bf16.msra.mxu2 %v7086_v56 }
 0x135   : > { %10435 = vst [vmem:[#allocation48_spill] sm:$0xff] %v8064_v14  ;;  %2490 = vmatpush.bf16.msra.mxu3 %v7094_v33 }
 0x138   : > { %v876_v19 = vpop.f32.mrf.mxu2 }
 0x139   : > { %v824_v4 = vpop.f32.mrf.mxu0 }
 0x13a   : > { %v1037_v23 = vpop.f32.mrf.mxu3 }
 0x13b   : > { %v8072_v36 = vadd.f32 %v1037_v23, %v876_v19  ;;  %v985_v60 = vpop.f32.mrf.mxu1 }
 0x13c   : > { %v8078_v14 = vadd.f32 %v985_v60, %v824_v4  ;;  %1712 = vmatmul.bf16.gmra.mxu0 %v7834_v53  ;;  %v1853_v53 = vor.u32 %v1851_v35, %v7863_v50  ;;  %v1854_v60 = vrot.slane %v7894_v12, 1 }
 0x13d   : > { %10436 = vst [vmem:[#allocation49_spill] sm:$0xff] %v8072_v36  ;;  %1234 = vmatmul.bf16.gmra.mxu2 %v1066_v61  ;;  %v1070_v36 = vrot.slane %v7891_v47, 7 }
 0x13e   : > { %2019 = vmatmul.bf16.gmra.mxu1 %v8076_v21 }
 0x13f   : > { %1477 = vmatmul.bf16.gmra.mxu3 %v1069_v57  ;;  %v1071_v4 = vor.u32 %v1070_v36, %v7894_v12 }
 0x140   : > { %v879_v49 = vpop.f32.mrf.mxu2 }
 0x141   : > { %v826_v19 = vpop.f32.mrf.mxu0  ;;  %v1072_v21 = vsel %vm1049_vm5, %v1067_v7, %v1071_v4  ;;  %v1073_v7 = vrot.slane %v7925_v46, 7 }
 0x142   : > { %v1040_v40 = vpop.f32.mrf.mxu3 }
 0x143   : > { %v8082_v8 = vadd.f32 %v1040_v40, %v879_v49  ;;  %v987_v23 = vpop.f32.mrf.mxu1 }
 0x144   : > { %v8085_v58 = vadd.f32 %v987_v23, %v826_v19  ;;  %v8094_v19 = vsel %vm1833_vm7, %v1853_v53, %v1854_v60  ;;  %v7102_v23 = vld [vmem:[#allocation2 + $0x220] sm:$0xff]  ;;  %v7121_v53 = vld [vmem:[#allocation5 + $0x78] sm:$0xff] }
 0x145   : > { %10438 = vst [vmem:[#allocation51_spill] sm:$0xff] %v8082_v8  ;;  %2813 = vmatpush.bf16.msra.mxu0 %v7102_v23  ;;  %3818 = vmatpush.bf16.msra.mxu1 %v7121_v53 }
 0x146   : > { %10440 = vst [vmem:[#allocation53_spill] sm:$0xff] %v8094_v19 }
 0x148   : > { %v881_v61 = vpop.f32.mrf.mxu2 }
 0x149   : > { %v829_v40 = vpop.f32.mrf.mxu0 }
 0x14a   : > { %v1042_v44 = vpop.f32.mrf.mxu3 }
 0x14b   : > { %v8090_v49 = vadd.f32 %v1042_v44, %v881_v61  ;;  %v990_v8 = vpop.f32.mrf.mxu1 }
 0x14c   : > { %v8096_v56 = vadd.f32 %v990_v8, %v829_v40  ;;  %1717 = vmatmul.bf16.gmra.mxu0 %v7857_v37  ;;  %v1074_v8 = vor.u32 %v1073_v7, %v7928_v9  ;;  %v1857_v37 = vrot.slane %v7928_v9, 1 }
 0x14d   : > { %10439 = vst [vmem:[#allocation52_spill] sm:$0xff] %v8090_v49  ;;  %1239 = vmatmul.bf16.gmra.mxu2 %v1069_v57  ;;  %v1856_v57 = vor.u32 %v1854_v60, %v7891_v47 }
 0x14e   : > { %2024 = vmatmul.bf16.gmra.mxu1 %v8094_v19 }
 0x14f   : > { %1482 = vmatmul.bf16.gmra.mxu3 %v1072_v21 }
 0x150   : > { %v884_v35 = vpop.f32.mrf.mxu2 }
 0x151   : > { %v831_v61 = vpop.f32.mrf.mxu0 }
 0x152   : > { %v1045_v44 = vpop.f32.mrf.mxu3 }
 0x153   : > { %v8100_v33 = vadd.f32 %v1045_v44, %v884_v35  ;;  %v992_v49 = vpop.f32.mrf.mxu1  ;;  %v1075_v35 = vsel %vm1049_vm5, %v1070_v36, %v1074_v8  ;;  %v8110_v44 = vsel %vm1833_vm7, %v1856_v57, %v1857_v37  ;;  %v1076_v36 = vrot.slane %v7680_v15, 7 }
 0x154   : > { %v8103_v4 = vadd.f32 %v992_v49, %v831_v61  ;;  %10442 = vst [vmem:[#allocation55_spill] sm:$0xff] %v8110_v44 }
 0x155   : > { %10441 = vst [vmem:[#allocation54_spill] sm:$0xff] %v8100_v33 }
 0x158   : > { %v886_v40 = vpop.f32.mrf.mxu2 }
 0x159   : > { %v834_v12 = vpop.f32.mrf.mxu0 }
 0x15a   : > { %v1047_v23 = vpop.f32.mrf.mxu3 }
 0x15b   : > { %v995_v19 = vpop.f32.mrf.mxu1 }
 0x15c   : > { %v8112_v33 = vadd.f32 %v995_v19, %v834_v12  ;;  %1722 = vmatmul.bf16.gmra.mxu0 %v7885_v2  ;;  %v1077_v12 = vor.u32 %v1076_v36, %v7683_v16  ;;  %v1860_v2 = vrot.slane %v7683_v16, 1 }
 0x15d   : > { %1244 = vmatmul.bf16.gmra.mxu2 %v1072_v21  ;;  %v1859_v21 = vor.u32 %v1857_v37, %v7925_v46 }
 0x15e   : > { %2029 = vmatmul.bf16.gmra.mxu1 %v8110_v44 }
 0x15f   : > { %1487 = vmatmul.bf16.gmra.mxu3 %v1075_v35 }
 0x160   : > { %v1205_v60 = vpop.f32.mrf.mxu2 }
 0x161   : > { %v1309_v49 = vadd.f32 %v1205_v60, %v7922_v52  ;;  %v836_v53 = vpop.f32.mrf.mxu0 }
 0x162   : > { %v1448_v61 = vpop.f32.mrf.mxu3 }
 0x163   : > { %v1552_v40 = vadd.f32 %v1448_v61, %v1309_v49  ;;  %v997_v23 = vpop.f32.mrf.mxu1  ;;  %v1078_v49 = vsel %vm1049_vm5, %v1073_v7, %v1077_v12  ;;  %v8126_v61 = vsel %vm1833_vm7, %v1859_v21, %v1860_v2 }
 0x164   : > { %v8118_v8 = vadd.f32 %v997_v23, %v836_v53  ;;  %v7085_v53 = vld [vmem:[#allocation2 + $0x198] sm:$0xff] }
 0x165   : > { %2209 = vmatpush.bf16.msra.mxu2 %v7085_v53 }
 0x168   : > { %v1207_v19 = vpop.f32.mrf.mxu2 }
 0x169   : > { %v1310_v57 = vadd.f32 %v1207_v19, %v7940_v51  ;;  %v1688_v44 = vpop.f32.mrf.mxu0  ;;  %v7093_v51 = vld [vmem:[#allocation2 + $0x1d8] sm:$0xff] }
 0x16a   : > { %v1450_v9 = vpop.f32.mrf.mxu3  ;;  %v1792_v60 = vadd.f32 %v1688_v44, %v1552_v40  ;;  %2491 = vmatpush.bf16.msra.mxu3 %v7093_v51 }
 0x16b   : > { %v1553_v52 = vadd.f32 %v1450_v9, %v1310_v57  ;;  %v1995_v47 = vpop.f32.mrf.mxu1  ;;  %v1862_v57 = vor.u32 %v1860_v2, %v7680_v15  ;;  %v7385_v2 = vld [vmem:[%s7671_s11 + $0x48] sm:$0xff] }
 0x16c   : > { %v8128_v23 = vadd.f32 %v1995_v47, %v1792_v60  ;;  %1727 = vmatmul.bf16.gmra.mxu0 %v7916_v5  ;;  %v1079_v47 = vrot.slane %v7686_v17, 7  ;;  %v1863_v60 = vrot.slane %v7689_v18, 1 }
 0x16d   : > { %1249 = vmatmul.bf16.gmra.mxu2 %v1075_v35  ;;  %v7101_v35 = vld [vmem:[#allocation2 + $0x218] sm:$0xff] }
 0x16e   : > { %2034 = vmatmul.bf16.gmra.mxu1 %v8126_v61  ;;  %v1080_v5 = vor.u32 %v1079_v47, %v7689_v18  ;;  %2814 = vmatpush.bf16.msra.mxu0 %v7101_v35  ;;  %v7120_v35 = vld [vmem:[#allocation5 + $0x70] sm:$0xff] }
 0x16f   : > { %1492 = vmatmul.bf16.gmra.mxu3 %v1078_v49  ;;  %3819 = vmatpush.bf16.msra.mxu1 %v7120_v35 }
 0x170   : > { %v1210_v37 = vpop.f32.mrf.mxu2 }
 0x171   : > { %v1311_v9 = vadd.f32 %v1210_v37, %v7950_v34  ;;  %v1690_v7 = vpop.f32.mrf.mxu0 }
 0x172   : > { %v1453_v44 = vpop.f32.mrf.mxu3  ;;  %v1793_v12 = vadd.f32 %v1690_v7, %v1553_v52  ;;  %v1081_v7 = vsel %vm1049_vm5, %v1076_v36, %v1080_v5 }
 0x173   : > { %v1554_v40 = vadd.f32 %v1453_v44, %v1311_v9  ;;  %v1997_v21 = vpop.f32.mrf.mxu1 }
 0x174   : > { %v8134_v19 = vadd.f32 %v1997_v21, %v1793_v12  ;;  %v8142_v12 = vsel %vm1833_vm7, %v1862_v57, %v1863_v60  ;;  %v1082_v57 = vrot.slane %v7716_v42, 7 }
 0x178   : > { %v1212_v53 = vpop.f32.mrf.mxu2 }
 0x179   : > { %v1312_v34 = vadd.f32 %v1212_v53, %v7955_v54  ;;  %v1693_v37 = vpop.f32.mrf.mxu0 }
 0x17a   : > { %v1455_v51 = vpop.f32.mrf.mxu3  ;;  %v1794_v9 = vadd.f32 %v1693_v37, %v1554_v40 }
 0x17b   : > { %v1555_v52 = vadd.f32 %v1455_v51, %v1312_v34  ;;  %v2000_v44 = vpop.f32.mrf.mxu1 }
 0x17c   : > { %v8144_v21 = vadd.f32 %v2000_v44, %v1794_v9  ;;  %1732 = vmatmul.bf16.gmra.mxu0 %v7385_v2  ;;  %v1865_v9 = vor.u32 %v1863_v60, %v7686_v17  ;;  %v1866_v44 = vrot.slane %v7718_v43, 1 }
 0x17d   : > { %1254 = vmatmul.bf16.gmra.mxu2 %v1078_v49  ;;  %v1083_v49 = vor.u32 %v1082_v57, %v7718_v43 }
 0x17e   : > { %10443 = vst [vmem:[#allocation56_spill] sm:$0xff] %v8144_v21  ;;  %2039 = vmatmul.bf16.gmra.mxu1 %v8142_v12 }
 0x17f   : > { %1497 = vmatmul.bf16.gmra.mxu3 %v1081_v7 }
 0x180   : > { %v1215_v54 = vpop.f32.mrf.mxu2 }
 0x181   : > { %v1313_v53 = vadd.f32 %v1215_v54, %v7973_v45  ;;  %v1695_v34 = vpop.f32.mrf.mxu0 }
 0x182   : > { %v1458_v40 = vpop.f32.mrf.mxu3  ;;  %v1795_v36 = vadd.f32 %v1695_v34, %v1555_v52  ;;  %v8158_v34 = vsel %vm1833_vm7, %v1865_v9, %v1866_v44  ;;  %v7084_v9 = vld [vmem:[#allocation2 + $0x190] sm:$0xff] }
 0x183   : > { %v1556_v51 = vadd.f32 %v1458_v40, %v1313_v53  ;;  %v2002_v5 = vpop.f32.mrf.mxu1  ;;  %v1084_v40 = vsel %vm1049_vm5, %v1079_v47, %v1083_v49  ;;  %v1085_v47 = vrot.slane %v7751_v1, 7  ;;  %2210 = vmatpush.bf16.msra.mxu2 %v7084_v9  ;;  %v7100_v9 = vld [vmem:[#allocation2 + $0x210] sm:$0xff] }
 0x184   : > { %v8150_v37 = vadd.f32 %v2002_v5, %v1795_v36  ;;  %v7386_v5 = vld [vmem:[%s7671_s11 + $0x50] sm:$0xff]  ;;  %2815 = vmatpush.bf16.msra.mxu0 %v7100_v9 }
 0x188   : > { %v1217_v2 = vpop.f32.mrf.mxu2 }
 0x189   : > { %v1314_v35 = vadd.f32 %v1217_v2, %v7980_v13  ;;  %v1698_v54 = vpop.f32.mrf.mxu0 }
 0x18a   : > { %v1460_v45 = vpop.f32.mrf.mxu3  ;;  %v1796_v53 = vadd.f32 %v1698_v54, %v1556_v51 }
 0x18b   : > { %v1557_v21 = vadd.f32 %v1460_v45, %v1314_v35  ;;  %v2005_v52 = vpop.f32.mrf.mxu1 }
 0x18c   : > { %v8160_v36 = vadd.f32 %v2005_v52, %v1796_v53  ;;  %1737 = vmatmul.bf16.gmra.mxu0 %v7386_v5  ;;  %v7092_v53 = vld [vmem:[#allocation2 + $0x1d0] sm:$0xff]  ;;  %v1868_v52 = vor.u32 %v1866_v44, %v7716_v42  ;;  %v1869_v5 = vrot.slane %v7753_v3, 1  ;;  %v7387_v44 = vld [vmem:[%s7671_s11 + $0x58] sm:$0xff] }
 0x18d   : > { %1259 = vmatmul.bf16.gmra.mxu2 %v1081_v7  ;;  %v1086_v7 = vor.u32 %v1085_v47, %v7753_v3  ;;  %2492 = vmatpush.bf16.msra.mxu3 %v7092_v53 }
 0x18e   : > { %10444 = vst [vmem:[#allocation57_spill] sm:$0xff] %v8160_v36  ;;  %2044 = vmatmul.bf16.gmra.mxu1 %v8158_v34 }
 0x18f   : > { %1502 = vmatmul.bf16.gmra.mxu3 %v1084_v40 }
 0x190   : > { %v1220_v60 = vpop.f32.mrf.mxu2 }
 0x191   : > { %v1315_v13 = vadd.f32 %v1220_v60, %v7989_v41  ;;  %v1700_v35 = vpop.f32.mrf.mxu0 }
 0x192   : > { %v1463_v2 = vpop.f32.mrf.mxu3  ;;  %v1797_v45 = vadd.f32 %v1700_v35, %v1557_v21 }
 0x193   : > { %v1558_v51 = vadd.f32 %v1463_v2, %v1315_v13  ;;  %v2007_v54 = vpop.f32.mrf.mxu1 }
 0x194   : > { %v8166_v49 = vadd.f32 %v2007_v54, %v1797_v45  ;;  %v1087_v54 = vsel %vm1049_vm5, %v1082_v57, %v1086_v7 }
 0x196   : > { %10445 = vst [vmem:[#allocation58_spill] sm:$0xff] %v8166_v49  ;;  %v8174_v49 = vsel %vm1833_vm7, %v1868_v52, %v1869_v5  ;;  %v10447_v52 = vld [vmem:[#allocation14_spill] sm:$0xff] }
 0x198   : > { %v1222_v41 = vpop.f32.mrf.mxu2 }
 0x199   : > { %v1316_v60 = vadd.f32 %v1222_v41, %v7995_v24  ;;  %v1703_v13 = vpop.f32.mrf.mxu0 }
 0x19a   : > { %v1465_v21 = vpop.f32.mrf.mxu3  ;;  %v1798_v35 = vadd.f32 %v1703_v13, %v1558_v51 }
 0x19b   : > { %v1559_v2 = vadd.f32 %v1465_v21, %v1316_v60  ;;  %v2010_v45 = vpop.f32.mrf.mxu1  ;;  %v1088_v21 = vrot.slane %v10447_v52, 7 }
 0x19c   : > { %v8176_v36 = vadd.f32 %v2010_v45, %v1798_v35  ;;  %1742 = vmatmul.bf16.gmra.mxu0 %v7387_v44  ;;  %v1871_v45 = vor.u32 %v1869_v5, %v7751_v1  ;;  %v7388_v5 = vld [vmem:[%s7671_s11 + $0x60] sm:$0xff] }
 0x19d   : > { %1264 = vmatmul.bf16.gmra.mxu2 %v1084_v40  ;;  %v10449_v40 = vld [vmem:[#allocation15_spill] sm:$0xff] }
 0x19e   : > { %10446 = vst [vmem:[#allocation59_spill] sm:$0xff] %v8176_v36  ;;  %2049 = vmatmul.bf16.gmra.mxu1 %v8174_v49  ;;  %v1089_v35 = vor.u32 %v1088_v21, %v10449_v40  ;;  %v1872_v44 = vrot.slane %v10449_v40, 1 }
 0x19f   : > { %1507 = vmatmul.bf16.gmra.mxu3 %v1087_v54 }
 0x1a0   : > { %v1225_v24 = vpop.f32.mrf.mxu2 }
 0x1a1   : > { %v1317_v53 = vadd.f32 %v1225_v24, %v8006_v26  ;;  %v1705_v41 = vpop.f32.mrf.mxu0 }
 0x1a2   : > { %v1468_v51 = vpop.f32.mrf.mxu3  ;;  %v1799_v57 = vadd.f32 %v1705_v41, %v1559_v2  ;;  %v8190_v41 = vsel %vm1833_vm7, %v1871_v45, %v1872_v44  ;;  %v10451_v45 = vld [vmem:[#allocation17_spill] sm:$0xff] }
 0x1a3   : > { %v1560_v60 = vadd.f32 %v1468_v51, %v1317_v53  ;;  %v2012_v7 = vpop.f32.mrf.mxu1  ;;  %v1090_v51 = vsel %vm1049_vm5, %v1085_v47, %v1089_v35 }
 0x1a4   : > { %v8182_v13 = vadd.f32 %v2012_v7, %v1799_v57  ;;  %v7119_v57 = vld [vmem:[#allocation5 + $0x68] sm:$0xff] }
 0x1a5   : > { %3820 = vmatpush.bf16.msra.mxu1 %v7119_v57 }
 0x1a6   : > { %10448 = vst [vmem:[#allocation14_spill] sm:$0xff] %v8182_v13 }
 0x1a8   : > { %v1227_v36 = vpop.f32.mrf.mxu2 }
 0x1a9   : > { %v1318_v9 = vadd.f32 %v1227_v36, %v8013_v48  ;;  %v1708_v24 = vpop.f32.mrf.mxu0 }
 0x1aa   : > { %v1470_v26 = vpop.f32.mrf.mxu3  ;;  %v1800_v53 = vadd.f32 %v1708_v24, %v1560_v60  ;;  %v1091_v24 = vrot.slane %v10451_v45, 7 }
 0x1ab   : > { %v1561_v3 = vadd.f32 %v1470_v26, %v1318_v9  ;;  %v2015_v2 = vpop.f32.mrf.mxu1 }
 0x1ac   : > { %v8192_v7 = vadd.f32 %v2015_v2, %v1800_v53  ;;  %1747 = vmatmul.bf16.gmra.mxu0 %v7388_v5  ;;  %v1874_v5 = vor.u32 %v1872_v44, %v10447_v52  ;;  %v7083_v44 = vld [vmem:[#allocation2 + $0x188] sm:$0xff] }
 0x1ad   : > { %1269 = vmatmul.bf16.gmra.mxu2 %v1087_v54  ;;  %v10453_v54 = vld [vmem:[#allocation18_spill] sm:$0xff] }
 0x1ae   : > { %10450 = vst [vmem:[#allocation60_spill] sm:$0xff] %v8192_v7  ;;  %2054 = vmatmul.bf16.gmra.mxu1 %v8190_v41  ;;  %v1092_v2 = vor.u32 %v1091_v24, %v10453_v54  ;;  %v1875_v7 = vrot.slane %v10453_v54, 1  ;;  %2211 = vmatpush.bf16.msra.mxu2 %v7083_v44 }
 0x1af   : > { %1512 = vmatmul.bf16.gmra.mxu3 %v1090_v51 }
 0x1b0   : > { %v1230_v48 = vpop.f32.mrf.mxu2 }
 0x1b1   : > { %v1319_v36 = vadd.f32 %v1230_v48, %v8024_v59  ;;  %v1710_v9 = vpop.f32.mrf.mxu0 }
 0x1b2   : > { %v1473_v60 = vpop.f32.mrf.mxu3  ;;  %v1801_v47 = vadd.f32 %v1710_v9, %v1561_v3  ;;  %v8206_v9 = vsel %vm1833_vm7, %v1874_v5, %v1875_v7  ;;  %v10455_v5 = vld [vmem:[#allocation20_spill] sm:$0xff] }
 0x1b3   : > { %v1562_v26 = vadd.f32 %v1473_v60, %v1319_v36  ;;  %v2017_v35 = vpop.f32.mrf.mxu1  ;;  %v1093_v60 = vsel %vm1049_vm5, %v1088_v21, %v1092_v2 }
 0x1b4   : > { %v8198_v53 = vadd.f32 %v2017_v35, %v1801_v47  ;;  %v7389_v35 = vld [vmem:[%s7671_s11 + $0x68] sm:$0xff] }
 0x1b6   : > { %10452 = vst [vmem:[#allocation17_spill] sm:$0xff] %v8198_v53 }
 0x1b8   : > { %v1232_v57 = vpop.f32.mrf.mxu2 }
 0x1b9   : > { %v1320_v13 = vadd.f32 %v1232_v57, %v8031_v38  ;;  %v1713_v48 = vpop.f32.mrf.mxu0 }
 0x1ba   : > { %v1475_v59 = vpop.f32.mrf.mxu3  ;;  %v1802_v36 = vadd.f32 %v1713_v48, %v1562_v26  ;;  %v1094_v48 = vrot.slane %v10455_v5, 7 }
 0x1bb   : > { %v1563_v40 = vadd.f32 %v1475_v59, %v1320_v13  ;;  %v2020_v3 = vpop.f32.mrf.mxu1 }
 0x1bc   : > { %v8208_v47 = vadd.f32 %v2020_v3, %v1802_v36  ;;  %1752 = vmatmul.bf16.gmra.mxu0 %v7389_v35  ;;  %v7091_v36 = vld [vmem:[#allocation2 + $0x1c8] sm:$0xff]  ;;  %v10457_v35 = vld [vmem:[#allocation21_spill] sm:$0xff] }
 0x1bd   : > { %1274 = vmatmul.bf16.gmra.mxu2 %v1090_v51  ;;  %2493 = vmatpush.bf16.msra.mxu3 %v7091_v36  ;;  %v3050_v51 = vld [vmem:[%s10245_s5] sm:$0xff]  ;;  %v1095_v44 = vor.u32 %v1094_v48, %v10457_v35 }
 0x1be   : > { %10454 = vst [vmem:[#allocation18_spill] sm:$0xff] %v8208_v47  ;;  %2059 = vmatmul.bf16.gmra.mxu1 %v8206_v9  ;;  %3093 = vperm.xlu0 %7380, %v3050_v51   ;;  %v7099_v51 = vld [vmem:[#allocation2 + $0x208] sm:$0xff] }
 0x1bf   : > { %1517 = vmatmul.bf16.gmra.mxu3 %v1093_v60  ;;  %2816 = vmatpush.bf16.msra.mxu0 %v7099_v51  ;;  %v3056_v51 = vld [vmem:[%s10245_s5 + $0x30] sm:$0xff] }
 0x1c0   : > { %v1235_v38 = vpop.f32.mrf.mxu2 }
 0x1c1   : > { %v1321_v13 = vadd.f32 %v1235_v38, %v8042_v10  ;;  %v1715_v57 = vpop.f32.mrf.mxu0  ;;  %v1877_v10 = vor.u32 %v1875_v7, %v10451_v45  ;;  %v1878_v38 = vrot.slane %v10457_v35, 1  ;;  %v7390_v7 = vld [vmem:[%s7671_s11 + $0x70] sm:$0xff] }
 0x1c2   : > { %v1478_v26 = vpop.f32.mrf.mxu3  ;;  %v1803_v21 = vadd.f32 %v1715_v57, %v1563_v40 }
 0x1c3   : > { %v1564_v59 = vadd.f32 %v1478_v26, %v1321_v13  ;;  %v2022_v2 = vpop.f32.mrf.mxu1  ;;  %v8225_v47 = vsel %vm1833_vm7, %v1877_v10, %v1878_v38 }
 0x1c4   : > { %v8214_v3 = vadd.f32 %v2022_v2, %v1803_v21 }
 0x1c6   : > { %10456 = vst [vmem:[#allocation20_spill] sm:$0xff] %v8214_v3  ;;  %v1096_v3 = vsel %vm1049_vm5, %v1091_v24, %v1095_v44 }
 0x1c8   : > { %v1237_v40 = vpop.f32.mrf.mxu2 }
 0x1c9   : > { %v1322_v13 = vadd.f32 %v1237_v40, %v8049_v29  ;;  %v1718_v57 = vpop.f32.mrf.mxu0  ;;  %v3051_v29 = vld [vmem:[%s10245_s5 + $0x8] sm:$0xff] }
 0x1ca   : > { %v1480_v26 = vpop.f32.mrf.mxu3  ;;  %v1804_v2 = vadd.f32 %v1718_v57, %v1564_v59  ;;  %3098 = vperm.xlu0 %7380, %v3051_v29  }
 0x1cb   : > { %v1565_v21 = vadd.f32 %v1480_v26, %v1322_v13  ;;  %v2025_v36 = vpop.f32.mrf.mxu1 }
 0x1cc   : > { %v8227_v53 = vadd.f32 %v2025_v36, %v1804_v2  ;;  %1757 = vmatmul.bf16.gmra.mxu0 %v7390_v7  ;;  %v7118_v2 = vld [vmem:[#allocation5 + $0x60] sm:$0xff]  ;;  %v3052_v7 = vld [vmem:[%s10245_s5 + $0x10] sm:$0xff] }
 0x1cd   : > { %1279 = vmatmul.bf16.gmra.mxu2 %v1093_v60  ;;  %v10459_v60 = vld [vmem:[#allocation23_spill] sm:$0xff]  ;;  %3821 = vmatpush.bf16.msra.mxu1 %v7118_v2 }
 0x1ce   : > { %10458 = vst [vmem:[#allocation61_spill] sm:$0xff] %v8227_v53  ;;  %2064 = vmatmul.bf16.gmra.mxu1 %v8225_v47  ;;  %v1097_v57 = vrot.slane %v10459_v60, 7  ;;  %3103 = vperm.xlu1 %7381, %v3052_v7  }
 0x1cf   : > { %1522 = vmatmul.bf16.gmra.mxu3 %v1096_v3 }
 0x1d0   : > { %v1240_v59 = vpop.f32.mrf.mxu2 }
 0x1d1   : > { %v1323_v24 = vadd.f32 %v1240_v59, %v8060_v32  ;;  %v1720_v10 = vpop.f32.mrf.mxu0  ;;  %v10461_v32 = vld [vmem:[#allocation24_spill] sm:$0xff] }
 0x1d2   : > { %v1483_v44 = vpop.f32.mrf.mxu3  ;;  %v1805_v13 = vadd.f32 %v1720_v10, %v1565_v21  ;;  %v1098_v29 = vor.u32 %v1097_v57, %v10461_v32  ;;  %v1880_v21 = vor.u32 %v1878_v38, %v10455_v5  ;;  %v1881_v59 = vrot.slane %v10461_v32, 1  ;;  %3123 = vperm.xlu0 %7380, %v3056_v51   ;;  %v7391_v38 = vld [vmem:[%s7671_s11 + $0x78] sm:$0xff] }
 0x1d3   : > { %v1566_v40 = vadd.f32 %v1483_v44, %v1323_v24  ;;  %v2027_v26 = vpop.f32.mrf.mxu1 }
 0x1d4   : > { %v8236_v36 = vadd.f32 %v2027_v26, %v1805_v13  ;;  %v1099_v53 = vsel %vm1049_vm5, %v1094_v48, %v1098_v29  ;;  %v8250_v7 = vsel %vm1833_vm7, %v1880_v21, %v1881_v59 }
 0x1d5   : > { %10462 = vst [vmem:[#allocation63_spill] sm:$0xff] %v8250_v7 }
 0x1d6   : > { %10460 = vst [vmem:[#allocation62_spill] sm:$0xff] %v8236_v36 }
 0x1d8   : > { %v1242_v24 = vpop.f32.mrf.mxu2 }
 0x1d9   : > { %v1324_v44 = vadd.f32 %v1242_v24, %v8067_v11  ;;  %v1723_v13 = vpop.f32.mrf.mxu0  ;;  %v3053_v11 = vld [vmem:[%s10245_s5 + $0x18] sm:$0xff] }
 0x1da   : > { %v1485_v10 = vpop.f32.mrf.mxu3  ;;  %v1806_v2 = vadd.f32 %v1723_v13, %v1566_v40  ;;  %v3059_v40 = vld [vmem:[%s10245_s5 + $0x48] sm:$0xff]  ;;  %3108 = vperm.xlu1 %7381, %v3053_v11  }
 0x1db   : > { %v1567_v26 = vadd.f32 %v1485_v10, %v1324_v44  ;;  %v2030_v36 = vpop.f32.mrf.mxu1  ;;  %3138 = vperm.xlu0 %7380, %v3059_v40   ;;  %v10464_v44 = vld [vmem:[#allocation26_spill] sm:$0xff]  ;;  %v10466_v11 = vld [vmem:[#allocation27_spill] sm:$0xff] }
 0x1dc   : > { %v8252_v35 = vadd.f32 %v2030_v36, %v1806_v2  ;;  %1762 = vmatmul.bf16.gmra.mxu0 %v7391_v38  ;;  %v1100_v10 = vrot.slane %v10464_v44, 7  ;;  %v3057_v2 = vld [vmem:[%s10245_s5 + $0x38] sm:$0xff]  ;;  %v3062_v38 = vld [vmem:[%s10245_s5 + $0x60] sm:$0xff] }
 0x1dd   : > { %1284 = vmatmul.bf16.gmra.mxu2 %v1096_v3 }
 0x1de   : > { %10463 = vst [vmem:[#allocation64_spill] sm:$0xff] %v8252_v35  ;;  %2069 = vmatmul.bf16.gmra.mxu1 %v8250_v7  ;;  %v1101_v40 = vor.u32 %v1100_v10, %v10466_v11  ;;  %v7082_v7 = vld [vmem:[#allocation2 + $0x180] sm:$0xff] }
 0x1df   : > { %1527 = vmatmul.bf16.gmra.mxu3 %v1099_v53  ;;  %2212 = vmatpush.bf16.msra.mxu2 %v7082_v7  ;;  %v3063_v7 = vld [vmem:[%s10245_s5 + $0x68] sm:$0xff] }
 0x1e0   : > { %v1245_v48 = vpop.f32.mrf.mxu2  ;;  %v1102_v35 = vsel %vm1049_vm5, %v1097_v57, %v1101_v40  ;;  %v3065_v57 = vld [vmem:[%s10245_s5 + $0x78] sm:$0xff] }
 0x1e1   : > { %v1325_v36 = vadd.f32 %v1245_v48, %v8078_v14  ;;  %v1725_v3 = vpop.f32.mrf.mxu0  ;;  %v1883_v14 = vor.u32 %v1881_v59, %v10459_v60  ;;  %v1884_v48 = vrot.slane %v10466_v11, 1  ;;  %v7090_v59 = vld [vmem:[#allocation2 + $0x1c0] sm:$0xff]  ;;  %v327_v40 = vld [vmem:[%s7671_s11 + $0x9c] sm:$0xf] }
 0x1e2   : > { %v1488_v51 = vpop.f32.mrf.mxu3  ;;  %v1807_v21 = vadd.f32 %v1725_v3, %v1567_v26  ;;  %3128 = vperm.xlu1 %7381, %v3057_v2   ;;  %v7392_v2 = vld [vmem:[%s7671_s11 + $0x80] sm:$0xff]  ;;  %2494 = vmatpush.bf16.msra.mxu3 %v7090_v59  ;;  %v1352_v59 = vunpack.c.l.b16 %v327_v40 }
 0x1e3   : > { %v1568_v29 = vadd.f32 %v1488_v51, %v1325_v36  ;;  %v2032_v24 = vpop.f32.mrf.mxu1  ;;  %3153 = vperm.xlu0 %7380, %v3062_v38   ;;  %v8278_v32 = vsel %vm1833_vm7, %v1883_v14, %v1884_v48 }
 0x1e4   : > { %v8264_v13 = vadd.f32 %v2032_v24, %v1807_v21 }
 0x1e6   : > { %10465 = vst [vmem:[#allocation65_spill] sm:$0xff] %v8264_v13 }
 0x1e8   : > { %v1247_v26 = vpop.f32.mrf.mxu2 }
 0x1e9   : > { %v1326_v36 = vadd.f32 %v1247_v26, %v8085_v58  ;;  %v1728_v3 = vpop.f32.mrf.mxu0  ;;  %v3060_v58 = vld [vmem:[%s10245_s5 + $0x50] sm:$0xff] }
 0x1ea   : > { %v1490_v51 = vpop.f32.mrf.mxu3  ;;  %v1808_v24 = vadd.f32 %v1728_v3, %v1568_v29  ;;  %3143 = vperm.xlu1 %7381, %v3060_v58   ;;  %v10470_v58 = vld [vmem:[#allocation31_spill] sm:$0xff] }
 0x1eb   : > { %v1569_v21 = vadd.f32 %v1490_v51, %v1326_v36  ;;  %v2035_v13 = vpop.f32.mrf.mxu1  ;;  %3168 = vperm.xlu0 %7380, %v3065_v57   ;;  %v10468_v51 = vld [vmem:[#allocation30_spill] sm:$0xff]  ;;  %v1886_v57 = vor.u32 %v1884_v48, %v10464_v44 }
 0x1ec   : > { %v8280_v60 = vadd.f32 %v2035_v13, %v1808_v24  ;;  %1767 = vmatmul.bf16.gmra.mxu0 %v7392_v2  ;;  %v8293_v3 = vrot.slane %v10468_v51, 7  ;;  %v7098_v24 = vld [vmem:[#allocation2 + $0x200] sm:$0xff] }
 0x1ed   : > { %1289 = vmatmul.bf16.gmra.mxu2 %v1099_v53  ;;  %2817 = vmatpush.bf16.msra.mxu0 %v7098_v24 }
 0x1ee   : > { %10467 = vst [vmem:[#allocation66_spill] sm:$0xff] %v8280_v60  ;;  %2074 = vmatmul.bf16.gmra.mxu1 %v8278_v32 }
 0x1ef   : > { %1532 = vmatmul.bf16.gmra.mxu3 %v1102_v35 }
 0x1f0   : > { %v1250_v29 = vpop.f32.mrf.mxu2 }
 0x1f1   : > { %v1327_v53 = vadd.f32 %v1250_v29, %v8096_v56  ;;  %v1730_v38 = vpop.f32.mrf.mxu0  ;;  %v3068_v56 = vld [vmem:[%s10245_s5 + $0x90] sm:$0xff]  ;;  %v1887_v29 = vrot.slane %v10470_v58, 1 }
 0x1f2   : > { %v1493_v13 = vpop.f32.mrf.mxu3  ;;  %v1809_v26 = vadd.f32 %v1730_v38, %v1569_v21  ;;  %v1104_v21 = vor.u32 %v8293_v3, %v10470_v58  ;;  %3158 = vperm.xlu1 %7381, %v3063_v7   ;;  %v7393_v7 = vld [vmem:[%s7671_s11 + $0x88] sm:$0xff] }
 0x1f3   : > { %v1570_v14 = vadd.f32 %v1493_v13, %v1327_v53  ;;  %v2037_v36 = vpop.f32.mrf.mxu1  ;;  %3183 = vperm.xlu0 %7380, %v3068_v56   ;;  %v8313_v48 = vsel %vm1833_vm7, %v1886_v57, %v1887_v29  ;;  %v7117_v56 = vld [vmem:[#allocation5 + $0x58] sm:$0xff] }
 0x1f4   : > { %v8295_v2 = vadd.f32 %v2037_v36, %v1809_v26  ;;  %v10471_v26 = vld [vmem:[#allocation32_spill] sm:$0xff]  ;;  %v1105_v11 = vsel %vm1049_vm5, %v1100_v10, %v1104_v21  ;;  %v3066_v10 = vld [vmem:[%s10245_s5 + $0x80] sm:$0xff]  ;;  %3822 = vmatpush.bf16.msra.mxu1 %v7117_v56  ;;  %v1889_v56 = vor.u32 %v1887_v29, %v10468_v51 }
 0x1f5   : > { %v8309_v36 = vpack.c.b16 %v1352_v59, %v10471_v26 }
 0x1f6   : > { %10469 = vst [vmem:[#allocation30_spill] sm:$0xff] %v8295_v2 }
 0x1f8   : > { %v1252_v53 = vpop.f32.mrf.mxu2 }
 0x1f9   : > { %v1328_v13 = vadd.f32 %v1252_v53, %v8103_v4  ;;  %v1733_v24 = vpop.f32.mrf.mxu0  ;;  %v8320_v4 = vshrl.u32 %v8309_v36, 16  ;;  %v8331_v53 = vshll.u32 %v8309_v36, 16 }
 0x1fa   : > { %v1495_v38 = vpop.f32.mrf.mxu3  ;;  %v1810_v40 = vadd.f32 %v1733_v24, %v1570_v14  ;;  %3173 = vperm.xlu1 %7381, %v3066_v10   ;;  %v328_v24 = vld [vmem:[%s7671_s11 + $0xa0] sm:$0xf] }
 0x1fb   : > { %v1571_v2 = vadd.f32 %v1495_v38, %v1328_v13  ;;  %v2040_v60 = vpop.f32.mrf.mxu1  ;;  %v10303_v57 = vrot.slane %v8320_v4, 7  ;;  %10473 = vst [vmem:[#allocation67_spill] sm:$0xff] %v8331_v53  ;;  %v1890_v10 = vrot.slane %v8331_v53, 1 }
 0x1fc   : > { %v8315_v44 = vadd.f32 %v2040_v60, %v1810_v40  ;;  %1772 = vmatmul.bf16.gmra.mxu0 %v7393_v7  ;;  %v3071_v60 = vld [vmem:[%s10245_s5 + $0xa8] sm:$0xff]  ;;  %v3054_v40 = vld [vmem:[%s10245_s5 + $0x20] sm:$0xff] }
 0x1fd   : > { %1294 = vmatmul.bf16.gmra.mxu2 %v1102_v35  ;;  %3198 = vperm.xlu0 %7380, %v3071_v60   ;;  %v3074_v7 = vld [vmem:[%s10245_s5 + $0xc0] sm:$0xff]  ;;  %v1353_v60 = vunpack.c.l.b16 %v328_v24  ;;  %v7394_v24 = vld [vmem:[%s7671_s11 + $0x90] sm:$0xff] }
 0x1fe   : > { %10472 = vst [vmem:[#allocation32_spill] sm:$0xff] %v8315_v44  ;;  %2079 = vmatmul.bf16.gmra.mxu1 %v8313_v48  ;;  %3113 = vperm.xlu2 %7382, %v3054_v40   ;;  %v8356_v40 = vsel %vm1833_vm7, %v1889_v56, %v1890_v10  ;;  %v10479_v56 = vld [vmem:[#allocation33_spill] sm:$0xff] }
 0x1ff   : > { %1537 = vmatmul.bf16.gmra.mxu3 %v1105_v11  ;;  %10476 = vst [vmem:[#allocation70_spill] sm:$0xff] %v8356_v40  ;;  %v8358_v29 = vpack.c.b16 %v1353_v60, %v1353_v60  ;;  %v10480_v60 = vshrl.u32 %v10479_v56, 16 }
 0x200   : > { %v1255_v35 = vpop.f32.mrf.mxu2 }
 0x201   : > { %v1329_v14 = vadd.f32 %v1255_v35, %v8112_v33  ;;  %v1735_v21 = vpop.f32.mrf.mxu0  ;;  %v3069_v33 = vld [vmem:[%s10245_s5 + $0x98] sm:$0xff] }
 0x202   : > { %v1498_v59 = vpop.f32.mrf.mxu3  ;;  %v8333_v38 = vadd.f32 %v1735_v21, %v1571_v2  ;;  %v1362_v2 = vor.u32 %v8331_v53, %v10303_v57  ;;  %3188 = vperm.xlu1 %7381, %v3069_v33   ;;  %v3077_v33 = vld [vmem:[%s10245_s5 + $0xd8] sm:$0xff] }
 0x203   : > { %v1572_v13 = vadd.f32 %v1498_v59, %v1329_v14  ;;  %v8335_v26 = vpop.f32.mrf.mxu1 }
 0x204   : > { %10474 = vst [vmem:[#allocation68_spill] sm:$0xff] %v8333_v38 }
 0x205   : > { %10475 = vst [vmem:[#allocation69_spill] sm:$0xff] %v8335_v26  ;;  %3213 = vperm.xlu0 %7380, %v3074_v7   ;;  %v1363_v26 = vsel %vm1049_vm5, %v8293_v3, %v1362_v2 }
 0x208   : > { %v1257_v35 = vpop.f32.mrf.mxu2 }
 0x209   : > { %v1330_v14 = vadd.f32 %v1257_v35, %v8118_v8  ;;  %v1738_v21 = vpop.f32.mrf.mxu0  ;;  %v3055_v8 = vld [vmem:[%s10245_s5 + $0x28] sm:$0xff]  ;;  %v1106_v35 = vrot.slane %v10480_v60, 7 }
 0x20a   : > { %v1500_v59 = vpop.f32.mrf.mxu3  ;;  %v1812_v44 = vadd.f32 %v1738_v21, %v1572_v13  ;;  %v3072_v13 = vld [vmem:[%s10245_s5 + $0xb0] sm:$0xff]  ;;  %3118 = vperm.xlu2 %7382, %v3055_v8   ;;  %v3058_v8 = vld [vmem:[%s10245_s5 + $0x40] sm:$0xff] }
 0x20b   : > { %v1573_v38 = vadd.f32 %v1500_v59, %v1330_v14  ;;  %v2045_v57 = vpop.f32.mrf.mxu1  ;;  %3203 = vperm.xlu1 %7381, %v3072_v13   ;;  %v3075_v13 = vld [vmem:[%s10245_s5 + $0xc8] sm:$0xff] }
 0x20c   : > { %v8360_v53 = vadd.f32 %v2045_v57, %v1812_v44  ;;  %1777 = vmatmul.bf16.gmra.mxu0 %v7394_v24  ;;  %v8374_v44 = vshrl.u32 %v8358_v29, 16  ;;  %v10478_v57 = vld [vmem:[#allocation35_spill] sm:$0xff] }
 0x20d   : > { %1299 = vmatmul.bf16.gmra.mxu2 %v1105_v11  ;;  %3228 = vperm.xlu0 %7380, %v3077_v33   ;;  %v10483_v33 = vshll.u32 %v10479_v56, 16 }
 0x20e   : > { %10477 = vst [vmem:[#allocation71_spill] sm:$0xff] %v8360_v53  ;;  %2084 = vmatmul.bf16.gmra.mxu1 %v8356_v40  ;;  %v1367_v24 = vrot.slane %v8374_v44, 7  ;;  %v8385_v53 = vshll.u32 %v8358_v29, 16 }
 0x20f   : > { %1542 = vmatmul.bf16.gmra.mxu3 %v1363_v26 }
 0x210   : > { %v1260_v11 = vpop.f32.mrf.mxu2 }
 0x211   : > { %v1331_v26 = vadd.f32 %v1260_v11, %v10478_v57  ;;  %v1740_v2 = vpop.f32.mrf.mxu0  ;;  %v1107_v11 = vor.u32 %v1106_v35, %v10483_v33  ;;  %v1370_v57 = vor.u32 %v8385_v53, %v1367_v24  ;;  %v10484_v24 = vrot.slane %v8320_v4, 7 }
 0x212   : > { %v1503_v7 = vpop.f32.mrf.mxu3  ;;  %v8379_v59 = vadd.f32 %v1740_v2, %v1573_v38  ;;  %v3080_v38 = vld [vmem:[%s10245_s5 + $0xf0] sm:$0xff]  ;;  %3133 = vperm.xlu2 %7382, %v3058_v8  }
 0x213   : > { %v1574_v14 = vadd.f32 %v1503_v7, %v1331_v26  ;;  %v8381_v21 = vpop.f32.mrf.mxu1  ;;  %v1892_v26 = vor.u32 %v1890_v10, %v8320_v4  ;;  %v1893_v7 = vrot.slane %v8385_v53, 1  ;;  %3218 = vperm.xlu1 %7381, %v3075_v13   ;;  %v1108_v40 = vsel %vm1049_vm5, %v8293_v3, %v1107_v11  ;;  %v3078_v3 = vld [vmem:[%s10245_s5 + $0xe0] sm:$0xff] }
 0x214   : > { %10481 = vst [vmem:[#allocation35_spill] sm:$0xff] %v8379_v59  ;;  %v1371_v10 = vsel %vm1049_vm5, %v10484_v24, %v1370_v57 }
 0x215   : > { %10482 = vst [vmem:[#allocation33_spill] sm:$0xff] %v8381_v21  ;;  %3243 = vperm.xlu0 %7380, %v3080_v38   ;;  %v8408_v33 = vsel %vm1833_vm7, %v1892_v26, %v1893_v7  ;;  %v3064_v26 = vld [vmem:[%s10245_s5 + $0x70] sm:$0xff] }
 0x218   : > { %v1262_v2 = vpop.f32.mrf.mxu2 }
 0x219   : > { %v1332_v60 = vadd.f32 %v1262_v2, %v7944_v31  ;;  %v1743_v59 = vpop.f32.mrf.mxu0  ;;  %v3061_v31 = vld [vmem:[%s10245_s5 + $0x58] sm:$0xff] }
 0x21a   : > { %v1505_v21 = vpop.f32.mrf.mxu3  ;;  %v1814_v56 = vadd.f32 %v1743_v59, %v1574_v14  ;;  %v3083_v14 = vld [vmem:[%s10245_s5 + $0x108] sm:$0xff]  ;;  %3148 = vperm.xlu2 %7382, %v3061_v31   ;;  %v3081_v2 = vld [vmem:[%s10245_s5 + $0xf8] sm:$0xff] }
 0x21b   : > { %v1575_v58 = vadd.f32 %v1505_v21, %v1332_v60  ;;  %v2050_v35 = vpop.f32.mrf.mxu1  ;;  %3233 = vperm.xlu1 %7381, %v3078_v3   ;;  %v7116_v60 = vld [vmem:[#allocation5 + $0x50] sm:$0xff]  ;;  %v10485_v3 = vmov 0 }
 0x21c   : > { %v8410_v8 = vadd.f32 %v2050_v35, %v1814_v56  ;;  %1782 = vmatmul.bf16.gmra.mxu0 %v8309_v36  ;;  %v7395_v56 = vld [vmem:[%s7671_s11 + $0x8] sm:$0xff]  ;;  %v7396_v35 = vld [vmem:[%s7671_s11 + $0x10] sm:$0xff]  ;;  %3823 = vmatpush.bf16.msra.mxu1 %v7116_v60  ;;  %v10486_v3 = vsel %vm8441_vm11, 4294967295, %v10485_v3 }
 0x21d   : > { %1304 = vmatmul.bf16.gmra.mxu2 %v1108_v40  ;;  %3258 = vperm.xlu0 %7380, %v3083_v14   ;;  %v2361_v24 = vrot.slane %v7396_v35, 1  ;;  %10487 = vst [vmem:[#allocation72_spill] sm:$0xff] %v10486_v3 }
 0x21e   : > { %2089 = vmatmul.bf16.gmra.mxu1 %v8408_v33 }
 0x21f   : > { %1547 = vmatmul.bf16.gmra.mxu3 %v1371_v10  ;;  %v1895_v10 = vor.u32 %v1893_v7, %v8374_v44 }
 0x220   : > { %v1265_v40 = vpop.f32.mrf.mxu2 }
 0x221   : > { %v1333_v59 = vadd.f32 %v1265_v40, %v7952_v6  ;;  %v1745_v13 = vpop.f32.mrf.mxu0  ;;  %v3086_v6 = vld [vmem:[%s10245_s5 + $0x120] sm:$0xff] }
 0x222   : > { %v1508_v21 = vpop.f32.mrf.mxu3  ;;  %v8424_v11 = vadd.f32 %v1745_v13, %v1575_v58  ;;  %v2360_v58 = vrot.slane %v7395_v56, 1  ;;  %3163 = vperm.xlu2 %7382, %v3064_v26   ;;  %v8449_v26 = vsel %vm8441_vm11, %v1895_v10, 0  ;;  %v2642_v10 = vrot.slane %v7746_v63, 1 }
 0x223   : > { %v1576_v38 = vadd.f32 %v1508_v21, %v1333_v59  ;;  %v8426_v57 = vpop.f32.mrf.mxu1  ;;  %3248 = vperm.xlu1 %7381, %v3081_v2   ;;  %v3089_v2 = vld [vmem:[%s10245_s5 + $0x138] sm:$0xff] }
 0x224   : > { %v2362_v7 = vsel %vm2359_vm10, %v2360_v58, %v2361_v24 }
 0x225   : > { %3273 = vperm.xlu0 %7380, %v3086_v6  }
 0x228   : > { %v1267_v31 = vpop.f32.mrf.mxu2 }
 0x229   : > { %v1334_v14 = vadd.f32 %v1267_v31, %v7964_v22  ;;  %v1748_v59 = vpop.f32.mrf.mxu0  ;;  %v3067_v22 = vld [vmem:[%s10245_s5 + $0x88] sm:$0xff]  ;;  %v2643_v31 = vrot.slane %v7749_v0, 2  ;;  %v7397_v0 = vld [vmem:[%s7671_s11 + $0x18] sm:$0xff] }
 0x22a   : > { %v1510_v40 = vpop.f32.mrf.mxu3  ;;  %v1816_v13 = vadd.f32 %v1748_v59, %v1576_v38  ;;  %v3084_v38 = vld [vmem:[%s10245_s5 + $0x110] sm:$0xff]  ;;  %3178 = vperm.xlu2 %7382, %v3067_v22  }
 0x22b   : > { %v1577_v21 = vadd.f32 %v1510_v40, %v1334_v14  ;;  %v2055_v56 = vpop.f32.mrf.mxu1  ;;  %3263 = vperm.xlu1 %7381, %v3084_v38   ;;  %v2645_v14 = vrot.slane %v7769_v27, 1  ;;  %v2646_v40 = vrot.slane %v7772_v28, 2  ;;  %v2644_v63 = vor.u32 %v2643_v31, %v2642_v10  ;;  %v10489_v10 = vld [vmem:[#allocation41_spill] sm:$0xff]  ;;  %v3090_v31 = vld [vmem:[%s10245_s5 + $0x140] sm:$0xff] }
 0x22c   : > { %v8451_v60 = vadd.f32 %v2055_v56, %v1816_v13  ;;  %1787 = vmatmul.bf16.gmra.mxu0 %v8358_v29  ;;  %v2363_v38 = vrot.slane %v7397_v0, 1 }
 0x22d   : > { %2213 = vmatmul.bf16.vlgmr.msra.gmra.mxu2 %v8004_v30  ;;  %3288 = vperm.xlu0 %7380, %v3089_v2   ;;  %v2647_v22 = vor.u32 %v2646_v40, %v2645_v14  ;;  %v10490_v40 = vld [vmem:[#allocation37_spill] sm:$0xff] }
 0x22e   : > { %2094 = vmatmul.bf16.gmra.mxu1 %v8449_v26  ;;  %v2364_v3 = vsel %vm2359_vm10, %v2361_v24, %v2363_v38 }
 0x22f   : > { %2495 = vmatmul.bf16.vlgmr.msra.gmra.mxu3 %v2362_v7  ;;  %v3070_v7 = vld [vmem:[%s10245_s5 + $0xa0] sm:$0xff] }
 0x230   : > { %v1270_v6 = vpop.f32.mrf.mxu2 }
 0x231   : > { %v1335_v30 = vadd.f32 %v1270_v6, %v7976_v39  ;;  %v1750_v35 = vpop.f32.mrf.mxu0  ;;  %v3087_v39 = vld [vmem:[%s10245_s5 + $0x128] sm:$0xff]  ;;  %v2648_v6 = vsel %vm2641_vm12, %v2644_v63, %v2647_v22  ;;  %v10491_v63 = vld [vmem:[#allocation16_spill] sm:$0xff] }
 0x232   : > { %v1513_v58 = vpop.f32.mrf.mxu3  ;;  %v8470_v13 = vadd.f32 %v1750_v35, %v1577_v21  ;;  %3193 = vperm.xlu2 %7382, %v3070_v7  }
 0x233   : > { %v1578_v59 = vadd.f32 %v1513_v58, %v1335_v30  ;;  %v8472_v56 = vpop.f32.mrf.mxu1  ;;  %3278 = vperm.xlu1 %7381, %v3087_v39   ;;  %v2649_v39 = vrot.slane %v7792_v55, 1 }
 0x234   : > { %10488 = vst [vmem:[#allocation73_spill] sm:$0xff] %v8472_v56 }
 0x238   : > { %v1272_v27 = vpop.f32.mrf.mxu2 }
 0x239   : > { %v1336_v28 = vadd.f32 %v1272_v27, %v7985_v20  ;;  %v1753_v2 = vpop.f32.mrf.mxu0  ;;  %v3073_v20 = vld [vmem:[%s10245_s5 + $0xb8] sm:$0xff] }
 0x23a   : > { %v1515_v21 = vpop.f32.mrf.mxu3  ;;  %v1818_v58 = vadd.f32 %v1753_v2, %v1578_v59  ;;  %3208 = vperm.xlu2 %7382, %v3073_v20  }
 0x23b   : > { %v1579_v30 = vadd.f32 %v1515_v21, %v1336_v28  ;;  %v2060_v35 = vpop.f32.mrf.mxu1  ;;  %3293 = vperm.xlu1 %7381, %v3090_v31   ;;  %v3076_v21 = vld [vmem:[%s10245_s5 + $0xd0] sm:$0xff] }
 0x23c   : > { %v8484_v56 = vadd.f32 %v2060_v35, %v1818_v58  ;;  %2818 = vmatmul.bf16.vlgmr.msra.gmra.mxu0 %v2648_v6  ;;  %v7398_v6 = vld [vmem:[%s7671_s11 + $0x20] sm:$0xff] }
 0x23d   : > { %2218 = vmatmul.bf16.gmra.mxu2 %v10489_v10  ;;  %v2365_v58 = vrot.slane %v7398_v6, 1  ;;  %v10493_v10 = vld [vmem:[#allocation38_spill] sm:$0xff] }
 0x23f   : > { %2500 = vmatmul.bf16.gmra.mxu3 %v2364_v3  ;;  %v2650_v3 = vrot.slane %v10491_v63, 2  ;;  %v10495_v63 = vld [vmem:[#allocation44_spill] sm:$0xff] }
 0x240   : > { %v1275_v14 = vpop.f32.mrf.mxu2 }
 0x241   : > { %v1337_v24 = vadd.f32 %v1275_v14, %v10490_v40  ;;  %v1755_v7 = vpop.f32.mrf.mxu0  ;;  %v2651_v2 = vor.u32 %v2650_v3, %v2649_v39  ;;  %v3079_v39 = vld [vmem:[%s10245_s5 + $0xe8] sm:$0xff] }
 0x242   : > { %v1518_v59 = vpop.f32.mrf.mxu3  ;;  %v8496_v27 = vadd.f32 %v1755_v7, %v1579_v30  ;;  %3223 = vperm.xlu2 %7382, %v3076_v21   ;;  %v10496_v21 = vld [vmem:[#allocation39_spill] sm:$0xff] }
 0x243   : > { %v1580_v0 = vadd.f32 %v1518_v59, %v1337_v24  ;;  %v8498_v28 = vpop.f32.mrf.mxu1  ;;  %v2652_v14 = vsel %vm2641_vm12, %v2647_v22, %v2651_v2  ;;  %v2366_v59 = vsel %vm2359_vm10, %v2363_v38, %v2365_v58  ;;  %v10497_v38 = vld [vmem:[#allocation19_spill] sm:$0xff] }
 0x244   : > { %10492 = vst [vmem:[#allocation41_spill] sm:$0xff] %v8498_v28 }
 0x248   : > { %v1277_v35 = vpop.f32.mrf.mxu2 }
 0x249   : > { %v1338_v20 = vadd.f32 %v1277_v35, %v10493_v10  ;;  %v1758_v55 = vpop.f32.mrf.mxu0  ;;  %v2653_v35 = vrot.slane %v7815_v25, 1  ;;  %v2654_v10 = vrot.slane %v10497_v38, 2 }
 0x24a   : > { %v1520_v31 = vpop.f32.mrf.mxu3  ;;  %v1820_v30 = vadd.f32 %v1758_v55, %v1580_v0  ;;  %3238 = vperm.xlu2 %7382, %v3079_v39  }
 0x24b   : > { %v1581_v40 = vadd.f32 %v1520_v31, %v1338_v20  ;;  %v2065_v24 = vpop.f32.mrf.mxu1 }
 0x24c   : > { %v8507_v7 = vadd.f32 %v2065_v24, %v1820_v30  ;;  %2823 = vmatmul.bf16.gmra.mxu0 %v2652_v14  ;;  %v7115_v14 = vld [vmem:[#allocation5 + $0x48] sm:$0xff]  ;;  %v3082_v30 = vld [vmem:[%s10245_s5 + $0x100] sm:$0xff]  ;;  %v2655_v24 = vor.u32 %v2654_v10, %v2653_v35  ;;  %v3085_v35 = vld [vmem:[%s10245_s5 + $0x118] sm:$0xff] }
 0x24d   : > { %2223 = vmatmul.bf16.gmra.mxu2 %v10495_v63  ;;  %3824 = vmatpush.bf16.msra.mxu1 %v7115_v14 }
 0x24e   : > { %10494 = vst [vmem:[#allocation37_spill] sm:$0xff] %v8507_v7 }
 0x24f   : > { %2505 = vmatmul.bf16.gmra.mxu3 %v2366_v59  ;;  %v7399_v59 = vld [vmem:[%s7671_s11 + $0x28] sm:$0xff] }
 0x250   : > { %v1280_v3 = vpop.f32.mrf.mxu2  ;;  %v2367_v63 = vrot.slane %v7399_v59, 1 }
 0x251   : > { %v1339_v22 = vadd.f32 %v1280_v3, %v10496_v21  ;;  %v1760_v0 = vpop.f32.mrf.mxu0  ;;  %v10500_v3 = vld [vmem:[#allocation40_spill] sm:$0xff] }
 0x252   : > { %v1523_v6 = vpop.f32.mrf.mxu3  ;;  %v8516_v31 = vadd.f32 %v1760_v0, %v1581_v40  ;;  %3253 = vperm.xlu2 %7382, %v3082_v30   ;;  %v2656_v40 = vsel %vm2641_vm12, %v2651_v2, %v2655_v24  ;;  %v2368_v14 = vsel %vm2359_vm10, %v2365_v58, %v2367_v63  ;;  %v10503_v30 = vld [vmem:[#allocation42_spill] sm:$0xff] }
 0x253   : > { %v1582_v20 = vadd.f32 %v1523_v6, %v1339_v22  ;;  %v8518_v55 = vpop.f32.mrf.mxu1  ;;  %v10504_v58 = vld [vmem:[#allocation22_spill] sm:$0xff] }
 0x254   : > { %10498 = vst [vmem:[#allocation16_spill] sm:$0xff] %v8516_v31  ;;  %v10502_v31 = vld [vmem:[#allocation47_spill] sm:$0xff] }
 0x255   : > { %10499 = vst [vmem:[#allocation38_spill] sm:$0xff] %v8518_v55 }
 0x258   : > { %v1282_v39 = vpop.f32.mrf.mxu2 }
 0x259   : > { %v1340_v25 = vadd.f32 %v1282_v39, %v10500_v3  ;;  %v1763_v38 = vpop.f32.mrf.mxu0  ;;  %v2657_v39 = vrot.slane %v7838_v62, 1  ;;  %v2658_v3 = vrot.slane %v10504_v58, 2 }
 0x25a   : > { %v1525_v21 = vpop.f32.mrf.mxu3  ;;  %v1822_v6 = vadd.f32 %v1763_v38, %v1582_v20  ;;  %3268 = vperm.xlu2 %7382, %v3085_v35   ;;  %v3088_v38 = vld [vmem:[%s10245_s5 + $0x130] sm:$0xff]  ;;  %v10507_v35 = vld [vmem:[#allocation43_spill] sm:$0xff] }
 0x25b   : > { %v1583_v22 = vadd.f32 %v1525_v21, %v1340_v25  ;;  %v2070_v0 = vpop.f32.mrf.mxu1 }
 0x25c   : > { %v8527_v55 = vadd.f32 %v2070_v0, %v1822_v6  ;;  %2828 = vmatmul.bf16.gmra.mxu0 %v2656_v40  ;;  %v2659_v40 = vor.u32 %v2658_v3, %v2657_v39  ;;  %v7400_v6 = vld [vmem:[%s7671_s11 + $0x30] sm:$0xff]  ;;  %v10510_v3 = vld [vmem:[#allocation45_spill] sm:$0xff] }
 0x25d   : > { %2228 = vmatmul.bf16.gmra.mxu2 %v10502_v31  ;;  %v2369_v0 = vrot.slane %v7400_v6, 1 }
 0x25e   : > { %10501 = vst [vmem:[#allocation44_spill] sm:$0xff] %v8527_v55  ;;  %v2660_v58 = vsel %vm2641_vm12, %v2655_v24, %v2659_v40  ;;  %v10511_v24 = vld [vmem:[#allocation25_spill] sm:$0xff] }
 0x25f   : > { %2510 = vmatmul.bf16.gmra.mxu3 %v2368_v14 }
 0x260   : > { %v1285_v10 = vpop.f32.mrf.mxu2 }
 0x261   : > { %v1341_v2 = vadd.f32 %v1285_v10, %v10503_v30  ;;  %v1765_v20 = vpop.f32.mrf.mxu0 }
 0x262   : > { %v1528_v59 = vpop.f32.mrf.mxu3  ;;  %v8536_v21 = vadd.f32 %v1765_v20, %v1583_v22  ;;  %3283 = vperm.xlu2 %7382, %v3088_v38   ;;  %v2370_v20 = vsel %vm2359_vm10, %v2367_v63, %v2369_v0 }
 0x263   : > { %v1584_v25 = vadd.f32 %v1528_v59, %v1341_v2  ;;  %v8538_v31 = vpop.f32.mrf.mxu1 }
 0x264   : > { %10505 = vst [vmem:[#allocation39_spill] sm:$0xff] %v8536_v21  ;;  %v10509_v21 = vld [vmem:[#allocation50_spill] sm:$0xff] }
 0x265   : > { %10506 = vst [vmem:[#allocation19_spill] sm:$0xff] %v8538_v31 }
 0x268   : > { %v1287_v14 = vpop.f32.mrf.mxu2 }
 0x269   : > { %v1342_v10 = vadd.f32 %v1287_v14, %v10507_v35  ;;  %v1768_v62 = vpop.f32.mrf.mxu0  ;;  %v2661_v35 = vrot.slane %v7863_v50, 1 }
 0x26a   : > { %v1530_v30 = vpop.f32.mrf.mxu3  ;;  %v1824_v22 = vadd.f32 %v1768_v62, %v1584_v25 }
 0x26b   : > { %v1585_v2 = vadd.f32 %v1530_v30, %v1342_v10  ;;  %v2075_v59 = vpop.f32.mrf.mxu1  ;;  %v2662_v10 = vrot.slane %v10511_v24, 2 }
 0x26c   : > { %v8547_v31 = vadd.f32 %v2075_v59, %v1824_v22  ;;  %2833 = vmatmul.bf16.gmra.mxu0 %v2660_v58  ;;  %v7401_v22 = vld [vmem:[%s7671_s11 + $0x38] sm:$0xff]  ;;  %v10514_v58 = vld [vmem:[#allocation46_spill] sm:$0xff] }
 0x26d   : > { %2233 = vmatmul.bf16.gmra.mxu2 %v10509_v21  ;;  %v2663_v63 = vor.u32 %v2662_v10, %v2661_v35  ;;  %v2371_v59 = vrot.slane %v7401_v22, 1  ;;  %v10517_v35 = vld [vmem:[#allocation48_spill] sm:$0xff] }
 0x26e   : > { %10508 = vst [vmem:[#allocation40_spill] sm:$0xff] %v8547_v31 }
 0x26f   : > { %2515 = vmatmul.bf16.gmra.mxu3 %v2370_v20  ;;  %v2372_v24 = vsel %vm2359_vm10, %v2369_v0, %v2371_v59 }
 0x270   : > { %v1290_v39 = vpop.f32.mrf.mxu2 }
 0x271   : > { %v1343_v38 = vadd.f32 %v1290_v39, %v10510_v3  ;;  %v1770_v14 = vpop.f32.mrf.mxu0  ;;  %v2664_v39 = vsel %vm2641_vm12, %v2659_v40, %v2663_v63 }
 0x272   : > { %v1533_v6 = vpop.f32.mrf.mxu3  ;;  %v8553_v30 = vadd.f32 %v1770_v14, %v1585_v2 }
 0x273   : > { %v1586_v25 = vadd.f32 %v1533_v6, %v1343_v38  ;;  %v8555_v62 = vpop.f32.mrf.mxu1  ;;  %v7114_v38 = vld [vmem:[#allocation5 + $0x40] sm:$0xff]  ;;  %v10516_v6 = vld [vmem:[#allocation53_spill] sm:$0xff] }
 0x274   : > { %10512 = vst [vmem:[#allocation47_spill] sm:$0xff] %v8553_v30  ;;  %3825 = vmatpush.bf16.msra.mxu1 %v7114_v38 }
 0x275   : > { %10513 = vst [vmem:[#allocation42_spill] sm:$0xff] %v8555_v62 }
 0x278   : > { %v1292_v21 = vpop.f32.mrf.mxu2 }
 0x279   : > { %v1344_v20 = vadd.f32 %v1292_v21, %v10514_v58  ;;  %v1773_v55 = vpop.f32.mrf.mxu0  ;;  %v10518_v21 = vmov 0  }
 0x27a   : > { %v1535_v31 = vpop.f32.mrf.mxu3  ;;  %v1826_v7 = vadd.f32 %v1773_v55, %v1586_v25  ;;  %3826 = vmatmul.bf16.vlgmr.msra.gmra.mxu1 %v10518_v21  ;;  %v10519_v55 = vld [vmem:[#allocation28_spill] sm:$0xff]  ;;  %v10520_v25 = vld [vmem:[#allocation29_spill] sm:$0xff] }
 0x27b   : > { %v1587_v3 = vadd.f32 %v1535_v31, %v1344_v20  ;;  %v2080_v50 = vpop.f32.mrf.mxu1  ;;  %v2665_v40 = vrot.slane %v10519_v55, 1  ;;  %v2666_v0 = vrot.slane %v10520_v25, 2 }
 0x27c   : > { %v8561_v2 = vadd.f32 %v2080_v50, %v1826_v7  ;;  %2838 = vmatmul.bf16.gmra.mxu0 %v2664_v39  ;;  %v7402_v39 = vld [vmem:[%s7671_s11 + $0x40] sm:$0xff] }
 0x27d   : > { %2238 = vmatmul.bf16.gmra.mxu2 %v10516_v6  ;;  %v2667_v50 = vor.u32 %v2666_v0, %v2665_v40  ;;  %v10522_v6 = vld [vmem:[#allocation49_spill] sm:$0xff]  ;;  %v10525_v40 = vld [vmem:[#allocation51_spill] sm:$0xff] }
 0x27e   : > { %10515 = vst [vmem:[#allocation22_spill] sm:$0xff] %v8561_v2 }
 0x27f   : > { %2520 = vmatmul.bf16.gmra.mxu3 %v2372_v24  ;;  %v2373_v24 = vrot.slane %v7402_v39, 1  ;;  %v2668_v62 = vsel %vm2641_vm12, %v2663_v63, %v2667_v50  ;;  %v10526_v63 = vld [vmem:[#allocation34_spill] sm:$0xff] }
 0x280   : > { %v1295_v14 = vpop.f32.mrf.mxu2 }
 0x281   : > { %v1345_v10 = vadd.f32 %v1295_v14, %v10517_v35  ;;  %v1775_v31 = vpop.f32.mrf.mxu0 }
 0x282   : > { %v1538_v22 = vpop.f32.mrf.mxu3  ;;  %v8568_v7 = vadd.f32 %v1775_v31, %v1587_v3 }
 0x283   : > { %v1588_v58 = vadd.f32 %v1538_v22, %v1345_v10  ;;  %v8570_v20 = vpop.f32.mrf.mxu1  ;;  %v2374_v10 = vsel %vm2359_vm10, %v2371_v59, %v2373_v24  ;;  %v10524_v22 = vld [vmem:[#allocation55_spill] sm:$0xff] }
 0x284   : > { %10521 = vst [vmem:[#allocation43_spill] sm:$0xff] %v8570_v20  ;;  %v7403_v59 = vld [vmem:[%s7671_s11 + $0x48] sm:$0xff] }
 0x288   : > { %v1297_v38 = vpop.f32.mrf.mxu2 }
 0x289   : > { %v1346_v2 = vadd.f32 %v1297_v38, %v10522_v6  ;;  %v1778_v35 = vpop.f32.mrf.mxu0  ;;  %v2669_v38 = vrot.slane %v7925_v46, 1 }
 0x28a   : > { %v1540_v14 = vpop.f32.mrf.mxu3  ;;  %v1828_v28 = vadd.f32 %v1778_v35, %v1588_v58  ;;  %v2375_v35 = vrot.slane %v7403_v59, 1 }
 0x28b   : > { %v1589_v30 = vadd.f32 %v1540_v14, %v1346_v2  ;;  %v2085_v55 = vpop.f32.mrf.mxu1  ;;  %v2670_v2 = vrot.slane %v10526_v63, 2 }
 0x28c   : > { %v8576_v3 = vadd.f32 %v2085_v55, %v1828_v28  ;;  %2843 = vmatmul.bf16.gmra.mxu0 %v2668_v62  ;;  %v10527_v62 = vld [vmem:[#allocation52_spill] sm:$0xff]  ;;  %v2376_v63 = vsel %vm2359_vm10, %v2373_v24, %v2375_v35 }
 0x28d   : > { %2243 = vmatmul.bf16.gmra.mxu2 %v10524_v22  ;;  %v2671_v28 = vor.u32 %v2670_v2, %v2669_v38 }
 0x28e   : > { %10523 = vst [vmem:[#allocation50_spill] sm:$0xff] %v8576_v3 }
 0x28f   : > { %2525 = vmatmul.bf16.gmra.mxu3 %v2374_v10 }
 0x290   : > { %v1300_v31 = vpop.f32.mrf.mxu2 }
 0x291   : > { %v1347_v25 = vadd.f32 %v1300_v31, %v10525_v40  ;;  %v1780_v39 = vpop.f32.mrf.mxu0  ;;  %v2672_v31 = vsel %vm2641_vm12, %v2667_v50, %v2671_v28  ;;  %v2673_v50 = vrot.slane %v7680_v15, 1 }
 0x292   : > { %v1543_v0 = vpop.f32.mrf.mxu3  ;;  %v8582_v6 = vadd.f32 %v1780_v39, %v1589_v30  ;;  %v10528_v39 = vld [vmem:[#allocation54_spill] sm:$0xff] }
 0x293   : > { %v1590_v58 = vadd.f32 %v1543_v0, %v1347_v25  ;;  %v8584_v14 = vpop.f32.mrf.mxu1  ;;  %v7113_v25 = vld [vmem:[#allocation5 + $0x38] sm:$0xff] }
 0x294   : > { %3979 = vmatpush.bf16.msrb.mxu2 %v7113_v25 }
 0x298   : > { %v1302_v55 = vpop.f32.mrf.mxu2 }
 0x299   : > { %v1348_v10 = vadd.f32 %v1302_v55, %v10527_v62  ;;  %v1783_v3 = vpop.f32.mrf.mxu0  ;;  %v7129_v55 = vld [vmem:[#allocation5 + $0xb8] sm:$0xff] }
 0x29a   : > { %v1545_v22 = vpop.f32.mrf.mxu3  ;;  %v1830_v20 = vadd.f32 %v1783_v3, %v1590_v58  ;;  %v2674_v3 = vrot.slane %v7683_v16, 2  ;;  %4237 = vmatpush.bf16.msrb.mxu3 %v7129_v55  ;;  %v7405_v55 = vld [vmem:[%s7671_s11 + $0x58] sm:$0xff] }
 0x29b   : > { %v1591_v40 = vadd.f32 %v1545_v22, %v1348_v10  ;;  %v2090_v46 = vpop.f32.mrf.mxu1 }
 0x29c   : > { %v8590_v30 = vadd.f32 %v2090_v46, %v1830_v20  ;;  %2848 = vmatmul.bf16.gmra.mxu0 %v2672_v31  ;;  %v2675_v62 = vor.u32 %v2674_v3, %v2673_v50  ;;  %v2678_v50 = vrot.slane %v7689_v18, 2 }
 0x29d   : > { %2248 = vmatmul.bf16.gmra.mxu2 %v8126_v61  ;;  %v7404_v61 = vld [vmem:[%s7671_s11 + $0x50] sm:$0xff] }
 0x29e   : > { %v2377_v10 = vrot.slane %v7404_v61, 1  ;;  %v2379_v61 = vrot.slane %v7405_v55, 1 }
 0x29f   : > { %2530 = vmatmul.bf16.gmra.mxu3 %v2376_v63  ;;  %v2676_v63 = vsel %vm2641_vm12, %v2671_v28, %v2675_v62  ;;  %v2677_v28 = vrot.slane %v7686_v17, 1 }
 0x2a0   : > { %v1305_v0 = vpop.f32.mrf.mxu2  ;;  %v2378_v15 = vsel %vm2359_vm10, %v2375_v35, %v2377_v10  ;;  %v2380_v18 = vsel %vm2359_vm10, %v2377_v10, %v2379_v61 }
 0x2a1   : > { %v1349_v38 = vadd.f32 %v1305_v0, %v10528_v39  ;;  %v1785_v59 = vpop.f32.mrf.mxu0  ;;  %v7145_v39 = vld [vmem:[#allocation5 + $0x138] sm:$0xff] }
 0x2a2   : > { %v1548_v2 = vpop.f32.mrf.mxu3  ;;  %v8596_v24 = vadd.f32 %v1785_v59, %v1591_v40  ;;  %v7137_v40 = vld [vmem:[#allocation5 + $0xf8] sm:$0xff]  ;;  %4720 = vmatpush.bf16.msrb.mxu1 %v7145_v39 }
 0x2a3   : > { %v1592_v58 = vadd.f32 %v1548_v2, %v1349_v38  ;;  %v8598_v20 = vpop.f32.mrf.mxu1  ;;  %4480 = vmatpush.bf16.msrb.mxu0 %v7137_v40 }
 0x2a8   : > { %v1307_v22 = vpop.f32.mrf.mxu2 }
 0x2a9   : > { %v1788_v46 = vpop.f32.mrf.mxu0 }
 0x2aa   : > { %v1550_v31 = vpop.f32.mrf.mxu3  ;;  %v1832_v25 = vadd.f32 %v1788_v46, %v1592_v58  ;;  %v2679_v58 = vor.u32 %v2678_v50, %v2677_v28  ;;  %v8613_v46 = vld [vmem:[%s10243_s3] ss:$0 sm:$0xff]  ;;  %v2682_v28 = vrot.slane %v7718_v43, 2 }
 0x2ab   : > { %v2095_v0 = vpop.f32.mrf.mxu1 }
 0x2ac   : > { %v8603_v16 = vadd.f32 %v2095_v0, %v1832_v25  ;;  %2853 = vmatmul.bf16.gmra.mxu0 %v2676_v63  ;;  %v2680_v25 = vsel %vm2641_vm12, %v2675_v62, %v2679_v58  ;;  %v2681_v62 = vrot.slane %v7716_v42, 1 }
 0x2ad   : > { %2253 = vmatmul.bf16.gmra.mxu2 %v8142_v12 }
 0x2ae   : > { %10529 = vst [vmem:[#allocation45_spill] sm:$0xff] %v8603_v16 }
 0x2af   : > { %2535 = vmatmul.bf16.gmra.mxu3 %v2378_v15  ;;  %v3094_v15 = vpop.permute.xlu0 %3093 }
 0x2b0   : > { %v2214_v38 = vpop.f32.mrf.mxu2 }
 0x2b1   : > { %v1790_v59 = vpop.f32.mrf.mxu0  ;;  %v2318_v35 = vadd.f32 %v2214_v38, %v8128_v23 }
 0x2b2   : > { %v2496_v2 = vpop.f32.mrf.mxu3 }
 0x2b3   : > { %v2097_v3 = vpop.f32.mrf.mxu1  ;;  %v2600_v22 = vadd.f32 %v2496_v2, %v2318_v35 }
 0x2b8   : > { %v2216_v12 = vpop.f32.mrf.mxu2 }
 0x2b9   : > { %v2819_v63 = vpop.f32.mrf.mxu0  ;;  %v2319_v0 = vadd.f32 %v2216_v12, %v8134_v19  ;;  %v10530_v19 = vld [vmem:[#allocation56_spill] sm:$0xff]  ;;  %v8625_v12 = vld [vmem:[%s7671_s11 + $0x60] sm:$0xff] }
 0x2ba   : > { %v2498_v31 = vpop.f32.mrf.mxu3  ;;  %v2923_v17 = vadd.f32 %v2819_v63, %v2600_v22  ;;  %v2381_v22 = vrot.slane %v8625_v12, 1 }
 0x2bb   : > { %v2601_v39 = vadd.f32 %v2498_v31, %v2319_v0  ;;  %v3099_v31 = vpop.permute.xlu0 %3098 }
 0x2bc   : > { %v2968_v23 = vadd.f32 %v8613_v46, %v2923_v17  ;;  %2858 = vmatmul.bf16.gmra.mxu0 %v2680_v25 }
 0x2bd   : > { %2258 = vmatmul.bf16.gmra.mxu2 %v8158_v34  ;;  %v2683_v34 = vor.u32 %v2682_v28, %v2681_v62  ;;  %v3104_v28 = vpop.permute.xlu1 %3103 }
 0x2be   : > { %v3009_v38 = vmax.f32 %v2968_v23, 0.0 }
 0x2bf   : > { %2540 = vmatmul.bf16.gmra.mxu3 %v2380_v18  ;;  %v2684_v43 = vsel %vm2641_vm12, %v2679_v58, %v2683_v34 }
 0x2c0   : > { %v2219_v40 = vpop.f32.mrf.mxu2  ;;  %v3296_v50 = vmul.f32 %v3094_v15, %v3009_v38 }
 0x2c1   : > { %v2821_v59 = vpop.f32.mrf.mxu0  ;;  %v2320_v3 = vadd.f32 %v2219_v40, %v10530_v19  ;;  %v2382_v40 = vsel %vm2359_vm10, %v2379_v61, %v2381_v22 }
 0x2c2   : > { %v2501_v2 = vpop.f32.mrf.mxu3  ;;  %v2924_v10 = vadd.f32 %v2821_v59, %v2601_v39  ;;  %v3337_v25 = vpack.c.bf16 %v3296_v50, %v3296_v50  ;;  %v7128_v50 = vld [vmem:[#allocation5 + $0xb0] sm:$0xff] }
 0x2c3   : > { %v2602_v17 = vadd.f32 %v2501_v2, %v2320_v3  ;;  %4238 = vmatpush.bf16.msrb.mxu3 %v7128_v50 }
 0x2c4   : > { %v2969_v35 = vadd.f32 %v8613_v46, %v2924_v10  ;;  %v3417_v39 = vunpack.c.l.b16 %v3337_v25  ;;  %v7112_v10 = vld [vmem:[#allocation5 + $0x30] sm:$0xff] }
 0x2c5   : > { %3980 = vmatpush.bf16.msrb.mxu2 %v7112_v10  ;;  %v3109_v10 = vpop.permute.xlu1 %3108 }
 0x2c6   : > { %v3010_v55 = vmax.f32 %v2969_v35, 0.0 }
 0x2c8   : > { %v2221_v63 = vpop.f32.mrf.mxu2  ;;  %v3297_v18 = vmul.f32 %v3099_v31, %v3010_v55  ;;  %v2685_v55 = vrot.slane %v7751_v1, 1  ;;  %v7136_v1 = vld [vmem:[#allocation5 + $0xf0] sm:$0xff] }
 0x2c9   : > { %v2824_v0 = vpop.f32.mrf.mxu0  ;;  %v2321_v59 = vadd.f32 %v2221_v63, %v8150_v37  ;;  %4481 = vmatpush.bf16.msrb.mxu0 %v7136_v1 }
 0x2ca   : > { %v2503_v42 = vpop.f32.mrf.mxu3  ;;  %v3338_v23 = vpack.c.bf16 %v3297_v18, %v3297_v18  ;;  %v2925_v15 = vadd.f32 %v2824_v0, %v2602_v17  ;;  %v10534_v0 = vld [vmem:[#allocation57_spill] sm:$0xff] }
 0x2cb   : > { %v2603_v19 = vadd.f32 %v2503_v42, %v2321_v59  ;;  %v7407_v59 = vld [vmem:[%s7671_s11 + $0x68] sm:$0xff] }
 0x2cc   : > { %v3418_v38 = vunpack.c.l.b16 %v3338_v23  ;;  %v2970_v62 = vadd.f32 %v8613_v46, %v2925_v15  ;;  %2863 = vmatmul.bf16.gmra.mxu0 %v2684_v43  ;;  %v7144_v15 = vld [vmem:[#allocation5 + $0x130] sm:$0xff] }
 0x2cd   : > { %2263 = vmatmul.bf16.gmra.mxu2 %v8174_v49  ;;  %v10532_v49 = vld [vmem:[#allocation13_spill] sm:$0xff]  ;;  %4721 = vmatpush.bf16.msrb.mxu1 %v7144_v15 }
 0x2ce   : > { %v8633_v2 = vpack.c.b16 %v3418_v38, %v3417_v39  ;;  %v3011_v3 = vmax.f32 %v2970_v62, 0.0  ;;  %v2686_v12 = vrot.slane %v10532_v49, 2  ;;  %v2383_v62 = vrot.slane %v7407_v59, 1 }
 0x2cf   : > { %2545 = vmatmul.bf16.gmra.mxu3 %v2382_v40 }
 0x2d0   : > { %10531 = vst [vmem:[#allocation25_spill] sm:$0xff] %v8633_v2  ;;  %v2224_v58 = vpop.f32.mrf.mxu2  ;;  %v3692_v61 = vrot.slane %v8633_v2, 7  ;;  %v8639_v31 = vshll.u32 %v8633_v2, 16  ;;  %v8644_v17 = vshrl.u32 %v8633_v2, 16  ;;  %v3298_v42 = vmul.f32 %v3104_v28, %v3011_v3 }
 0x2d1   : > { %v2826_v37 = vpop.f32.mrf.mxu0  ;;  %v2322_v43 = vadd.f32 %v2224_v58, %v10534_v0  ;;  %v2687_v40 = vor.u32 %v2686_v12, %v2685_v55  ;;  %v2384_v55 = vsel %vm2359_vm10, %v2381_v22, %v2383_v62  ;;  %v10535_v0 = vld [vmem:[#allocation58_spill] sm:$0xff] }
 0x2d2   : > { %v2506_v35 = vpop.f32.mrf.mxu3  ;;  %v2926_v63 = vadd.f32 %v2826_v37, %v2603_v19  ;;  %6754 = vmatmul.msk.bf16.gmra.mxu1 %vm7731_vm4, %v3692_v61  ;;  %v4874_v18 = vrot.slane %v8639_v31, 1  ;;  %v3339_v19 = vpack.c.bf16 %v3298_v42, %v3298_v42  ;;  %v3114_v42 = vpop.permute.xlu2 %3113 }
 0x2d3   : > { %v2604_v37 = vadd.f32 %v2506_v35, %v2322_v43  ;;  %v2688_v58 = vsel %vm2641_vm12, %v2683_v34, %v2687_v40 }
 0x2d4   : > { %v2971_v23 = vadd.f32 %v8613_v46, %v2926_v63  ;;  %v4875_v39 = vor.u32 %v4874_v18, %v8644_v17  ;;  %v3419_v12 = vunpack.c.l.b16 %v3339_v19  ;;  %v10537_v19 = vld [vmem:[#allocation15_spill] sm:$0xff] }
 0x2d6   : > { %v3012_v38 = vmax.f32 %v2971_v23, 0.0 }
 0x2d8   : > { %v2226_v50 = vpop.f32.mrf.mxu2  ;;  %v3299_v49 = vmul.f32 %v3109_v10, %v3012_v38 }
 0x2d9   : > { %v2829_v3 = vpop.f32.mrf.mxu0  ;;  %v2323_v23 = vadd.f32 %v2226_v50, %v10535_v0  ;;  %v2689_v50 = vrot.slane %v10447_v52, 1 }
 0x2da   : > { %v2508_v28 = vpop.f32.mrf.mxu3  ;;  %v3340_v63 = vpack.c.bf16 %v3299_v49, %v3299_v49  ;;  %v2927_v25 = vadd.f32 %v2829_v3, %v2604_v37 }
 0x2db   : > { %v2605_v34 = vadd.f32 %v2508_v28, %v2323_v23 }
 0x2dc   : > { %v3420_v18 = vunpack.c.l.b16 %v3340_v63  ;;  %v2972_v1 = vadd.f32 %v8613_v46, %v2927_v25  ;;  %2868 = vmatmul.bf16.gmra.mxu0 %v2688_v58  ;;  %v10538_v63 = vld [vmem:[#allocation59_spill] sm:$0xff] }
 0x2dd   : > { %2268 = vmatmul.bf16.gmra.mxu2 %v8190_v41  ;;  %v2690_v41 = vrot.slane %v10537_v19, 2 }
 0x2de   : > { %v8656_v35 = vpack.c.b16 %v3420_v18, %v3419_v12  ;;  %v3013_v43 = vmax.f32 %v2972_v1, 0.0  ;;  %v8680_v1 = vld [vmem:[%s7671_s11 + $0x70] sm:$0xff] }
 0x2df   : > { %2550 = vmatmul.bf16.gmra.mxu3 %v2384_v55  ;;  %v8673_v18 = vor.u32 %v2690_v41, %v2689_v50 }
 0x2e0   : > { %10536 = vst [vmem:[#allocation46_spill] sm:$0xff] %v8656_v35  ;;  %v2229_v15 = vpop.f32.mrf.mxu2  ;;  %v3693_v59 = vrot.slane %v8656_v35, 7  ;;  %v8660_v22 = vshrl.u32 %v8656_v35, 16  ;;  %v8665_v37 = vshll.u32 %v8656_v35, 16  ;;  %v3300_v58 = vmul.f32 %v3114_v42, %v3013_v43 }
 0x2e1   : > { %v2831_v10 = vpop.f32.mrf.mxu0  ;;  %v2324_v25 = vadd.f32 %v2229_v15, %v10538_v63  ;;  %v2385_v42 = vrot.slane %v8680_v1, 1  ;;  %v3119_v15 = vpop.permute.xlu2 %3118  ;;  %v7143_v1 = vld [vmem:[#allocation5 + $0x128] sm:$0xff] }
 0x2e2   : > { %v2511_v38 = vpop.f32.mrf.mxu3  ;;  %v2928_v49 = vadd.f32 %v2831_v10, %v2605_v34  ;;  %v3694_v3 = vsel %vm646_vm0, %v3692_v61, %v3693_v59  ;;  %v4876_v28 = vrot.slane %v8665_v37, 1  ;;  %v5676_v12 = vrot.slane %v8660_v22, 1  ;;  %4722 = vmatpush.bf16.msrb.mxu1 %v7143_v1 }
 0x2e3   : > { %3836 = vmatmul.bf16.gmra.mxu1 %v3694_v3  ;;  %v5677_v52 = vrot.slane %v8665_v37, 2  ;;  %v3341_v10 = vpack.c.bf16 %v3300_v58, %v3300_v58  ;;  %v2606_v19 = vadd.f32 %v2511_v38, %v2324_v25 }
 0x2e4   : > { %v2973_v55 = vadd.f32 %v8613_v46, %v2928_v49  ;;  %v8676_v0 = vsel %vm1833_vm7, %v4875_v39, %v4876_v28  ;;  %v4878_v23 = vor.u32 %v4876_v28, %v8660_v22  ;;  %v2692_v39 = vsel %vm2641_vm12, %v2687_v40, %v8673_v18 }
 0x2e5   : > { %10539 = vst [vmem:[#allocation53_spill] sm:$0xff] %v8676_v0  ;;  %v8683_v43 = vor.u32 %v5677_v52, %v5676_v12  ;;  %v2386_v28 = vsel %vm2359_vm10, %v2383_v62, %v2385_v42  ;;  %v10540_v12 = vld [vmem:[#allocation14_spill] sm:$0xff]  ;;  %v2693_v62 = vrot.slane %v10451_v45, 1  ;;  %v10542_v45 = vld [vmem:[#allocation60_spill] sm:$0xff] }
 0x2e6   : > { %v3014_v61 = vmax.f32 %v2973_v55, 0.0  ;;  %v3421_v55 = vunpack.c.l.b16 %v3341_v10  ;;  %v2694_v10 = vrot.slane %v10453_v54, 2 }
 0x2e8   : > { %v2231_v34 = vpop.f32.mrf.mxu2  ;;  %v3301_v49 = vmul.f32 %v3119_v15, %v3014_v61 }
 0x2e9   : > { %v2834_v50 = vpop.f32.mrf.mxu0  ;;  %v2325_v52 = vadd.f32 %v2231_v34, %v10540_v12 }
 0x2ea   : > { %v2513_v3 = vpop.f32.mrf.mxu3  ;;  %v3342_v41 = vpack.c.bf16 %v3301_v49, %v3301_v49  ;;  %v2929_v63 = vadd.f32 %v2834_v50, %v2606_v19  ;;  %v3124_v49 = vpop.permute.xlu0 %3123 }
 0x2eb   : > { %v2607_v40 = vadd.f32 %v2513_v3, %v2325_v52 }
 0x2ec   : > { %v3422_v0 = vunpack.c.l.b16 %v3342_v41  ;;  %v2974_v35 = vadd.f32 %v8613_v46, %v2929_v63  ;;  %2873 = vmatmul.bf16.gmra.mxu0 %v2692_v39  ;;  %v7111_v41 = vld [vmem:[#allocation5 + $0x28] sm:$0xff] }
 0x2ed   : > { %2273 = vmatmul.bf16.gmra.mxu2 %v8206_v9  ;;  %v7127_v63 = vld [vmem:[#allocation5 + $0xa8] sm:$0xff] }
 0x2ee   : > { %v8693_v38 = vpack.c.b16 %v3422_v0, %v3421_v55  ;;  %v3015_v25 = vmax.f32 %v2974_v35, 0.0  ;;  %3981 = vmatpush.bf16.msrb.mxu2 %v7111_v41  ;;  %4239 = vmatpush.bf16.msrb.mxu3 %v7127_v63  ;;  %v10545_v63 = vld [vmem:[#allocation17_spill] sm:$0xff] }
 0x2ef   : > { %2555 = vmatmul.bf16.gmra.mxu3 %v2386_v28  ;;  %v8710_v28 = vor.u32 %v2694_v10, %v2693_v62 }
 0x2f0   : > { %10541 = vst [vmem:[#allocation48_spill] sm:$0xff] %v8693_v38  ;;  %v2234_v58 = vpop.f32.mrf.mxu2  ;;  %v10310_v15 = vrot.slane %v8693_v38, 7  ;;  %v8699_v34 = vshrl.u32 %v8693_v38, 16  ;;  %v8702_v9 = vshll.u32 %v8693_v38, 16  ;;  %v3302_v50 = vmul.f32 %v3124_v49, %v3015_v25 }
 0x2f1   : > { %v2836_v19 = vpop.f32.mrf.mxu0  ;;  %v2326_v39 = vadd.f32 %v2234_v58, %v10542_v45 }
 0x2f2   : > { %v2516_v61 = vpop.f32.mrf.mxu3  ;;  %v2930_v0 = vadd.f32 %v2836_v19, %v2607_v40  ;;  %v3696_v35 = vsel %vm646_vm0, %v3693_v59, %v10310_v15  ;;  %v4879_v3 = vrot.slane %v8702_v9, 1  ;;  %v5679_v59 = vrot.slane %v8699_v34, 1  ;;  %v8718_v40 = vld [vmem:[%s7671_s11 + $0x78] sm:$0xff]  ;;  %v3129_v19 = vpop.permute.xlu1 %3128 }
 0x2f3   : > { %3841 = vmatmul.bf16.gmra.mxu1 %v3696_v35  ;;  %v10311_v25 = vrot.slane %v8718_v40, 1  ;;  %v5680_v58 = vrot.slane %v8702_v9, 2  ;;  %v3343_v62 = vpack.c.bf16 %v3302_v50, %v3302_v50  ;;  %v2608_v10 = vadd.f32 %v2516_v61, %v2326_v39 }
 0x2f4   : > { %v2975_v54 = vadd.f32 %v8613_v46, %v2930_v0  ;;  %v8713_v55 = vsel %vm1833_vm7, %v4878_v23, %v4879_v3  ;;  %v4881_v12 = vor.u32 %v4879_v3, %v8699_v34  ;;  %v2696_v3 = vsel %vm2641_vm12, %v8673_v18, %v8710_v28 }
 0x2f5   : > { %10543 = vst [vmem:[#allocation28_spill] sm:$0xff] %v8713_v55  ;;  %v5681_v45 = vor.u32 %v5680_v58, %v5679_v59  ;;  %v2388_v41 = vsel %vm2359_vm10, %v2385_v42, %v10311_v25  ;;  %v3423_v61 = vunpack.c.l.b16 %v3343_v62  ;;  %v7135_v59 = vld [vmem:[#allocation5 + $0xe8] sm:$0xff] }
 0x2f6   : > { %v3016_v52 = vmax.f32 %v2975_v54, 0.0  ;;  %4482 = vmatpush.bf16.msrb.mxu0 %v7135_v59 }
 0x2f7   : > { %v8732_v50 = vsel %vm2641_vm12, %v8683_v43, %v5681_v45 }
 0x2f8   : > { %v2236_v0 = vpop.f32.mrf.mxu2  ;;  %v3303_v35 = vmul.f32 %v3129_v19, %v3016_v52  ;;  %10544 = vst [vmem:[#allocation29_spill] sm:$0xff] %v8732_v50 }
 0x2f9   : > { %v2839_v49 = vpop.f32.mrf.mxu0  ;;  %v2327_v52 = vadd.f32 %v2236_v0, %v10545_v63  ;;  %v2697_v0 = vrot.slane %v10455_v5, 1  ;;  %v10549_v5 = vld [vmem:[#allocation18_spill] sm:$0xff] }
 0x2fa   : > { %v2518_v23 = vpop.f32.mrf.mxu3  ;;  %v3344_v54 = vpack.c.bf16 %v3303_v35, %v3303_v35  ;;  %v2931_v15 = vadd.f32 %v2839_v49, %v2608_v10 }
 0x2fb   : > { %v2609_v42 = vadd.f32 %v2518_v23, %v2327_v52  ;;  %v10548_v23 = vrot.slane %v8693_v38, 7 }
 0x2fc   : > { %v3424_v39 = vunpack.c.l.b16 %v3344_v54  ;;  %v2976_v19 = vadd.f32 %v8613_v46, %v2931_v15  ;;  %2878 = vmatmul.bf16.gmra.mxu0 %v2696_v3  ;;  %v10547_v15 = vld [vmem:[#allocation21_spill] sm:$0xff] }
 0x2fd   : > { %2278 = vmatmul.bf16.gmra.mxu2 %v8225_v47  ;;  %v2698_v49 = vrot.slane %v10547_v15, 2 }
 0x2fe   : > { %v8737_v18 = vpack.c.b16 %v3424_v39, %v3423_v61  ;;  %v3017_v10 = vmax.f32 %v2976_v19, 0.0  ;;  %v3134_v61 = vpop.permute.xlu2 %3133 }
 0x2ff   : > { %2560 = vmatmul.bf16.gmra.mxu3 %v2388_v41  ;;  %v8754_v59 = vor.u32 %v2698_v49, %v2697_v0 }
 0x300   : > { %10546 = vst [vmem:[#allocation49_spill] sm:$0xff] %v8737_v18  ;;  %v2239_v58 = vpop.f32.mrf.mxu2  ;;  %v3697_v43 = vrot.slane %v8737_v18, 7  ;;  %v8743_v47 = vshrl.u32 %v8737_v18, 16  ;;  %v8746_v3 = vshll.u32 %v8737_v18, 16  ;;  %v3304_v63 = vmul.f32 %v3134_v61, %v3017_v10  ;;  %v3139_v61 = vpop.permute.xlu0 %3138 }
 0x301   : > { %v2841_v62 = vpop.f32.mrf.mxu0  ;;  %v2328_v52 = vadd.f32 %v2239_v58, %v10549_v5 }
 0x302   : > { %v2521_v35 = vpop.f32.mrf.mxu3  ;;  %v2932_v54 = vadd.f32 %v2841_v62, %v2609_v42  ;;  %v3698_v41 = vsel %vm646_vm0, %v10548_v23, %v3697_v43  ;;  %v4882_v39 = vrot.slane %v8746_v3, 1  ;;  %v5683_v62 = vrot.slane %v8743_v47, 1  ;;  %v8762_v23 = vld [vmem:[%s7671_s11 + $0x80] sm:$0xff] }
 0x303   : > { %3846 = vmatmul.bf16.gmra.mxu1 %v3698_v41  ;;  %v2389_v41 = vrot.slane %v8762_v23, 1  ;;  %v5684_v10 = vrot.slane %v8746_v3, 2  ;;  %v3345_v5 = vpack.c.bf16 %v3304_v63, %v3304_v63 }
 0x304   : > { %v2977_v19 = vadd.f32 %v8613_v46, %v2932_v54  ;;  %v8757_v1 = vsel %vm1833_vm7, %v4881_v12, %v4882_v39  ;;  %v4884_v42 = vor.u32 %v4882_v39, %v8743_v47  ;;  %v2610_v54 = vadd.f32 %v2521_v35, %v2328_v52  ;;  %v10553_v35 = vld [vmem:[#allocation20_spill] sm:$0xff] }
 0x305   : > { %10550 = vst [vmem:[#allocation55_spill] sm:$0xff] %v8757_v1  ;;  %v2700_v12 = vsel %vm2641_vm12, %v8710_v28, %v8754_v59  ;;  %v5685_v39 = vor.u32 %v5684_v10, %v5683_v62  ;;  %v10551_v1 = vrot.slane %v8718_v40, 1  ;;  %v3425_v18 = vunpack.c.l.b16 %v3345_v5 }
 0x306   : > { %v3018_v15 = vmax.f32 %v2977_v19, 0.0 }
 0x307   : > { %v2390_v23 = vsel %vm2359_vm10, %v10551_v1, %v2389_v41  ;;  %v8773_v55 = vsel %vm2641_vm12, %v5681_v45, %v5685_v39 }
 0x308   : > { %v2241_v58 = vpop.f32.mrf.mxu2  ;;  %v3305_v0 = vmul.f32 %v3139_v61, %v3018_v15  ;;  %10552 = vst [vmem:[#allocation51_spill] sm:$0xff] %v8773_v55  ;;  %v10554_v61 = vld [vmem:[#allocation63_spill] sm:$0xff] }
 0x309   : > { %v2844_v25 = vpop.f32.mrf.mxu0  ;;  %v2329_v52 = vadd.f32 %v2241_v58, %v10553_v35  ;;  %v10558_v35 = vld [vmem:[#allocation61_spill] sm:$0xff] }
 0x30a   : > { %v2523_v49 = vpop.f32.mrf.mxu3  ;;  %v3346_v50 = vpack.c.bf16 %v3305_v0, %v3305_v0  ;;  %v2933_v19 = vadd.f32 %v2844_v25, %v2610_v54  ;;  %v10556_v54 = vld [vmem:[#allocation23_spill] sm:$0xff] }
 0x30b   : > { %v2611_v62 = vadd.f32 %v2523_v49, %v2329_v52  ;;  %v2701_v5 = vrot.slane %v10556_v54, 1  ;;  %v3144_v49 = vpop.permute.xlu1 %3143 }
 0x30c   : > { %v3426_v63 = vunpack.c.l.b16 %v3346_v50  ;;  %v2978_v15 = vadd.f32 %v8613_v46, %v2933_v19  ;;  %2883 = vmatmul.bf16.gmra.mxu0 %v2700_v12  ;;  %v10557_v50 = vld [vmem:[#allocation24_spill] sm:$0xff] }
 0x30d   : > { %2283 = vmatmul.bf16.gmra.mxu2 %v10554_v61  ;;  %v2702_v0 = vrot.slane %v10557_v50, 2 }
 0x30e   : > { %v8778_v28 = vpack.c.b16 %v3426_v63, %v3425_v18  ;;  %v3019_v40 = vmax.f32 %v2978_v15, 0.0 }
 0x30f   : > { %2565 = vmatmul.bf16.gmra.mxu3 %v2390_v23  ;;  %v8793_v61 = vor.u32 %v2702_v0, %v2701_v5 }
 0x310   : > { %10555 = vst [vmem:[#allocation34_spill] sm:$0xff] %v8778_v28  ;;  %v2244_v25 = vpop.f32.mrf.mxu2  ;;  %v3699_v1 = vrot.slane %v8778_v28, 7  ;;  %v8784_v58 = vshrl.u32 %v8778_v28, 16  ;;  %v8787_v12 = vshll.u32 %v8778_v28, 16  ;;  %v3306_v63 = vmul.f32 %v3144_v49, %v3019_v40  ;;  %v3149_v49 = vpop.permute.xlu2 %3148 }
 0x311   : > { %v2846_v45 = vpop.f32.mrf.mxu0  ;;  %v2330_v52 = vadd.f32 %v2244_v25, %v10558_v35 }
 0x312   : > { %v2526_v10 = vpop.f32.mrf.mxu3  ;;  %v2934_v18 = vadd.f32 %v2846_v45, %v2611_v62  ;;  %v3700_v19 = vsel %vm646_vm0, %v3697_v43, %v3699_v1  ;;  %v4885_v23 = vrot.slane %v8787_v12, 1  ;;  %v5687_v62 = vrot.slane %v8784_v58, 1  ;;  %v8801_v43 = vld [vmem:[%s7671_s11 + $0x88] sm:$0xff] }
 0x313   : > { %3851 = vmatmul.bf16.gmra.mxu1 %v3700_v19  ;;  %v10322_v19 = vrot.slane %v8801_v43, 1  ;;  %v5688_v40 = vrot.slane %v8787_v12, 2  ;;  %v3347_v35 = vpack.c.bf16 %v3306_v63, %v3306_v63 }
 0x314   : > { %v2979_v15 = vadd.f32 %v8613_v46, %v2934_v18  ;;  %v8796_v54 = vsel %vm1833_vm7, %v4884_v42, %v4885_v23  ;;  %v4887_v50 = vor.u32 %v4885_v23, %v8784_v58  ;;  %v2612_v18 = vadd.f32 %v2526_v10, %v2330_v52  ;;  %v10561_v10 = vld [vmem:[#allocation62_spill] sm:$0xff] }
 0x315   : > { %10559 = vst [vmem:[#allocation52_spill] sm:$0xff] %v8796_v54  ;;  %v2704_v42 = vsel %vm2641_vm12, %v8754_v59, %v8793_v61  ;;  %v5689_v23 = vor.u32 %v5688_v40, %v5687_v62  ;;  %v2392_v28 = vsel %vm2359_vm10, %v2389_v41, %v10322_v19  ;;  %v3427_v2 = vunpack.c.l.b16 %v3347_v35  ;;  %v7126_v62 = vld [vmem:[#allocation5 + $0xa0] sm:$0xff] }
 0x316   : > { %v3020_v45 = vmax.f32 %v2979_v15, 0.0  ;;  %4240 = vmatpush.bf16.msrb.mxu3 %v7126_v62  ;;  %v7134_v62 = vld [vmem:[#allocation5 + $0xe0] sm:$0xff] }
 0x317   : > { %v8812_v38 = vsel %vm2641_vm12, %v5685_v39, %v5689_v23  ;;  %4483 = vmatpush.bf16.msrb.mxu0 %v7134_v62  ;;  %v10567_v62 = vrot.slane %v8801_v43, 1 }
 0x318   : > { %v2246_v25 = vpop.f32.mrf.mxu2  ;;  %v3307_v5 = vmul.f32 %v3149_v49, %v3020_v45  ;;  %10560 = vst [vmem:[#allocation54_spill] sm:$0xff] %v8812_v38 }
 0x319   : > { %v2849_v55 = vpop.f32.mrf.mxu0  ;;  %v2331_v52 = vadd.f32 %v2246_v25, %v10561_v10  ;;  %v10563_v25 = vld [vmem:[#allocation26_spill] sm:$0xff] }
 0x31a   : > { %v2528_v0 = vpop.f32.mrf.mxu3  ;;  %v3348_v54 = vpack.c.bf16 %v3307_v5, %v3307_v5  ;;  %v2935_v15 = vadd.f32 %v2849_v55, %v2612_v18  ;;  %v7110_v55 = vld [vmem:[#allocation5 + $0x20] sm:$0xff]  ;;  %v2705_v35 = vrot.slane %v10563_v25, 1  ;;  %v10564_v5 = vld [vmem:[#allocation27_spill] sm:$0xff] }
 0x31b   : > { %v2613_v49 = vadd.f32 %v2528_v0, %v2331_v52  ;;  %3982 = vmatpush.bf16.msrb.mxu2 %v7110_v55  ;;  %v10565_v52 = vld [vmem:[#allocation64_spill] sm:$0xff] }
 0x31c   : > { %v3428_v63 = vunpack.c.l.b16 %v3348_v54  ;;  %v2980_v45 = vadd.f32 %v8613_v46, %v2935_v15  ;;  %2888 = vmatmul.bf16.gmra.mxu0 %v2704_v42  ;;  %v2706_v15 = vrot.slane %v10564_v5, 2  ;;  %v3154_v42 = vpop.permute.xlu0 %3153 }
 0x31d   : > { %2288 = vmatmul.bf16.gmra.mxu2 %v8278_v32 }
 0x31e   : > { %v8817_v59 = vpack.c.b16 %v3428_v63, %v3427_v2  ;;  %v3021_v41 = vmax.f32 %v2980_v45, 0.0  ;;  %v8832_v25 = vor.u32 %v2706_v15, %v2705_v35 }
 0x31f   : > { %2570 = vmatmul.bf16.gmra.mxu3 %v2392_v28 }
 0x320   : > { %10562 = vst [vmem:[#allocation56_spill] sm:$0xff] %v8817_v59  ;;  %v2249_v40 = vpop.f32.mrf.mxu2  ;;  %v3701_v39 = vrot.slane %v8817_v59, 7  ;;  %v8823_v32 = vshrl.u32 %v8817_v59, 16  ;;  %v8826_v2 = vshll.u32 %v8817_v59, 16  ;;  %v3308_v10 = vmul.f32 %v3154_v42, %v3021_v41  ;;  %v3159_v41 = vpop.permute.xlu1 %3158 }
 0x321   : > { %v2851_v54 = vpop.f32.mrf.mxu0  ;;  %v2332_v45 = vadd.f32 %v2249_v40, %v10565_v52 }
 0x322   : > { %v2531_v18 = vpop.f32.mrf.mxu3  ;;  %v2936_v28 = vadd.f32 %v2851_v54, %v2613_v49  ;;  %v3702_v0 = vsel %vm646_vm0, %v3699_v1, %v3701_v39  ;;  %v4888_v63 = vrot.slane %v8826_v2, 1  ;;  %v5691_v49 = vrot.slane %v8823_v32, 1  ;;  %v8840_v54 = vld [vmem:[%s7671_s11 + $0x90] sm:$0xff] }
 0x323   : > { %3856 = vmatmul.bf16.gmra.mxu1 %v3702_v0  ;;  %v10326_v0 = vrot.slane %v8840_v54, 1  ;;  %v5692_v40 = vrot.slane %v8826_v2, 2  ;;  %v3349_v42 = vpack.c.bf16 %v3308_v10, %v3308_v10  ;;  %v2614_v35 = vadd.f32 %v2531_v18, %v2332_v45  ;;  %v10569_v45 = vld [vmem:[#allocation65_spill] sm:$0xff] }
 0x324   : > { %v2981_v55 = vadd.f32 %v8613_v46, %v2936_v28  ;;  %v8835_v5 = vsel %vm1833_vm7, %v4887_v50, %v4888_v63  ;;  %v4890_v19 = vor.u32 %v4888_v63, %v8823_v32  ;;  %v2708_v63 = vsel %vm2641_vm12, %v8793_v61, %v8832_v25 }
 0x325   : > { %10566 = vst [vmem:[#allocation13_spill] sm:$0xff] %v8835_v5  ;;  %v5693_v38 = vor.u32 %v5692_v40, %v5691_v49  ;;  %v2394_v59 = vsel %vm2359_vm10, %v10567_v62, %v10326_v0  ;;  %v3429_v18 = vunpack.c.l.b16 %v3349_v42  ;;  %v7142_v49 = vld [vmem:[#allocation5 + $0x120] sm:$0xff] }
 0x326   : > { %v3022_v1 = vmax.f32 %v2981_v55, 0.0  ;;  %4723 = vmatpush.bf16.msrb.mxu1 %v7142_v49 }
 0x327   : > { %v8853_v16 = vsel %vm2641_vm12, %v5689_v23, %v5693_v38 }
 0x328   : > { %v2251_v28 = vpop.f32.mrf.mxu2  ;;  %v3309_v15 = vmul.f32 %v3159_v41, %v3022_v1  ;;  %10568 = vst [vmem:[#allocation12_spill] sm:$0xff] %v8853_v16 }
 0x329   : > { %v2854_v50 = vpop.f32.mrf.mxu0  ;;  %v2333_v1 = vadd.f32 %v2251_v28, %v10569_v45  ;;  %v10571_v28 = vld [vmem:[#allocation31_spill] sm:$0xff] }
 0x32a   : > { %v2533_v52 = vpop.f32.mrf.mxu3  ;;  %v3350_v55 = vpack.c.bf16 %v3309_v15, %v3309_v15  ;;  %v2937_v5 = vadd.f32 %v2854_v50, %v2614_v35  ;;  %v2709_v50 = vrot.slane %v10468_v51, 1 }
 0x32b   : > { %v2615_v43 = vadd.f32 %v2533_v52, %v2333_v1  ;;  %v3164_v52 = vpop.permute.xlu2 %3163 }
 0x32c   : > { %v3430_v10 = vunpack.c.l.b16 %v3350_v55  ;;  %v2982_v41 = vadd.f32 %v8613_v46, %v2937_v5  ;;  %2893 = vmatmul.bf16.gmra.mxu0 %v2708_v63  ;;  %v2710_v55 = vrot.slane %v10571_v28, 2 }
 0x32d   : > { %2293 = vmatmul.bf16.gmra.mxu2 %v8313_v48 }
 0x32e   : > { %v8858_v61 = vpack.c.b16 %v3430_v10, %v3429_v18  ;;  %v3023_v35 = vmax.f32 %v2982_v41, 0.0  ;;  %v10572_v10 = vld [vmem:[#allocation66_spill] sm:$0xff]  ;;  %v8873_v1 = vor.u32 %v2710_v55, %v2709_v50 }
 0x32f   : > { %2575 = vmatmul.bf16.gmra.mxu3 %v2394_v59 }
 0x330   : > { %10570 = vst [vmem:[#allocation57_spill] sm:$0xff] %v8858_v61  ;;  %v2254_v40 = vpop.f32.mrf.mxu2  ;;  %v3703_v23 = vrot.slane %v8858_v61, 7  ;;  %v8864_v5 = vshrl.u32 %v8858_v61, 16  ;;  %v8867_v48 = vshll.u32 %v8858_v61, 16  ;;  %v3310_v18 = vmul.f32 %v3164_v52, %v3023_v35  ;;  %v10577_v61 = vld [vmem:[#allocation70_spill] sm:$0xff] }
 0x331   : > { %v2856_v42 = vpop.f32.mrf.mxu0  ;;  %v2334_v45 = vadd.f32 %v2254_v40, %v10572_v10 }
 0x332   : > { %v2536_v15 = vpop.f32.mrf.mxu3  ;;  %v2938_v59 = vadd.f32 %v2856_v42, %v2615_v43  ;;  %v3704_v63 = vsel %vm646_vm0, %v3701_v39, %v3703_v23  ;;  %v4891_v62 = vrot.slane %v8867_v48, 1  ;;  %v5695_v43 = vrot.slane %v8864_v5, 1 }
 0x333   : > { %3861 = vmatmul.bf16.gmra.mxu1 %v3704_v63  ;;  %v10331_v39 = vrot.slane %v8309_v36, 1  ;;  %v5696_v28 = vrot.slane %v8867_v48, 2  ;;  %v3169_v63 = vpop.permute.xlu0 %3168  ;;  %v3351_v52 = vpack.c.bf16 %v3310_v18, %v3310_v18  ;;  %v2616_v40 = vadd.f32 %v2536_v15, %v2334_v45  ;;  %v10576_v45 = vld [vmem:[#allocation30_spill] sm:$0xff] }
 0x334   : > { %v2983_v51 = vadd.f32 %v8613_v46, %v2938_v59  ;;  %v8876_v41 = vsel %vm1833_vm7, %v4890_v19, %v4891_v62  ;;  %v4893_v49 = vor.u32 %v4891_v62, %v8864_v5  ;;  %v2712_v19 = vsel %vm2641_vm12, %v8832_v25, %v8873_v1  ;;  %v8896_v25 = vpop.f32.mrf.mxu1 }
 0x335   : > { %10573 = vst [vmem:[#allocation58_spill] sm:$0xff] %v8876_v41  ;;  %v5697_v55 = vor.u32 %v5696_v28, %v5695_v43  ;;  %v3431_v15 = vunpack.c.l.b16 %v3351_v52 }
 0x336   : > { %v3024_v42 = vmax.f32 %v2983_v51, 0.0  ;;  %v10574_v51 = vrot.slane %v8840_v54, 1  ;;  %10578 = vst [vmem:[#allocation59_spill] sm:$0xff] %v8896_v25  ;;  %v10586_v25 = vrot.slane %v8358_v29, 1 }
 0x337   : > { %v8891_v41 = vsel %vm2641_vm12, %v5693_v38, %v5697_v55 }
 0x338   : > { %v2256_v35 = vpop.f32.mrf.mxu2  ;;  %v3311_v10 = vmul.f32 %v3169_v63, %v3024_v42  ;;  %v2396_v16 = vsel %vm2359_vm10, %v10574_v51, %v10331_v39  ;;  %10575 = vst [vmem:[#allocation15_spill] sm:$0xff] %v8891_v41  ;;  %v10585_v41 = vld [vmem:[#allocation69_spill] sm:$0xff] }
 0x339   : > { %v2859_v50 = vpop.f32.mrf.mxu0  ;;  %v2335_v42 = vadd.f32 %v2256_v35, %v10576_v45 }
 0x33a   : > { %v2538_v59 = vpop.f32.mrf.mxu3  ;;  %v3352_v62 = vpack.c.bf16 %v3311_v10, %v3311_v10  ;;  %v2939_v0 = vadd.f32 %v2859_v50, %v2616_v40  ;;  %v10580_v50 = vld [vmem:[#allocation67_spill] sm:$0xff] }
 0x33b   : > { %v2617_v28 = vadd.f32 %v2538_v59, %v2335_v42 }
 0x33c   : > { %v3432_v18 = vunpack.c.l.b16 %v3352_v62  ;;  %v2984_v63 = vadd.f32 %v8613_v46, %v2939_v0  ;;  %2898 = vmatmul.bf16.gmra.mxu0 %v2712_v19  ;;  %v2713_v0 = vrot.slane %v8320_v4, 1  ;;  %v3174_v62 = vpop.permute.xlu1 %3173  ;;  %v7109_v4 = vld [vmem:[#allocation5 + $0x18] sm:$0xff] }
 0x33d   : > { %2298 = vmatmul.bf16.gmra.mxu2 %v10577_v61  ;;  %v2714_v61 = vrot.slane %v10580_v50, 2 }
 0x33e   : > { %v8898_v43 = vpack.c.b16 %v3432_v18, %v3431_v15  ;;  %v3025_v40 = vmax.f32 %v2984_v63, 0.0  ;;  %v10581_v18 = vld [vmem:[#allocation32_spill] sm:$0xff]  ;;  %3983 = vmatpush.bf16.msrb.mxu2 %v7109_v4 }
 0x33f   : > { %2580 = vmatmul.bf16.gmra.mxu3 %v2396_v16  ;;  %v8916_v50 = vor.u32 %v2714_v61, %v2713_v0 }
 0x340   : > { %10579 = vst [vmem:[#allocation14_spill] sm:$0xff] %v8898_v43  ;;  %v2259_v54 = vpop.f32.mrf.mxu2  ;;  %v10330_v38 = vrot.slane %v8898_v43, 7  ;;  %v8902_v52 = vshrl.u32 %v8898_v43, 16  ;;  %v8907_v19 = vshll.u32 %v8898_v43, 16  ;;  %v3312_v15 = vmul.f32 %v3174_v62, %v3025_v40 }
 0x341   : > { %v2861_v35 = vpop.f32.mrf.mxu0  ;;  %v2336_v45 = vadd.f32 %v2259_v54, %v10581_v18  ;;  %v8924_v54 = vpop.f32.mrf.mxu1 }
 0x342   : > { %v2541_v10 = vpop.f32.mrf.mxu3  ;;  %v2940_v16 = vadd.f32 %v2861_v35, %v2617_v28  ;;  %v3706_v59 = vsel %vm646_vm0, %v3703_v23, %v10330_v38  ;;  %v4894_v51 = vrot.slane %v8907_v19, 1  ;;  %v5699_v63 = vrot.slane %v8902_v52, 1  ;;  %v3179_v23 = vpop.permute.xlu2 %3178  ;;  %10583 = vst [vmem:[#allocation17_spill] sm:$0xff] %v8924_v54 }
 0x343   : > { %3866 = vmatmul.bf16.gmra.mxu1 %v3706_v59  ;;  %v5700_v40 = vrot.slane %v8907_v19, 2  ;;  %v3353_v62 = vpack.c.bf16 %v3312_v15, %v3312_v15  ;;  %v2618_v18 = vadd.f32 %v2541_v10, %v2336_v45  ;;  %v10587_v54 = vrot.slane %v8309_v36, 1 }
 0x344   : > { %v2985_v42 = vadd.f32 %v8613_v46, %v2940_v16  ;;  %v8919_v28 = vsel %vm1833_vm7, %v4893_v49, %v4894_v51  ;;  %v4896_v35 = vor.u32 %v4894_v51, %v8902_v52  ;;  %v2716_v51 = vsel %vm2641_vm12, %v8873_v1, %v8916_v50 }
 0x345   : > { %10582 = vst [vmem:[#allocation60_spill] sm:$0xff] %v8919_v28  ;;  %v8926_v61 = vor.u32 %v5700_v40, %v5699_v63  ;;  %v2398_v10 = vsel %vm2359_vm10, %v10587_v54, %v10586_v25  ;;  %v3433_v15 = vunpack.c.l.b16 %v3353_v62  ;;  %v7108_v62 = vld [vmem:[#allocation5 + $0x10] sm:$0xff] }
 0x346   : > { %v3026_v38 = vmax.f32 %v2985_v42, 0.0  ;;  %v10584_v42 = vld [vmem:[#allocation68_spill] sm:$0xff]  ;;  %3984 = vmatpush.bf16.msrb.mxu2 %v7108_v62 }
 0x347   : > { %v2118_v59 = vadd.f32 %v10585_v41, %v10584_v42  ;;  %v7125_v41 = vld [vmem:[#allocation5 + $0x98] sm:$0xff] }
 0x348   : > { %v2261_v16 = vpop.f32.mrf.mxu2  ;;  %v3313_v39 = vmul.f32 %v3179_v23, %v3026_v38  ;;  %v8940_v38 = vsel %vm2641_vm12, %v5697_v55, %v8926_v61  ;;  %4241 = vmatpush.bf16.msrb.mxu3 %v7125_v41  ;;  %v7107_v41 = vld [vmem:[#allocation5 + $0x8] sm:$0xff] }
 0x349   : > { %v2864_v49 = vpop.f32.mrf.mxu0  ;;  %10588 = vst [vmem:[#allocation21_spill] sm:$0xff] %v8940_v38  ;;  %v2337_v63 = vadd.f32 %v2261_v16, %v2118_v59  ;;  %v7124_v59 = vld [vmem:[#allocation5 + $0x90] sm:$0xff]  ;;  %v2717_v16 = vrot.slane %v8374_v44, 1  ;;  %v10592_v44 = vld [vmem:[#allocation71_spill] sm:$0xff] }
 0x34a   : > { %v2543_v0 = vpop.f32.mrf.mxu3  ;;  %v3354_v4 = vpack.c.bf16 %v3313_v39, %v3313_v39  ;;  %v2941_v28 = vadd.f32 %v2864_v49, %v2618_v18  ;;  %v2718_v18 = vrot.slane %v8385_v53, 2  ;;  %v7123_v38 = vld [vmem:[#allocation5 + $0x88] sm:$0xff]  ;;  %3985 = vmatpush.bf16.msrb.mxu2 %v7107_v41 }
 0x34b   : > { %v2619_v25 = vadd.f32 %v2543_v0, %v2337_v63  ;;  %v10591_v0 = vrot.slane %v8898_v43, 7  ;;  %v7133_v63 = vld [vmem:[#allocation5 + $0xd8] sm:$0xff] }
 0x34c   : > { %v3434_v45 = vunpack.c.l.b16 %v3354_v4  ;;  %v2986_v1 = vadd.f32 %v8613_v46, %v2941_v28  ;;  %2903 = vmatmul.bf16.gmra.mxu0 %v2716_v51  ;;  %v3184_v4 = vpop.permute.xlu0 %3183  ;;  %4242 = vmatpush.bf16.msrb.mxu3 %v7124_v59  ;;  %v10596_v43 = vld [vmem:[#allocation33_spill] sm:$0xff] }
 0x34d   : > { %2303 = vmatmul.bf16.gmra.mxu2 %v8408_v33  ;;  %4484 = vmatpush.bf16.msrb.mxu0 %v7133_v63 }
 0x34e   : > { %v8944_v39 = vpack.c.b16 %v3434_v45, %v3433_v15  ;;  %v3027_v40 = vmax.f32 %v2986_v1, 0.0  ;;  %v7141_v1 = vld [vmem:[#allocation5 + $0x118] sm:$0xff] }
 0x34f   : > { %2585 = vmatmul.bf16.gmra.mxu3 %v2398_v10  ;;  %v8946_v23 = vpop.f32.mrf.mxu1  ;;  %4724 = vmatpush.bf16.msrb.mxu1 %v7141_v1 }
 0x350   : > { %10589 = vst [vmem:[#allocation18_spill] sm:$0xff] %v8944_v39  ;;  %v2264_v36 = vpop.f32.mrf.mxu2  ;;  %v10333_v54 = vrot.slane %v8944_v39, 7  ;;  %v8950_v28 = vshrl.u32 %v8944_v39, 16  ;;  %v8955_v49 = vshll.u32 %v8944_v39, 16  ;;  %v3314_v15 = vmul.f32 %v3184_v4, %v3027_v40  ;;  %4243 = vmatpush.bf16.msrb.mxu3 %v7123_v38 }
 0x351   : > { %10590 = vst [vmem:[#allocation20_spill] sm:$0xff] %v8946_v23  ;;  %v2866_v33 = vpop.f32.mrf.mxu0  ;;  %v2338_v45 = vadd.f32 %v2264_v36, %v10592_v44 }
 0x352   : > { %v2546_v55 = vpop.f32.mrf.mxu3  ;;  %v2942_v51 = vadd.f32 %v2866_v33, %v2619_v25  ;;  %v3708_v42 = vsel %vm646_vm0, %v10591_v0, %v10333_v54  ;;  %v4897_v10 = vrot.slane %v8955_v49, 1  ;;  %v5703_v25 = vrot.slane %v8950_v28, 1  ;;  %v3189_v0 = vpop.permute.xlu1 %3188  ;;  %v7106_v54 = vld [vmem:[#allocation5] sm:$0xff] }
 0x353   : > { %3871 = vmatmul.bf16.gmra.mxu1 %v3708_v42  ;;  %v8966_v33 = vor.u32 %v2718_v18, %v2717_v16  ;;  %v5704_v36 = vrot.slane %v8955_v49, 2  ;;  %v3355_v4 = vpack.c.bf16 %v3314_v15, %v3314_v15  ;;  %v2620_v16 = vadd.f32 %v2546_v55, %v2338_v45  ;;  %3986 = vmatpush.bf16.msrb.mxu2 %v7106_v54 }
 0x354   : > { %v2987_v53 = vadd.f32 %v8613_v46, %v2942_v51  ;;  %v8969_v62 = vsel %vm1833_vm7, %v4896_v35, %v4897_v10  ;;  %v4899_v59 = vor.u32 %v4897_v10, %v8950_v28  ;;  %v7122_v35 = vld [vmem:[#allocation5 + $0x80] sm:$0xff]  ;;  %v10595_v10 = vld [vmem:[#allocation35_spill] sm:$0xff] }
 0x355   : > { %10593 = vst [vmem:[#allocation63_spill] sm:$0xff] %v8969_v62  ;;  %v8975_v62 = vor.u32 %v5704_v36, %v5703_v25  ;;  %v2720_v1 = vsel %vm2641_vm12, %v8916_v50, %v8966_v33  ;;  %4244 = vmatpush.bf16.msrb.mxu3 %v7122_v35  ;;  %v3435_v55 = vunpack.c.l.b16 %v3355_v4  ;;  %v10598_v50 = vrot.slane %v8358_v29, 1  ;;  %v7132_v36 = vld [vmem:[#allocation5 + $0xd0] sm:$0xff] }
 0x356   : > { %v3028_v42 = vmax.f32 %v2987_v53, 0.0  ;;  %v2120_v53 = vadd.f32 %v10596_v43, %v10595_v10  ;;  %4485 = vmatpush.bf16.msrb.mxu0 %v7132_v36  ;;  %v9011_v10 = vld [vmem:[%s10243_s3] ss:$0 sm:$0xff] }
 0x357   : > { %v8973_v51 = vpop.f32.mrf.mxu1  ;;  %v8985_v38 = vsel %vm2641_vm12, %v8926_v61, %v8975_v62 }
 0x358   : > { %v2266_v40 = vpop.f32.mrf.mxu2  ;;  %10594 = vst [vmem:[#allocation23_spill] sm:$0xff] %v8973_v51  ;;  %v3315_v18 = vmul.f32 %v3189_v0, %v3028_v42 }
 0x359   : > { %v2869_v63 = vpop.f32.mrf.mxu0  ;;  %10597 = vst [vmem:[#allocation24_spill] sm:$0xff] %v8985_v38  ;;  %v2339_v45 = vadd.f32 %v2266_v40, %v2120_v53 }
 0x35a   : > { %v2548_v44 = vpop.f32.mrf.mxu3  ;;  %v3356_v23 = vpack.c.bf16 %v3315_v18, %v3315_v18  ;;  %v2943_v51 = vadd.f32 %v2869_v63, %v2620_v16  ;;  %v3194_v16 = vpop.permute.xlu2 %3193  ;;  %v7131_v63 = vld [vmem:[#allocation5 + $0xc8] sm:$0xff] }
 0x35b   : > { %v2621_v0 = vadd.f32 %v2548_v44, %v2339_v45  ;;  %4486 = vmatpush.bf16.msrb.mxu0 %v7131_v63 }
 0x35c   : > { %v3436_v15 = vunpack.c.l.b16 %v3356_v23  ;;  %v2988_v43 = vadd.f32 %v8613_v46, %v2943_v51  ;;  %2908 = vmatmul.bf16.gmra.mxu0 %v2720_v1  ;;  %v10600_v51 = vrot.slane %v8944_v39, 7 }
 0x35d   : > { %2308 = vmatmul.bf16.gmra.mxu2 %v8449_v26 }
 0x35e   : > { %v8992_v41 = vpack.c.b16 %v3436_v15, %v3435_v55  ;;  %v3029_v61 = vmax.f32 %v2988_v43, 0.0  ;;  %v10602_v43 = vmov 0 }
 0x35f   : > { %6688 = vmatmul.msk.bf16.gmra.mxu3 %vm2418_vm13, %v10598_v50  ;;  %v10603_v43 = vsel %vm9020_vm15, 4294967295, %v10602_v43  ;;  %v3199_v50 = vpop.permute.xlu0 %3198 }
 0x360   : > { %10599 = vst [vmem:[#allocation61_spill] sm:$0xff] %v8992_v41  ;;  %v2269_v25 = vpop.f32.mrf.mxu2  ;;  %v8994_v54 = vpop.f32.mrf.mxu1  ;;  %v3709_v23 = vrot.slane %v8992_v41, 7  ;;  %v8998_v46 = vshrl.u32 %v8992_v41, 16  ;;  %v9001_v40 = vshll.u32 %v8992_v41, 16  ;;  %v3316_v44 = vmul.f32 %v3194_v16, %v3029_v61 }
 0x361   : > { %v2871_v26 = vpop.f32.mrf.mxu0  ;;  %v2340_v35 = vadd.f32 %v2269_v25, %v8410_v8  ;;  %10604 = vst [vmem:[#allocation26_spill] sm:$0xff] %v10603_v43  ;;  %v2744_v16 = vsel %vm9020_vm15, %v8966_v33, 0 }
 0x362   : > { %v2551_v42 = vpop.f32.mrf.mxu3  ;;  %v2944_v29 = vadd.f32 %v2871_v26, %v2621_v0  ;;  %v3710_v4 = vsel %vm646_vm0, %v10600_v51, %v3709_v23  ;;  %v4900_v18 = vrot.slane %v9001_v40, 1  ;;  %v5707_v1 = vrot.slane %v8998_v46, 1 }
 0x363   : > { %3876 = vmatmul.bf16.gmra.mxu1 %v3710_v4  ;;  %v5708_v8 = vrot.slane %v9001_v40, 2  ;;  %v3357_v0 = vpack.c.bf16 %v3316_v44, %v3316_v44  ;;  %v2622_v61 = vadd.f32 %v2551_v42, %v2340_v35 }
 0x364   : > { %v2989_v53 = vadd.f32 %v9011_v10, %v2944_v29  ;;  %v9016_v55 = vsel %vm1833_vm7, %v4899_v59, %v4900_v18  ;;  %v4902_v15 = vor.u32 %v4900_v18, %v8998_v46  ;;  %v7130_v59 = vld [vmem:[#allocation5 + $0xc0] sm:$0xff]  ;;  %v2122_v18 = vadd.f32 %v8426_v57, %v8424_v11 }
 0x365   : > { %10601 = vst [vmem:[#allocation62_spill] sm:$0xff] %v9016_v55  ;;  %v5709_v51 = vor.u32 %v5708_v8, %v5707_v1  ;;  %4487 = vmatpush.bf16.msrb.mxu0 %v7130_v59  ;;  %v3437_v44 = vunpack.c.l.b16 %v3357_v0 }
 0x366   : > { %v3030_v45 = vmax.f32 %v2989_v53, 0.0 }
 0x367   : > { %v9034_v42 = vsel %vm2641_vm12, %v8975_v62, %v5709_v51 }
 0x368   : > { %v2271_v25 = vpop.f32.mrf.mxu2  ;;  %v3317_v36 = vmul.f32 %v3199_v50, %v3030_v45  ;;  %v9025_v29 = vpop.f32.mrf.mxu1  ;;  %10605 = vst [vmem:[#allocation27_spill] sm:$0xff] %v9034_v42 }
 0x369   : > { %v2874_v4 = vpop.f32.mrf.mxu0  ;;  %v2341_v45 = vadd.f32 %v2271_v25, %v2122_v18 }
 0x36a   : > { %v2553_v26 = vpop.f32.mrf.mxu3  ;;  %v3358_v53 = vpack.c.bf16 %v3317_v36, %v3317_v36  ;;  %v2945_v63 = vadd.f32 %v2874_v4, %v2622_v61 }
 0x36b   : > { %v2623_v57 = vadd.f32 %v2553_v26, %v2341_v45 }
 0x36c   : > { %v3438_v35 = vunpack.c.l.b16 %v3358_v53  ;;  %v2990_v1 = vadd.f32 %v9011_v10, %v2945_v63  ;;  %2913 = vmatmul.bf16.gmra.mxu0 %v2744_v16  ;;  %v3204_v16 = vpop.permute.xlu1 %3203 }
 0x36d   : > { %2313 = vmatmul.bf16.gmra.mxu2 %v10518_v21 }
 0x36e   : > { %v9039_v33 = vpack.c.b16 %v3438_v35, %v3437_v44  ;;  %v3031_v8 = vmax.f32 %v2990_v1, 0.0 }
 0x36f   : > { %2595 = vmatmul.bf16.gmra.mxu3 %v10518_v21 }
 0x370   : > { %10606 = vst [vmem:[#allocation64_spill] sm:$0xff] %v9039_v33  ;;  %v2274_v11 = vpop.f32.mrf.mxu2  ;;  %v9041_v61 = vpop.f32.mrf.mxu1  ;;  %v3711_v62 = vrot.slane %v9039_v33, 7  ;;  %v9045_v0 = vshrl.u32 %v9039_v33, 16  ;;  %v9048_v36 = vshll.u32 %v9039_v33, 16  ;;  %v3318_v18 = vmul.f32 %v3204_v16, %v3031_v8 }
 0x371   : > { %v2876_v25 = vpop.f32.mrf.mxu0  ;;  %v2342_v53 = vadd.f32 %v2274_v11, %v8451_v60 }
 0x372   : > { %v2556_v50 = vpop.f32.mrf.mxu3  ;;  %v2946_v59 = vadd.f32 %v2876_v25, %v2623_v57  ;;  %v3712_v4 = vsel %vm646_vm0, %v3709_v23, %v3711_v62  ;;  %v4903_v26 = vrot.slane %v9048_v36, 1  ;;  %v5711_v44 = vrot.slane %v9045_v0, 1  ;;  %v3209_v23 = vpop.permute.xlu2 %3208 }
 0x373   : > { %3881 = vmatmul.bf16.gmra.mxu1 %v3712_v4  ;;  %v5712_v57 = vrot.slane %v9048_v36, 2  ;;  %v3359_v4 = vpack.c.bf16 %v3318_v18, %v3318_v18  ;;  %v2624_v43 = vadd.f32 %v2556_v50, %v2342_v53  ;;  %v7140_v53 = vld [vmem:[#allocation5 + $0x110] sm:$0xff] }
 0x374   : > { %v2991_v63 = vadd.f32 %v9011_v10, %v2946_v59  ;;  %v9056_v35 = vsel %vm1833_vm7, %v4902_v15, %v4903_v26  ;;  %v4905_v45 = vor.u32 %v4903_v26, %v9045_v0  ;;  %v10608_v59 = vld [vmem:[#allocation73_spill] sm:$0xff]  ;;  %4725 = vmatpush.bf16.msrb.mxu1 %v7140_v53 }
 0x375   : > { %10607 = vst [vmem:[#allocation65_spill] sm:$0xff] %v9056_v35  ;;  %v5713_v60 = vor.u32 %v5712_v57, %v5711_v44  ;;  %v2124_v38 = vadd.f32 %v10608_v59, %v8470_v13 }
 0x376   : > { %v3032_v1 = vmax.f32 %v2991_v63, 0.0  ;;  %v3439_v63 = vunpack.c.l.b16 %v3359_v4  ;;  %v3482_v4 = vrot.slane %v8639_v31, 7 }
 0x377   : > { %v9065_v26 = vsel %vm2641_vm12, %v5709_v51, %v5713_v60 }
 0x378   : > { %v2276_v25 = vpop.f32.mrf.mxu2  ;;  %v3319_v42 = vmul.f32 %v3209_v23, %v3032_v1  ;;  %v9060_v16 = vpop.f32.mrf.mxu1  ;;  %10609 = vst [vmem:[#allocation31_spill] sm:$0xff] %v9065_v26 }
 0x379   : > { %v2879_v11 = vpop.f32.mrf.mxu0  ;;  %v2343_v33 = vadd.f32 %v2276_v25, %v2124_v38  ;;  %v3214_v25 = vpop.permute.xlu0 %3213 }
 0x37a   : > { %v2558_v8 = vpop.f32.mrf.mxu3  ;;  %v3360_v15 = vpack.c.bf16 %v3319_v42, %v3319_v42  ;;  %v2947_v35 = vadd.f32 %v2879_v11, %v2624_v43 }
 0x37b   : > { %v2625_v42 = vadd.f32 %v2558_v8, %v2343_v33  ;;  %v3479_v33 = vrot.slane %v8644_v17, 6 }
 0x37c   : > { %v3440_v55 = vunpack.c.l.b16 %v3360_v15  ;;  %v2992_v18 = vadd.f32 %v9011_v10, %v2947_v35  ;;  %2918 = vmatmul.bf16.gmra.mxu0 %v10518_v21 }
 0x37d   : > { %3987 = vmatmul.bf16.vlgmr.msrb.gmra.mxu2 %v10518_v21  ;;  %v9095_v8 = vor.u32 %v3482_v4, %v3479_v33 }
 0x37e   : > { %v9071_v50 = vpack.c.b16 %v3440_v55, %v3439_v63  ;;  %v3033_v43 = vmax.f32 %v2992_v18, 0.0 }
 0x37f   : > { %4245 = vmatmul.bf16.vlgmr.msrb.gmra.mxu3 %v10518_v21 }
 0x380   : > { %10610 = vst [vmem:[#allocation66_spill] sm:$0xff] %v9071_v50  ;;  %v2279_v13 = vpop.f32.mrf.mxu2  ;;  %v9073_v51 = vpop.f32.mrf.mxu1  ;;  %v3713_v1 = vrot.slane %v9071_v50, 7  ;;  %v9077_v38 = vshrl.u32 %v9071_v50, 16  ;;  %v9080_v57 = vshll.u32 %v9071_v50, 16  ;;  %v3320_v59 = vmul.f32 %v3214_v25, %v3033_v43 }
 0x381   : > { %v2881_v35 = vpop.f32.mrf.mxu0  ;;  %v2344_v15 = vadd.f32 %v2279_v13, %v8484_v56  ;;  %v10612_v43 = vrot.slane %v8644_v17, 7 }
 0x382   : > { %v2561_v44 = vpop.f32.mrf.mxu3  ;;  %v2948_v23 = vadd.f32 %v2881_v35, %v2625_v42  ;;  %v3714_v55 = vsel %vm646_vm0, %v3711_v62, %v3713_v1  ;;  %v4906_v11 = vrot.slane %v9080_v57, 1  ;;  %v5715_v18 = vrot.slane %v9077_v38, 1 }
 0x383   : > { %3886 = vmatmul.bf16.gmra.mxu1 %v3714_v55  ;;  %v5716_v35 = vrot.slane %v9080_v57, 2  ;;  %v3219_v55 = vpop.permute.xlu1 %3218  ;;  %v4093_v56 = vor.u32 %v10612_v43, %v8639_v31  ;;  %v3361_v13 = vpack.c.bf16 %v3320_v59, %v3320_v59  ;;  %v3675_v31 = vsel %vm7725_vm3, 0, %v9095_v8 }
 0x384   : > { %v2993_v63 = vadd.f32 %v9011_v10, %v2948_v23  ;;  %v9091_v53 = vsel %vm1833_vm7, %v4905_v45, %v4906_v11  ;;  %v4908_v62 = vor.u32 %v4906_v11, %v9077_v38  ;;  %v2626_v23 = vadd.f32 %v2561_v44, %v2344_v15  ;;  %v10614_v11 = vld [vmem:[#allocation41_spill] sm:$0xff] }
 0x385   : > { %10611 = vst [vmem:[#allocation30_spill] sm:$0xff] %v9091_v53  ;;  %v5717_v45 = vor.u32 %v5716_v35, %v5715_v18  ;;  %v4171_v44 = vsel %vm7960_vm6, 0, %v4093_v56  ;;  %v3441_v15 = vunpack.c.l.b16 %v3361_v13 }
 0x386   : > { %v3034_v42 = vmax.f32 %v2993_v63, 0.0  ;;  %v2126_v63 = vadd.f32 %v10614_v11, %v8496_v27  ;;  %v3224_v11 = vpop.permute.xlu2 %3223 }
 0x387   : > { %v9105_v33 = vsel %vm2641_vm12, %v5713_v60, %v5717_v45 }
 0x388   : > { %v2281_v21 = vpop.f32.mrf.mxu2  ;;  %v3321_v25 = vmul.f32 %v3219_v55, %v3034_v42  ;;  %v9100_v50 = vpop.f32.mrf.mxu1  ;;  %10615 = vst [vmem:[#allocation67_spill] sm:$0xff] %v9105_v33 }
 0x389   : > { %10613 = vst [vmem:[#allocation70_spill] sm:$0xff] %v9100_v50  ;;  %v2884_v53 = vpop.f32.mrf.mxu0  ;;  %v2345_v55 = vadd.f32 %v2281_v21, %v2126_v63  ;;  %v3490_v63 = vrot.slane %v8665_v37, 7 }
 0x38a   : > { %v2563_v26 = vpop.f32.mrf.mxu3  ;;  %v3362_v41 = vpack.c.bf16 %v3321_v25, %v3321_v25  ;;  %v2949_v39 = vadd.f32 %v2884_v53, %v2626_v23 }
 0x38b   : > { %v2627_v60 = vadd.f32 %v2563_v26, %v2345_v55  ;;  %v3487_v26 = vrot.slane %v8660_v22, 6 }
 0x38c   : > { %v3442_v42 = vunpack.c.l.b16 %v3362_v41  ;;  %v2994_v18 = vadd.f32 %v9011_v10, %v2949_v39  ;;  %4488 = vmatmul.bf16.vlgmr.msrb.gmra.mxu0 %v4171_v44 }
 0x38d   : > { %3992 = vmatmul.bf16.gmra.mxu2 %v3675_v31  ;;  %v9137_v4 = vor.u32 %v3490_v63, %v3487_v26 }
 0x38e   : > { %v9113_v27 = vpack.c.b16 %v3442_v42, %v3441_v15  ;;  %v3035_v35 = vmax.f32 %v2994_v18, 0.0 }
 0x38f   : > { %4250 = vmatmul.bf16.gmra.mxu3 %v4171_v44  ;;  %v10622_v44 = vld [vmem:[#allocation37_spill] sm:$0xff] }
 0x390   : > { %10618 = vst [vmem:[#allocation32_spill] sm:$0xff] %v9113_v27  ;;  %v2284_v53 = vpop.f32.mrf.mxu2  ;;  %v9115_v23 = vpop.f32.mrf.mxu1  ;;  %v3715_v25 = vrot.slane %v9113_v27, 7  ;;  %v9119_v56 = vshrl.u32 %v9113_v27, 16  ;;  %v9122_v21 = vshll.u32 %v9113_v27, 16  ;;  %v3322_v59 = vmul.f32 %v3224_v11, %v3035_v35 }
 0x391   : > { %10619 = vst [vmem:[#allocation68_spill] sm:$0xff] %v9115_v23  ;;  %v2886_v41 = vpop.f32.mrf.mxu0  ;;  %v2346_v15 = vadd.f32 %v2284_v53, %v10622_v44  ;;  %v10624_v35 = vrot.slane %v8660_v22, 7 }
 0x392   : > { %v2566_v43 = vpop.f32.mrf.mxu3  ;;  %10620 = vst [vmem:[#allocation69_spill] sm:$0xff] %v9119_v56  ;;  %v2950_v39 = vadd.f32 %v2886_v41, %v2627_v60  ;;  %v3716_v13 = vsel %vm646_vm0, %v3713_v1, %v3715_v25  ;;  %v4909_v31 = vrot.slane %v9122_v21, 1  ;;  %v5719_v55 = vrot.slane %v9119_v56, 1 }
 0x393   : > { %10621 = vst [vmem:[#allocation71_spill] sm:$0xff] %v9122_v21  ;;  %3891 = vmatmul.bf16.gmra.mxu1 %v3716_v13  ;;  %v5720_v41 = vrot.slane %v9122_v21, 2  ;;  %v3229_v13 = vpop.permute.xlu0 %3228  ;;  %v4095_v53 = vor.u32 %v10624_v35, %v8665_v37  ;;  %v3363_v11 = vpack.c.bf16 %v3322_v59, %v3322_v59  ;;  %v3492_v37 = vsel %vm427_vm1, %v9095_v8, %v9137_v4 }
 0x394   : > { %v2995_v42 = vadd.f32 %v9011_v10, %v2950_v39  ;;  %v9133_v18 = vsel %vm1833_vm7, %v4908_v62, %v4909_v31  ;;  %v4911_v1 = vor.u32 %v4909_v31, %v9119_v56  ;;  %v2628_v39 = vadd.f32 %v2566_v43, %v2346_v15  ;;  %v10626_v31 = vld [vmem:[#allocation16_spill] sm:$0xff] }
 0x395   : > { %10623 = vst [vmem:[#allocation35_spill] sm:$0xff] %v9133_v18  ;;  %v5721_v62 = vor.u32 %v5720_v41, %v5719_v55  ;;  %v10629_v43 = vrot.slane %v8644_v17, 7  ;;  %v3443_v59 = vunpack.c.l.b16 %v3363_v11  ;;  %v3499_v11 = vrot.slane %v8702_v9, 7 }
 0x396   : > { %v3036_v60 = vmax.f32 %v2995_v42, 0.0  ;;  %v10627_v42 = vld [vmem:[#allocation38_spill] sm:$0xff] }
 0x397   : > { %v2128_v50 = vadd.f32 %v10627_v42, %v10626_v31  ;;  %v9147_v26 = vsel %vm2641_vm12, %v5717_v45, %v5721_v62  ;;  %v4096_v63 = vsel %vm1049_vm5, %v10629_v43, %v4095_v53  ;;  %v3234_v53 = vpop.permute.xlu1 %3233 }
 0x398   : > { %v2286_v33 = vpop.f32.mrf.mxu2  ;;  %v3323_v44 = vmul.f32 %v3229_v13, %v3036_v60  ;;  %v9142_v23 = vpop.f32.mrf.mxu1  ;;  %10628 = vst [vmem:[#allocation73_spill] sm:$0xff] %v9147_v26 }
 0x399   : > { %10625 = vst [vmem:[#allocation33_spill] sm:$0xff] %v9142_v23  ;;  %v2889_v18 = vpop.f32.mrf.mxu0  ;;  %v2347_v55 = vadd.f32 %v2286_v33, %v2128_v50 }
 0x39a   : > { %v2568_v27 = vpop.f32.mrf.mxu3  ;;  %v3364_v21 = vpack.c.bf16 %v3323_v44, %v3323_v44  ;;  %v2951_v56 = vadd.f32 %v2889_v18, %v2628_v39 }
 0x39b   : > { %v2629_v41 = vadd.f32 %v2568_v27, %v2347_v55  ;;  %v3496_v27 = vrot.slane %v8699_v34, 6 }
 0x39c   : > { %v3444_v15 = vunpack.c.l.b16 %v3364_v21  ;;  %v2996_v60 = vadd.f32 %v9011_v10, %v2951_v56  ;;  %4493 = vmatmul.bf16.gmra.mxu0 %v4096_v63 }
 0x39d   : > { %3997 = vmatmul.bf16.gmra.mxu2 %v3492_v37  ;;  %v10632_v37 = vld [vmem:[#allocation44_spill] sm:$0xff]  ;;  %v9180_v44 = vor.u32 %v3499_v11, %v3496_v27 }
 0x39e   : > { %v9156_v18 = vpack.c.b16 %v3444_v15, %v3443_v59  ;;  %v3037_v13 = vmax.f32 %v2996_v60, 0.0  ;;  %v7139_v59 = vld [vmem:[#allocation5 + $0x108] sm:$0xff] }
 0x39f   : > { %4255 = vmatmul.bf16.gmra.mxu3 %v4096_v63  ;;  %4726 = vmatpush.bf16.msrb.mxu1 %v7139_v59  ;;  %v10637_v59 = vld [vmem:[#allocation19_spill] sm:$0xff] }
 0x3a0   : > { %10630 = vst [vmem:[#allocation41_spill] sm:$0xff] %v9156_v18  ;;  %v2289_v45 = vpop.f32.mrf.mxu2  ;;  %v9158_v39 = vpop.f32.mrf.mxu1  ;;  %v3717_v17 = vrot.slane %v9156_v18, 7  ;;  %v9162_v8 = vshrl.u32 %v9156_v18, 16  ;;  %v9165_v50 = vshll.u32 %v9156_v18, 16  ;;  %v3324_v42 = vmul.f32 %v3234_v53, %v3037_v13 }
 0x3a1   : > { %10631 = vst [vmem:[#allocation11_spill] sm:$0xff] %v9158_v39  ;;  %v2891_v21 = vpop.f32.mrf.mxu0  ;;  %v2348_v43 = vadd.f32 %v2289_v45, %v10632_v37  ;;  %v10634_v45 = vrot.slane %v8699_v34, 7 }
 0x3a2   : > { %v2571_v35 = vpop.f32.mrf.mxu3  ;;  %v2952_v33 = vadd.f32 %v2891_v21, %v2629_v41  ;;  %v3718_v56 = vsel %vm646_vm0, %v3715_v25, %v3717_v17  ;;  %v4912_v31 = vrot.slane %v9165_v50, 1  ;;  %v5723_v15 = vrot.slane %v9162_v8, 1  ;;  %v3239_v21 = vpop.permute.xlu2 %3238 }
 0x3a3   : > { %3896 = vmatmul.bf16.gmra.mxu1 %v3718_v56  ;;  %v5724_v41 = vrot.slane %v9165_v50, 2  ;;  %v4098_v13 = vor.u32 %v10634_v45, %v8702_v9  ;;  %v2630_v53 = vadd.f32 %v2571_v35, %v2348_v43  ;;  %v3501_v9 = vsel %vm427_vm1, %v9137_v4, %v9180_v44 }
 0x3a4   : > { %v2997_v63 = vadd.f32 %v9011_v10, %v2952_v33  ;;  %v9176_v25 = vsel %vm1833_vm7, %v4911_v1, %v4912_v31  ;;  %v4914_v55 = vor.u32 %v4912_v31, %v9162_v8  ;;  %v3365_v33 = vpack.c.bf16 %v3324_v42, %v3324_v42 }
 0x3a5   : > { %10633 = vst [vmem:[#allocation36_spill] sm:$0xff] %v9176_v25  ;;  %v5725_v25 = vor.u32 %v5724_v41, %v5723_v15  ;;  %v10639_v35 = vrot.slane %v8660_v22, 7 }
 0x3a6   : > { %v3038_v60 = vmax.f32 %v2997_v63, 0.0  ;;  %v10636_v63 = vld [vmem:[#allocation39_spill] sm:$0xff]  ;;  %v3445_v42 = vunpack.c.l.b16 %v3365_v33  ;;  %v3508_v33 = vrot.slane %v8746_v3, 7 }
 0x3a7   : > { %v2130_v18 = vadd.f32 %v10637_v59, %v10636_v63  ;;  %v9190_v27 = vsel %vm2641_vm12, %v5721_v62, %v5725_v25  ;;  %v4099_v11 = vsel %vm1049_vm5, %v10639_v35, %v4098_v13  ;;  %v3244_v13 = vpop.permute.xlu0 %3243 }
 0x3a8   : > { %v2291_v56 = vpop.f32.mrf.mxu2  ;;  %v3325_v37 = vmul.f32 %v3239_v21, %v3038_v60  ;;  %v9185_v1 = vpop.f32.mrf.mxu1  ;;  %10638 = vst [vmem:[#allocation16_spill] sm:$0xff] %v9190_v27 }
 0x3a9   : > { %10635 = vst [vmem:[#allocation37_spill] sm:$0xff] %v9185_v1  ;;  %v2894_v31 = vpop.f32.mrf.mxu0  ;;  %v2349_v15 = vadd.f32 %v2291_v56, %v2130_v18 }
 0x3aa   : > { %v2573_v26 = vpop.f32.mrf.mxu3  ;;  %v3366_v39 = vpack.c.bf16 %v3325_v37, %v3325_v37  ;;  %v2953_v23 = vadd.f32 %v2894_v31, %v2630_v53  ;;  %v10363_v31 = vrot.slane %v8743_v47, 7 }
 0x3ab   : > { %v2631_v21 = vadd.f32 %v2573_v26, %v2349_v15  ;;  %v3505_v26 = vrot.slane %v8743_v47, 6 }
 0x3ac   : > { %v3446_v43 = vunpack.c.l.b16 %v3366_v39  ;;  %v2998_v60 = vadd.f32 %v9011_v10, %v2953_v23  ;;  %4498 = vmatmul.bf16.gmra.mxu0 %v4099_v11 }
 0x3ad   : > { %4002 = vmatmul.bf16.gmra.mxu2 %v3501_v9  ;;  %v10642_v9 = vld [vmem:[#allocation40_spill] sm:$0xff] }
 0x3ae   : > { %v9199_v41 = vpack.c.b16 %v3446_v43, %v3445_v42  ;;  %v3039_v45 = vmax.f32 %v2998_v60, 0.0 }
 0x3af   : > { %4260 = vmatmul.bf16.gmra.mxu3 %v4099_v11 }
 0x3b0   : > { %10640 = vst [vmem:[#allocation38_spill] sm:$0xff] %v9199_v41  ;;  %v2294_v62 = vpop.f32.mrf.mxu2  ;;  %v9201_v37 = vpop.f32.mrf.mxu1  ;;  %v3719_v22 = vrot.slane %v9199_v41, 7  ;;  %v9205_v4 = vshrl.u32 %v9199_v41, 16  ;;  %v9208_v18 = vshll.u32 %v9199_v41, 16  ;;  %v3326_v59 = vmul.f32 %v3244_v13, %v3039_v45 }
 0x3b1   : > { %10641 = vst [vmem:[#allocation44_spill] sm:$0xff] %v9201_v37  ;;  %v2896_v39 = vpop.f32.mrf.mxu0  ;;  %v2350_v35 = vadd.f32 %v2294_v62, %v10642_v9  ;;  %v4101_v62 = vor.u32 %v10363_v31, %v8746_v3 }
 0x3b2   : > { %v2576_v53 = vpop.f32.mrf.mxu3  ;;  %v2954_v23 = vadd.f32 %v2896_v39, %v2631_v21  ;;  %v3720_v56 = vsel %vm646_vm0, %v3717_v17, %v3719_v22  ;;  %v4915_v63 = vrot.slane %v9208_v18, 1  ;;  %v5727_v42 = vrot.slane %v9205_v4, 1  ;;  %v3249_v21 = vpop.permute.xlu1 %3248 }
 0x3b3   : > { %3901 = vmatmul.bf16.gmra.mxu1 %v3720_v56  ;;  %v5728_v60 = vrot.slane %v9208_v18, 2  ;;  %v9223_v56 = vor.u32 %v3508_v33, %v3505_v26  ;;  %v3367_v45 = vpack.c.bf16 %v3326_v59, %v3326_v59 }
 0x3b4   : > { %v2999_v11 = vadd.f32 %v9011_v10, %v2954_v23  ;;  %v9219_v43 = vsel %vm1833_vm7, %v4914_v55, %v4915_v63  ;;  %v4917_v17 = vor.u32 %v4915_v63, %v9205_v4  ;;  %v2632_v23 = vadd.f32 %v2576_v53, %v2350_v35  ;;  %v10644_v63 = vld [vmem:[#allocation47_spill] sm:$0xff] }
 0x3b5   : > { %10643 = vst [vmem:[#allocation39_spill] sm:$0xff] %v9219_v43  ;;  %v5729_v55 = vor.u32 %v5728_v60, %v5727_v42  ;;  %v3510_v3 = vsel %vm427_vm1, %v9180_v44, %v9223_v56  ;;  %v10647_v53 = vrot.slane %v8699_v34, 7  ;;  %v3447_v59 = vunpack.c.l.b16 %v3367_v45 }
 0x3b6   : > { %v3040_v15 = vmax.f32 %v2999_v11, 0.0  ;;  %v10645_v11 = vld [vmem:[#allocation42_spill] sm:$0xff]  ;;  %v3514_v45 = vrot.slane %v8784_v58, 6 }
 0x3b7   : > { %v2132_v41 = vadd.f32 %v10645_v11, %v10644_v63  ;;  %v9233_v26 = vsel %vm2641_vm12, %v5725_v25, %v5729_v55  ;;  %v4102_v33 = vsel %vm1049_vm5, %v10647_v53, %v4101_v62  ;;  %v3254_v62 = vpop.permute.xlu2 %3253  ;;  %v10367_v63 = vrot.slane %v8784_v58, 7  ;;  %v10650_v53 = vld [vmem:[#allocation22_spill] sm:$0xff] }
 0x3b8   : > { %v2296_v39 = vpop.f32.mrf.mxu2  ;;  %v3327_v13 = vmul.f32 %v3249_v21, %v3040_v15  ;;  %v9228_v27 = vpop.f32.mrf.mxu1  ;;  %10646 = vst [vmem:[#allocation19_spill] sm:$0xff] %v9233_v26 }
 0x3b9   : > { %v2899_v43 = vpop.f32.mrf.mxu0  ;;  %v2351_v42 = vadd.f32 %v2296_v39, %v2132_v41 }
 0x3ba   : > { %v2578_v9 = vpop.f32.mrf.mxu3  ;;  %v3368_v37 = vpack.c.bf16 %v3327_v13, %v3327_v13  ;;  %v2955_v1 = vadd.f32 %v2899_v43, %v2632_v23 }
 0x3bb   : > { %v2633_v60 = vadd.f32 %v2578_v9, %v2351_v42  ;;  %v3517_v9 = vrot.slane %v8787_v12, 7 }
 0x3bc   : > { %v3448_v35 = vunpack.c.l.b16 %v3368_v37  ;;  %v3000_v15 = vadd.f32 %v9011_v10, %v2955_v1  ;;  %4503 = vmatmul.bf16.gmra.mxu0 %v4102_v33 }
 0x3bd   : > { %4007 = vmatmul.bf16.gmra.mxu2 %v3510_v3  ;;  %v9266_v31 = vor.u32 %v3517_v9, %v3514_v45 }
 0x3be   : > { %v9242_v43 = vpack.c.b16 %v3448_v35, %v3447_v59  ;;  %v3041_v21 = vmax.f32 %v3000_v15, 0.0 }
 0x3bf   : > { %4265 = vmatmul.bf16.gmra.mxu3 %v4102_v33 }
 0x3c0   : > { %10648 = vst [vmem:[#allocation40_spill] sm:$0xff] %v9242_v43  ;;  %v2299_v25 = vpop.f32.mrf.mxu2  ;;  %v9244_v13 = vpop.f32.mrf.mxu1  ;;  %v3721_v34 = vrot.slane %v9242_v43, 7  ;;  %v9248_v44 = vshrl.u32 %v9242_v43, 16  ;;  %v9251_v41 = vshll.u32 %v9242_v43, 16  ;;  %v3328_v3 = vmul.f32 %v3254_v62, %v3041_v21 }
 0x3c1   : > { %10649 = vst [vmem:[#allocation47_spill] sm:$0xff] %v9244_v13  ;;  %v2901_v37 = vpop.f32.mrf.mxu0  ;;  %v2352_v33 = vadd.f32 %v2299_v25, %v10650_v53  ;;  %v4104_v25 = vor.u32 %v10367_v63, %v8787_v12  ;;  %v3519_v12 = vsel %vm427_vm1, %v9223_v56, %v9266_v31 }
 0x3c2   : > { %v2581_v23 = vpop.f32.mrf.mxu3  ;;  %v2956_v1 = vadd.f32 %v2901_v37, %v2633_v60  ;;  %v3722_v39 = vsel %vm646_vm0, %v3719_v22, %v3721_v34  ;;  %v4918_v11 = vrot.slane %v9251_v41, 1  ;;  %v5731_v35 = vrot.slane %v9248_v44, 1  ;;  %v3259_v37 = vpop.permute.xlu0 %3258 }
 0x3c3   : > { %3906 = vmatmul.bf16.gmra.mxu1 %v3722_v39  ;;  %v5732_v60 = vrot.slane %v9251_v41, 2  ;;  %v3369_v21 = vpack.c.bf16 %v3328_v3, %v3328_v3 }
 0x3c4   : > { %v3001_v59 = vadd.f32 %v9011_v10, %v2956_v1  ;;  %v9262_v42 = vsel %vm1833_vm7, %v4917_v17, %v4918_v11  ;;  %v4920_v22 = vor.u32 %v4918_v11, %v9248_v44  ;;  %v2634_v1 = vadd.f32 %v2581_v23, %v2352_v33  ;;  %v10652_v11 = vld [vmem:[#allocation43_spill] sm:$0xff] }
 0x3c5   : > { %10651 = vst [vmem:[#allocation42_spill] sm:$0xff] %v9262_v42  ;;  %v5733_v17 = vor.u32 %v5732_v60, %v5731_v35  ;;  %v10654_v23 = vrot.slane %v8743_v47, 7  ;;  %v3449_v3 = vunpack.c.l.b16 %v3369_v21  ;;  %v3264_v21 = vpop.permute.xlu1 %3263 }
 0x3c6   : > { %v3042_v15 = vmax.f32 %v3001_v59, 0.0  ;;  %v2134_v59 = vadd.f32 %v10652_v11, %v8568_v7 }
 0x3c7   : > { %v9276_v45 = vsel %vm2641_vm12, %v5729_v55, %v5733_v17  ;;  %v4105_v9 = vsel %vm1049_vm5, %v10654_v23, %v4104_v25  ;;  %v10657_v23 = vld [vmem:[#allocation50_spill] sm:$0xff] }
 0x3c8   : > { %v2301_v39 = vpop.f32.mrf.mxu2  ;;  %v3329_v62 = vmul.f32 %v3259_v37, %v3042_v15  ;;  %v9271_v26 = vpop.f32.mrf.mxu1  ;;  %10653 = vst [vmem:[#allocation22_spill] sm:$0xff] %v9276_v45 }
 0x3c9   : > { %v2904_v42 = vpop.f32.mrf.mxu0  ;;  %v2353_v35 = vadd.f32 %v2301_v39, %v2134_v59 }
 0x3ca   : > { %v2583_v53 = vpop.f32.mrf.mxu3  ;;  %v3370_v43 = vpack.c.bf16 %v3329_v62, %v3329_v62  ;;  %v2957_v13 = vadd.f32 %v2904_v42, %v2634_v1  ;;  %v3523_v62 = vrot.slane %v8823_v32, 6 }
 0x3cb   : > { %v2635_v42 = vadd.f32 %v2583_v53, %v2353_v35  ;;  %v3526_v53 = vrot.slane %v8826_v2, 7 }
 0x3cc   : > { %v3450_v33 = vunpack.c.l.b16 %v3370_v43  ;;  %v3002_v15 = vadd.f32 %v9011_v10, %v2957_v13  ;;  %4508 = vmatmul.bf16.gmra.mxu0 %v4105_v9 }
 0x3cd   : > { %4012 = vmatmul.bf16.gmra.mxu2 %v3519_v12  ;;  %v9309_v11 = vor.u32 %v3526_v53, %v3523_v62 }
 0x3ce   : > { %v9285_v7 = vpack.c.b16 %v3450_v33, %v3449_v3  ;;  %v3043_v60 = vmax.f32 %v3002_v15, 0.0 }
 0x3cf   : > { %4270 = vmatmul.bf16.gmra.mxu3 %v4105_v9 }
 0x3d0   : > { %10655 = vst [vmem:[#allocation43_spill] sm:$0xff] %v9285_v7  ;;  %v2304_v55 = vpop.f32.mrf.mxu2  ;;  %v9287_v1 = vpop.f32.mrf.mxu1  ;;  %v3723_v47 = vrot.slane %v9285_v7, 7  ;;  %v9291_v56 = vshrl.u32 %v9285_v7, 16  ;;  %v9294_v39 = vshll.u32 %v9285_v7, 16  ;;  %v3330_v12 = vmul.f32 %v3264_v21, %v3043_v60 }
 0x3d1   : > { %10656 = vst [vmem:[#allocation74_spill] sm:$0xff] %v9287_v1  ;;  %v2906_v43 = vpop.f32.mrf.mxu0  ;;  %v2354_v9 = vadd.f32 %v2304_v55, %v10657_v23  ;;  %v10659_v55 = vrot.slane %v8823_v32, 7 }
 0x3d2   : > { %v2586_v37 = vpop.f32.mrf.mxu3  ;;  %v2958_v13 = vadd.f32 %v2906_v43, %v2635_v42  ;;  %v3724_v25 = vsel %vm646_vm0, %v3721_v34, %v3723_v47  ;;  %v4921_v59 = vrot.slane %v9294_v39, 1  ;;  %v5735_v33 = vrot.slane %v9291_v56, 1  ;;  %v7138_v42 = vld [vmem:[#allocation5 + $0x100] sm:$0xff] }
 0x3d3   : > { %3911 = vmatmul.bf16.gmra.mxu1 %v3724_v25  ;;  %v5736_v43 = vrot.slane %v9294_v39, 2  ;;  %v3269_v25 = vpop.permute.xlu2 %3268  ;;  %v4107_v60 = vor.u32 %v10659_v55, %v8826_v2  ;;  %v2636_v21 = vadd.f32 %v2586_v37, %v2354_v9  ;;  %v3528_v2 = vsel %vm427_vm1, %v9266_v31, %v9309_v11 }
 0x3d4   : > { %v3003_v3 = vadd.f32 %v9011_v10, %v2958_v13  ;;  %v9305_v35 = vsel %vm1833_vm7, %v4920_v22, %v4921_v59  ;;  %v4923_v34 = vor.u32 %v4921_v59, %v9291_v56  ;;  %v3371_v13 = vpack.c.bf16 %v3330_v12, %v3330_v12  ;;  %4727 = vmatpush.bf16.msrb.mxu1 %v7138_v42 }
 0x3d5   : > { %10658 = vst [vmem:[#allocation50_spill] sm:$0xff] %v9305_v35  ;;  %v5737_v59 = vor.u32 %v5736_v43, %v5735_v33  ;;  %v2136_v35 = vadd.f32 %v8584_v14, %v8582_v6  ;;  %v10661_v37 = vrot.slane %v8784_v58, 7 }
 0x3d6   : > { %v3044_v15 = vmax.f32 %v3003_v3, 0.0  ;;  %v3451_v12 = vunpack.c.l.b16 %v3371_v13  ;;  %v3535_v13 = vrot.slane %v8867_v48, 7 }
 0x3d7   : > { %v9319_v62 = vsel %vm2641_vm12, %v5733_v17, %v5737_v59  ;;  %v4108_v53 = vsel %vm1049_vm5, %v10661_v37, %v4107_v60 }
 0x3d8   : > { %v2306_v63 = vpop.f32.mrf.mxu2  ;;  %v3331_v23 = vmul.f32 %v3269_v25, %v3044_v15  ;;  %v9314_v22 = vpop.f32.mrf.mxu1  ;;  %10660 = vst [vmem:[#allocation75_spill] sm:$0xff] %v9319_v62  ;;  %v7161_v62 = vld [vmem:[#allocation5 + $0x1b8] sm:$0xff] }
 0x3d9   : > { %v2909_v3 = vpop.f32.mrf.mxu0  ;;  %v2355_v33 = vadd.f32 %v2306_v63, %v2136_v35  ;;  %5242 = vmatpush.bf16.msra.mxu3 %v7161_v62 }
 0x3da   : > { %v2588_v45 = vpop.f32.mrf.mxu3  ;;  %v3372_v7 = vpack.c.bf16 %v3331_v23, %v3331_v23  ;;  %v2959_v1 = vadd.f32 %v2909_v3, %v2636_v21  ;;  %v10372_v21 = vrot.slane %v8864_v5, 7 }
 0x3db   : > { %v2637_v42 = vadd.f32 %v2588_v45, %v2355_v33  ;;  %v3532_v45 = vrot.slane %v8864_v5, 6 }
 0x3dc   : > { %v3452_v9 = vunpack.c.l.b16 %v3372_v7  ;;  %v3004_v15 = vadd.f32 %v9011_v10, %v2959_v1  ;;  %4513 = vmatmul.bf16.gmra.mxu0 %v4108_v53  ;;  %v3274_v1 = vpop.permute.xlu0 %3273 }
 0x3dd   : > { %4017 = vmatmul.bf16.gmra.mxu2 %v3528_v2 }
 0x3de   : > { %v9328_v6 = vpack.c.b16 %v3452_v9, %v3451_v12  ;;  %v3045_v14 = vmax.f32 %v3004_v15, 0.0  ;;  %v2138_v12 = vadd.f32 %v8598_v20, %v8596_v24  ;;  %v3279_v15 = vpop.permute.xlu1 %3278 }
 0x3df   : > { %4275 = vmatmul.bf16.gmra.mxu3 %v4108_v53 }
 0x3e0   : > { %10662 = vst [vmem:[#allocation76_spill] sm:$0xff] %v9328_v6  ;;  %v2309_v17 = vpop.f32.mrf.mxu2  ;;  %v9330_v25 = vpop.f32.mrf.mxu1  ;;  %v10371_v58 = vrot.slane %v9328_v6, 7  ;;  %v9334_v31 = vshrl.u32 %v9328_v6, 16  ;;  %v9337_v63 = vshll.u32 %v9328_v6, 16  ;;  %v3332_v60 = vmul.f32 %v3274_v1, %v3045_v14 }
 0x3e1   : > { %v2911_v7 = vpop.f32.mrf.mxu0  ;;  %v2356_v3 = vadd.f32 %v2309_v17, %v8590_v30  ;;  %v4110_v30 = vor.u32 %v10372_v21, %v8867_v48 }
 0x3e2   : > { %v2591_v43 = vpop.f32.mrf.mxu3  ;;  %v2960_v35 = vadd.f32 %v2911_v7, %v2637_v42  ;;  %v3726_v55 = vsel %vm646_vm0, %v3723_v47, %v10371_v58  ;;  %v4924_v23 = vrot.slane %v9337_v63, 1  ;;  %v5739_v37 = vrot.slane %v9334_v31, 1 }
 0x3e3   : > { %3916 = vmatmul.bf16.gmra.mxu1 %v3726_v55  ;;  %v5740_v33 = vrot.slane %v9337_v63, 2  ;;  %v3373_v14 = vpack.c.bf16 %v3332_v60, %v3332_v60  ;;  %v9356_v7 = vor.u32 %v3535_v13, %v3532_v45  ;;  %v2638_v17 = vadd.f32 %v2591_v43, %v2356_v3  ;;  %v7153_v60 = vld [vmem:[#allocation5 + $0x178] sm:$0xff] }
 0x3e4   : > { %v3005_v2 = vadd.f32 %v9011_v10, %v2960_v35  ;;  %v9350_v53 = vsel %vm1833_vm7, %v4923_v34, %v4924_v23  ;;  %v4926_v47 = vor.u32 %v4924_v23, %v9334_v31  ;;  %v10665_v43 = vrot.slane %v8823_v32, 7  ;;  %5023 = vmatpush.bf16.msra.mxu2 %v7153_v60 }
 0x3e5   : > { %10663 = vst [vmem:[#allocation77_spill] sm:$0xff] %v9350_v53  ;;  %v9363_v23 = vor.u32 %v5740_v33, %v5739_v37  ;;  %v3537_v48 = vsel %vm427_vm1, %v9309_v11, %v9356_v7  ;;  %v3453_v3 = vunpack.c.l.b16 %v3373_v14  ;;  %v3284_v33 = vpop.permute.xlu2 %3283  ;;  %v10667_v11 = vld [vmem:[#allocation45_spill] sm:$0xff] }
 0x3e6   : > { %v3046_v9 = vmax.f32 %v3005_v2, 0.0  ;;  %v4111_v13 = vsel %vm1049_vm5, %v10665_v43, %v4110_v30  ;;  %v3541_v43 = vrot.slane %v8902_v52, 6 }
 0x3e7   : > { %v9367_v45 = vsel %vm2641_vm12, %v5737_v59, %v9363_v23 }
 0x3e8   : > { %v2311_v42 = vpop.f32.mrf.mxu2  ;;  %v3333_v34 = vmul.f32 %v3279_v15, %v3046_v9  ;;  %v9361_v55 = vpop.f32.mrf.mxu1  ;;  %10664 = vst [vmem:[#allocation78_spill] sm:$0xff] %v9367_v45 }
 0x3e9   : > { %v2357_v1 = vadd.f32 %v2311_v42, %v2138_v12  ;;  %v2914_v24 = vpop.f32.mrf.mxu0 }
 0x3ea   : > { %v2593_v35 = vpop.f32.mrf.mxu3  ;;  %v3374_v20 = vpack.c.bf16 %v3333_v34, %v3333_v34  ;;  %v2961_v58 = vadd.f32 %v2914_v24, %v2638_v17 }
 0x3eb   : > { %v2639_v2 = vadd.f32 %v2593_v35, %v2357_v1 }
 0x3ec   : > { %v3454_v37 = vunpack.c.l.b16 %v3374_v20  ;;  %v3006_v12 = vadd.f32 %v9011_v10, %v2961_v58  ;;  %4518 = vmatmul.bf16.gmra.mxu0 %v4111_v13  ;;  %v10668_v20 = vrot.slane %v9328_v6, 7  ;;  %v7175_v6 = vld [vmem:[#allocation5 + $0x228] sm:$0xff] }
 0x3ed   : > { %4022 = vmatmul.bf16.gmra.mxu2 %v3537_v48  ;;  %v7169_v48 = vld [vmem:[#allocation5 + $0x1f8] sm:$0xff] }
 0x3ee   : > { %v9376_v9 = vpack.c.b16 %v3454_v37, %v3453_v3  ;;  %v3047_v59 = vmax.f32 %v3006_v12, 0.0  ;;  %v10373_v3 = vrot.slane %v8902_v52, 7  ;;  %v7177_v37 = vld [vmem:[#allocation5 + $0x238] sm:$0xff]  ;;  %5522 = vmatpush.bf16.msra.mxu0 %v7169_v48 }
 0x3ef   : > { %4280 = vmatmul.bf16.gmra.mxu3 %v4111_v13  ;;  %v3544_v13 = vrot.slane %v8907_v19, 7  ;;  %5841 = vmatpush.bf16.msra.mxu1 %v7177_v37 }
 0x3f0   : > { %10666 = vst [vmem:[#allocation79_spill] sm:$0xff] %v9376_v9  ;;  %v2314_v15 = vpop.f32.mrf.mxu2  ;;  %v3334_v42 = vmul.f32 %v3284_v33, %v3047_v59  ;;  %v9379_v34 = vpop.f32.mrf.mxu1  ;;  %v3727_v14 = vrot.slane %v9376_v9, 7  ;;  %v9383_v58 = vshrl.u32 %v9376_v9, 16  ;;  %v9386_v1 = vshll.u32 %v9376_v9, 16 }
 0x3f1   : > { %v2358_v17 = vadd.f32 %v2314_v15, %v10667_v11  ;;  %v2916_v30 = vpop.f32.mrf.mxu0 }
 0x3f2   : > { %v2596_v32 = vpop.f32.mrf.mxu3  ;;  %v3375_v35 = vpack.c.bf16 %v3334_v42, %v3334_v42  ;;  %v2962_v62 = vadd.f32 %v2916_v30, %v2639_v2  ;;  %v3728_v60 = vsel %vm646_vm0, %v10668_v20, %v3727_v14  ;;  %v4927_v12 = vrot.slane %v9386_v1, 1 }
 0x3f3   : > { %v2640_v24 = vadd.f32 %v2596_v32, %v2358_v17  ;;  %3921 = vmatmul.bf16.gmra.mxu1 %v3728_v60  ;;  %v5743_v15 = vrot.slane %v9383_v58, 1  ;;  %v5744_v17 = vrot.slane %v9386_v1, 2  ;;  %v3289_v32 = vpop.permute.xlu0 %3288  ;;  %v3545_v20 = vor.u32 %v3544_v13, %v3541_v43 }
 0x3f4   : > { %v3007_v59 = vadd.f32 %v9011_v10, %v2962_v62  ;;  %v9397_v2 = vsel %vm1833_vm7, %v4926_v47, %v4927_v12  ;;  %v4929_v33 = vor.u32 %v4927_v12, %v9383_v58  ;;  %v3455_v42 = vunpack.c.l.b16 %v3375_v35 }
 0x3f5   : > { %10669 = vst [vmem:[#allocation45_spill] sm:$0xff] %v9397_v2  ;;  %v4113_v62 = vor.u32 %v10373_v3, %v8907_v19  ;;  %v5745_v21 = vor.u32 %v5744_v17, %v5743_v15 }
 0x3f6   : > { %v3048_v11 = vmax.f32 %v3007_v59, 0.0  ;;  %v9407_v12 = vpack.c.b16 %v3455_v42, %v3455_v42  ;;  %v3546_v59 = vsel %vm427_vm1, %v9356_v7, %v3545_v20  ;;  %v3294_v7 = vpop.permute.xlu1 %3293 }
 0x3f7   : > { %v9416_v19 = vsel %vm2641_vm12, %v9363_v23, %v5745_v21 }
 0x3f8   : > { %v2316_v30 = vpop.f32.mrf.mxu2  ;;  %v3335_v60 = vmul.f32 %v3289_v32, %v3048_v11  ;;  %v9405_v37 = vpop.f32.mrf.mxu1  ;;  %10671 = vst [vmem:[#allocation80_spill] sm:$0xff] %v9416_v19  ;;  %v3729_v17 = vrot.slane %v9407_v12, 7 }
 0x3f9   : > { %v2919_v47 = vpop.f32.mrf.mxu0  ;;  %v10670_v30 = vrot.slane %v8864_v5, 7 }
 0x3fa   : > { %v2598_v48 = vpop.f32.mrf.mxu3  ;;  %v3376_v45 = vpack.c.bf16 %v3335_v60, %v3335_v60  ;;  %v2963_v35 = vadd.f32 %v2919_v47, %v2640_v24  ;;  %v10673_v60 = vld [vmem:[#allocation59_spill] sm:$0xff] }
 0x3fb   : > { %v4114_v43 = vsel %vm1049_vm5, %v10670_v30, %v4113_v62  ;;  %v3730_v30 = vsel %vm646_vm0, %v3727_v14, %v3729_v17 }
 0x3fc   : > { %v4393_v13 = vunpack.c.l.b16 %v3376_v45  ;;  %v3008_v11 = vadd.f32 %v9011_v10, %v2963_v35  ;;  %4523 = vmatmul.bf16.gmra.mxu0 %v4114_v43 }
 0x3fd   : > { %4027 = vmatmul.bf16.gmra.mxu2 %v3546_v59 }
 0x3fe   : > { %v9419_v15 = vpack.c.b16 %v4393_v13, %v3455_v42  ;;  %v3049_v24 = vmax.f32 %v3008_v11, 0.0  ;;  %v3550_v42 = vrot.slane %v8950_v28, 6  ;;  %v3553_v13 = vrot.slane %v8955_v49, 7 }
 0x3ff   : > { %4285 = vmatmul.bf16.gmra.mxu3 %v4114_v43  ;;  %v4115_v11 = vrot.slane %v8950_v28, 7  ;;  %v10677_v28 = vld [vmem:[#allocation17_spill] sm:$0xff] }
 0x400   : > { %10672 = vst [vmem:[#allocation81_spill] sm:$0xff] %v9419_v15  ;;  %v3988_v32 = vpop.f32.mrf.mxu2  ;;  %v3336_v5 = vmul.f32 %v3294_v7, %v3049_v24  ;;  %v9423_v47 = vpop.f32.mrf.mxu1  ;;  %v9426_v23 = vshrl.u32 %v9419_v15, 16  ;;  %v9429_v10 = vshll.u32 %v9419_v15, 16  ;;  %v3554_v17 = vor.u32 %v3553_v13, %v3550_v42 }
 0x401   : > { %v3989_v62 = vadd.f32 %v3988_v32, %v10673_v60  ;;  %v2921_v45 = vpop.f32.mrf.mxu0  ;;  %v10678_v42 = vrot.slane %v8902_v52, 7 }
 0x402   : > { %v4246_v48 = vpop.f32.mrf.mxu3  ;;  %v3377_v35 = vpack.c.bf16 %v3336_v5, %v3336_v5  ;;  %v4930_v43 = vrot.slane %v9429_v10, 1  ;;  %v5747_v24 = vrot.slane %v9426_v23, 1  ;;  %v5748_v7 = vrot.slane %v9429_v10, 2 }
 0x403   : > { %v4350_v59 = vadd.f32 %v4246_v48, %v3989_v62  ;;  %3926 = vmatmul.bf16.gmra.mxu1 %v3730_v30  ;;  %v4116_v45 = vor.u32 %v4115_v11, %v8955_v49 }
 0x404   : > { %v4394_v32 = vunpack.c.l.b16 %v3377_v35  ;;  %v9439_v60 = vsel %vm1833_vm7, %v4929_v33, %v4930_v43  ;;  %v4932_v5 = vor.u32 %v4930_v43, %v9426_v23  ;;  %v5749_v62 = vor.u32 %v5748_v7, %v5747_v24 }
 0x405   : > { %10674 = vst [vmem:[#allocation59_spill] sm:$0xff] %v9439_v60  ;;  %v4117_v13 = vsel %vm1049_vm5, %v10678_v42, %v4116_v45  ;;  %v7168_v60 = vld [vmem:[#allocation5 + $0x1f0] sm:$0xff] }
 0x406   : > { %v9442_v48 = vpack.c.b16 %v4394_v32, %v4394_v32  ;;  %v9446_v30 = vsel %vm2641_vm12, %v5745_v21, %v5749_v62  ;;  %v3555_v21 = vsel %vm427_vm1, %v3545_v20, %v3554_v17  ;;  %5523 = vmatpush.bf16.msra.mxu0 %v7168_v60  ;;  %v4121_v60 = vrot.slane %v9045_v0, 7 }
 0x407   : > { %10676 = vst [vmem:[#allocation83_spill] sm:$0xff] %v9446_v30 }
 0x408   : > { %10675 = vst [vmem:[#allocation82_spill] sm:$0xff] %v9442_v48  ;;  %v3990_v14 = vpop.f32.mrf.mxu2  ;;  %v9449_v2 = vpop.f32.mrf.mxu1  ;;  %v9452_v33 = vshrl.u32 %v9442_v48, 16  ;;  %v9455_v35 = vshll.u32 %v9442_v48, 16 }
 0x409   : > { %v3991_v3 = vadd.f32 %v3990_v14, %v10677_v28  ;;  %v4489_v43 = vpop.f32.mrf.mxu0 }
 0x40a   : > { %v4248_v19 = vpop.f32.mrf.mxu3  ;;  %v9457_v7 = vadd.f32 %v4489_v43, %v4350_v59  ;;  %v4933_v49 = vrot.slane %v9455_v35, 1  ;;  %v5751_v32 = vrot.slane %v9452_v33, 1  ;;  %v5752_v14 = vrot.slane %v9455_v35, 2  ;;  %v10683_v59 = vld [vmem:[#allocation20_spill] sm:$0xff] }
 0x40b   : > { %v4351_v24 = vadd.f32 %v4248_v19, %v3991_v3 }
 0x40c   : > { %4528 = vmatmul.bf16.gmra.mxu0 %v4117_v13  ;;  %v9467_v28 = vsel %vm1833_vm7, %v4932_v5, %v4933_v49  ;;  %v9470_v3 = vor.u32 %v4933_v49, %v9452_v33  ;;  %v9472_v19 = vor.u32 %v5752_v14, %v5751_v32  ;;  %v10684_v49 = vld [vmem:[#allocation25_spill] sm:$0xff]  ;;  %v3562_v32 = vrot.slane %v9001_v40, 7 }
 0x40d   : > { %4032 = vmatmul.bf16.gmra.mxu2 %v3555_v21  ;;  %10679 = vst [vmem:[#allocation17_spill] sm:$0xff] %v9467_v28  ;;  %v7152_v28 = vld [vmem:[#allocation5 + $0x170] sm:$0xff]  ;;  %v4118_v14 = vrot.slane %v8998_v46, 7 }
 0x40e   : > { %10680 = vst [vmem:[#allocation84_spill] sm:$0xff] %v9470_v3  ;;  %v9476_v52 = vsel %vm2641_vm12, %v5749_v62, %v9472_v19  ;;  %v7160_v62 = vld [vmem:[#allocation5 + $0x1b0] sm:$0xff]  ;;  %5024 = vmatpush.bf16.msra.mxu2 %v7152_v28 }
 0x40f   : > { %4290 = vmatmul.bf16.gmra.mxu3 %v4117_v13  ;;  %10681 = vst [vmem:[#allocation85_spill] sm:$0xff] %v9472_v19  ;;  %v3559_v13 = vrot.slane %v8998_v46, 6  ;;  %v4119_v19 = vor.u32 %v4118_v14, %v9001_v40  ;;  %v7176_v28 = vld [vmem:[#allocation5 + $0x230] sm:$0xff] }
 0x410   : > { %v3993_v20 = vpop.f32.mrf.mxu2  ;;  %10682 = vst [vmem:[#allocation86_spill] sm:$0xff] %v9476_v52  ;;  %v9479_v42 = vpop.f32.mrf.mxu1  ;;  %5243 = vmatpush.bf16.msra.mxu3 %v7160_v62  ;;  %v10685_v52 = vld [vmem:[#allocation23_spill] sm:$0xff]  ;;  %5842 = vmatpush.bf16.msra.mxu1 %v7176_v28 }
 0x411   : > { %v3994_v45 = vadd.f32 %v3993_v20, %v10683_v59  ;;  %v4491_v21 = vpop.f32.mrf.mxu0  ;;  %v3563_v59 = vor.u32 %v3562_v32, %v3559_v13  ;;  %v4120_v46 = vsel %vm1049_vm5, %v4115_v11, %v4119_v19  ;;  %v3568_v11 = vrot.slane %v9045_v0, 6 }
 0x412   : > { %v4251_v43 = vpop.f32.mrf.mxu3  ;;  %v9481_v5 = vadd.f32 %v4491_v21, %v4351_v24 }
 0x413   : > { %v4352_v30 = vadd.f32 %v4251_v43, %v3994_v45  ;;  %4728 = vmatmul.bf16.vlgmr.msrb.gmra.mxu1 %v10684_v49  ;;  %v3564_v53 = vsel %vm427_vm1, %v3554_v17, %v3563_v59 }
 0x414   : > { %5843 = vmatpush.bf16.msra.mxu1 %v7175_v6 }
 0x418   : > { %v3995_v20 = vpop.f32.mrf.mxu2  ;;  %v9489_v43 = vpop.f32.mrf.mxu1 }
 0x419   : > { %v3996_v45 = vadd.f32 %v3995_v20, %v10685_v52  ;;  %v4494_v21 = vpop.f32.mrf.mxu0 }
 0x41a   : > { %v4253_v24 = vpop.f32.mrf.mxu3  ;;  %v9491_v3 = vadd.f32 %v4494_v21, %v4352_v30 }
 0x41b   : > { %v4353_v49 = vadd.f32 %v4253_v24, %v3996_v45  ;;  %v10686_v45 = vld [vmem:[#allocation46_spill] sm:$0xff]  ;;  %v4122_v24 = vor.u32 %v4121_v60, %v9048_v36 }
 0x41c   : > { %4533 = vmatmul.bf16.gmra.mxu0 %v4120_v46 }
 0x41d   : > { %4037 = vmatmul.bf16.gmra.mxu2 %v3564_v53  ;;  %v3571_v53 = vrot.slane %v9048_v36, 7 }
 0x41f   : > { %4295 = vmatmul.bf16.gmra.mxu3 %v4120_v46  ;;  %v3572_v19 = vor.u32 %v3571_v53, %v3568_v11 }
 0x420   : > { %v3998_v40 = vpop.f32.mrf.mxu2  ;;  %v9496_v32 = vpop.f32.mrf.mxu1 }
 0x421   : > { %v3999_v52 = vadd.f32 %v3998_v40, %v8994_v54  ;;  %v4496_v62 = vpop.f32.mrf.mxu0 }
 0x422   : > { %v4256_v13 = vpop.f32.mrf.mxu3  ;;  %v9498_v20 = vadd.f32 %v4496_v62, %v4353_v49 }
 0x423   : > { %v4354_v30 = vadd.f32 %v4256_v13, %v3999_v52  ;;  %4733 = vmatmul.bf16.gmra.mxu1 %v10686_v45  ;;  %v3573_v52 = vsel %vm427_vm1, %v3563_v59, %v3572_v19  ;;  %v4123_v13 = vsel %vm1049_vm5, %v4118_v14, %v4122_v24  ;;  %v3580_v59 = vrot.slane %v9080_v57, 7 }
 0x424   : > { %v4124_v14 = vrot.slane %v9077_v38, 7 }
 0x428   : > { %v4000_v17 = vpop.f32.mrf.mxu2  ;;  %v9506_v46 = vpop.f32.mrf.mxu1 }
 0x429   : > { %v4001_v54 = vadd.f32 %v4000_v17, %v9025_v29  ;;  %v4499_v28 = vpop.f32.mrf.mxu0 }
 0x42a   : > { %v4258_v21 = vpop.f32.mrf.mxu3  ;;  %v9508_v40 = vadd.f32 %v4499_v28, %v4354_v30  ;;  %v3577_v30 = vrot.slane %v9077_v38, 6  ;;  %v4125_v28 = vor.u32 %v4124_v14, %v9080_v57  ;;  %v7159_v38 = vld [vmem:[#allocation5 + $0x1a8] sm:$0xff] }
 0x42b   : > { %v4355_v49 = vadd.f32 %v4258_v21, %v4001_v54  ;;  %v10687_v54 = vld [vmem:[#allocation48_spill] sm:$0xff]  ;;  %5244 = vmatpush.bf16.msra.mxu3 %v7159_v38 }
 0x42c   : > { %4538 = vmatmul.bf16.gmra.mxu0 %v4123_v13  ;;  %v3581_v21 = vor.u32 %v3580_v59, %v3577_v30  ;;  %v4126_v48 = vsel %vm1049_vm5, %v4121_v60, %v4125_v28  ;;  %v10692_v28 = vld [vmem:[#allocation71_spill] sm:$0xff] }
 0x42d   : > { %4042 = vmatmul.bf16.gmra.mxu2 %v3573_v52 }
 0x42f   : > { %4300 = vmatmul.bf16.gmra.mxu3 %v4123_v13 }
 0x430   : > { %v4003_v0 = vpop.f32.mrf.mxu2  ;;  %v9513_v11 = vpop.f32.mrf.mxu1 }
 0x431   : > { %v4004_v62 = vadd.f32 %v4003_v0, %v9041_v61  ;;  %v4501_v29 = vpop.f32.mrf.mxu0 }
 0x432   : > { %v4261_v36 = vpop.f32.mrf.mxu3  ;;  %v9515_v17 = vadd.f32 %v4501_v29, %v4355_v49  ;;  %v3582_v29 = vsel %vm427_vm1, %v3572_v19, %v3581_v21  ;;  %v10691_v19 = vld [vmem:[#allocation69_spill] sm:$0xff] }
 0x433   : > { %v4356_v53 = vadd.f32 %v4261_v36, %v4004_v62  ;;  %4738 = vmatmul.bf16.gmra.mxu1 %v10687_v54  ;;  %v7151_v36 = vld [vmem:[#allocation5 + $0x168] sm:$0xff]  ;;  %v3586_v60 = vrot.slane %v10691_v19, 6 }
 0x434   : > { %5025 = vmatpush.bf16.msra.mxu2 %v7151_v36  ;;  %v7167_v36 = vld [vmem:[#allocation5 + $0x1e8] sm:$0xff] }
 0x435   : > { %5524 = vmatpush.bf16.msra.mxu0 %v7167_v36 }
 0x438   : > { %v4005_v24 = vpop.f32.mrf.mxu2  ;;  %v9523_v13 = vpop.f32.mrf.mxu1 }
 0x439   : > { %v4006_v61 = vadd.f32 %v4005_v24, %v9060_v16  ;;  %10688 = vst [vmem:[#allocation20_spill] sm:$0xff] %v9523_v13  ;;  %v4504_v0 = vpop.f32.mrf.mxu0 }
 0x43a   : > { %v4263_v52 = vpop.f32.mrf.mxu3  ;;  %v9525_v62 = vadd.f32 %v4504_v0, %v4356_v53  ;;  %v3589_v0 = vrot.slane %v10692_v28, 7 }
 0x43b   : > { %v4357_v49 = vadd.f32 %v4263_v52, %v4006_v61  ;;  %v10690_v52 = vld [vmem:[#allocation49_spill] sm:$0xff] }
 0x43c   : > { %4543 = vmatmul.bf16.gmra.mxu0 %v4126_v48  ;;  %v3590_v38 = vor.u32 %v3589_v0, %v3586_v60 }
 0x43d   : > { %4047 = vmatmul.bf16.gmra.mxu2 %v3582_v29 }
 0x43f   : > { %4305 = vmatmul.bf16.gmra.mxu3 %v4126_v48  ;;  %v4127_v48 = vrot.slane %v10691_v19, 7 }
 0x440   : > { %v4008_v57 = vpop.f32.mrf.mxu2  ;;  %v9530_v59 = vpop.f32.mrf.mxu1 }
 0x441   : > { %v4009_v16 = vadd.f32 %v4008_v57, %v9073_v51  ;;  %10689 = vst [vmem:[#allocation25_spill] sm:$0xff] %v9530_v59  ;;  %v4506_v24 = vpop.f32.mrf.mxu0  ;;  %v4128_v51 = vor.u32 %v4127_v48, %v10692_v28  ;;  %v10693_v57 = vld [vmem:[#allocation70_spill] sm:$0xff]  ;;  %v3591_v59 = vsel %vm427_vm1, %v3581_v21, %v3590_v38  ;;  %v10695_v28 = vld [vmem:[#allocation68_spill] sm:$0xff]  ;;  %v3595_v21 = vrot.slane %v9162_v8, 6 }
 0x442   : > { %v4266_v30 = vpop.f32.mrf.mxu3  ;;  %v9532_v61 = vadd.f32 %v4506_v24, %v4357_v49 }
 0x443   : > { %v4358_v53 = vadd.f32 %v4266_v30, %v4009_v16  ;;  %4743 = vmatmul.bf16.gmra.mxu1 %v10690_v52  ;;  %v4129_v19 = vsel %vm1049_vm5, %v4124_v14, %v4128_v51  ;;  %v3598_v14 = vrot.slane %v9165_v50, 7 }
 0x445   : > { %v3599_v6 = vor.u32 %v3598_v14, %v3595_v21  ;;  %v10700_v21 = vld [vmem:[#allocation11_spill] sm:$0xff] }
 0x448   : > { %v4010_v29 = vpop.f32.mrf.mxu2  ;;  %v9540_v16 = vpop.f32.mrf.mxu1 }
 0x449   : > { %v4011_v15 = vadd.f32 %v4010_v29, %v10693_v57  ;;  %10694 = vst [vmem:[#allocation23_spill] sm:$0xff] %v9540_v16  ;;  %v4509_v49 = vpop.f32.mrf.mxu0 }
 0x44a   : > { %v4268_v9 = vpop.f32.mrf.mxu3  ;;  %v9542_v24 = vadd.f32 %v4509_v49, %v4358_v53  ;;  %v10698_v49 = vld [vmem:[#allocation33_spill] sm:$0xff] }
 0x44b   : > { %v4359_v30 = vadd.f32 %v4268_v9, %v4011_v15  ;;  %v10697_v15 = vld [vmem:[#allocation34_spill] sm:$0xff] }
 0x44c   : > { %4548 = vmatmul.bf16.gmra.mxu0 %v4129_v19 }
 0x44d   : > { %4052 = vmatmul.bf16.gmra.mxu2 %v3591_v59  ;;  %v4130_v59 = vrot.slane %v9162_v8, 7 }
 0x44f   : > { %4310 = vmatmul.bf16.gmra.mxu3 %v4129_v19  ;;  %v4131_v51 = vor.u32 %v4130_v59, %v9165_v50 }
 0x450   : > { %v4013_v60 = vpop.f32.mrf.mxu2  ;;  %v9547_v29 = vpop.f32.mrf.mxu1 }
 0x451   : > { %v4014_v0 = vadd.f32 %v4013_v60, %v10695_v28  ;;  %10696 = vst [vmem:[#allocation46_spill] sm:$0xff] %v9547_v29  ;;  %v4511_v57 = vpop.f32.mrf.mxu0  ;;  %v4132_v29 = vsel %vm1049_vm5, %v4127_v48, %v4131_v51  ;;  %v4133_v48 = vrot.slane %v9205_v4, 7  ;;  %v7150_v51 = vld [vmem:[#allocation5 + $0x160] sm:$0xff] }
 0x452   : > { %v4271_v36 = vpop.f32.mrf.mxu3  ;;  %v9549_v9 = vadd.f32 %v4511_v57, %v4359_v30  ;;  %v3600_v57 = vsel %vm427_vm1, %v3590_v38, %v3599_v6  ;;  %v3607_v38 = vrot.slane %v9208_v18, 7  ;;  %5026 = vmatpush.bf16.msra.mxu2 %v7150_v51 }
 0x453   : > { %v4360_v16 = vadd.f32 %v4271_v36, %v4014_v0  ;;  %4748 = vmatmul.bf16.gmra.mxu1 %v10697_v15 }
 0x458   : > { %v4015_v53 = vpop.f32.mrf.mxu2  ;;  %v9557_v28 = vpop.f32.mrf.mxu1 }
 0x459   : > { %v4016_v19 = vadd.f32 %v4015_v53, %v10698_v49  ;;  %10699 = vst [vmem:[#allocation48_spill] sm:$0xff] %v9557_v28  ;;  %v4514_v0 = vpop.f32.mrf.mxu0 }
 0x45a   : > { %v4273_v60 = vpop.f32.mrf.mxu3  ;;  %v9559_v36 = vadd.f32 %v4514_v0, %v4360_v16  ;;  %v3604_v16 = vrot.slane %v9205_v4, 6  ;;  %v4134_v0 = vor.u32 %v4133_v48, %v9208_v18  ;;  %v10705_v18 = vld [vmem:[#allocation44_spill] sm:$0xff] }
 0x45b   : > { %v4361_v30 = vadd.f32 %v4273_v60, %v4016_v19  ;;  %v10702_v19 = vld [vmem:[#allocation56_spill] sm:$0xff] }
 0x45c   : > { %4553 = vmatmul.bf16.gmra.mxu0 %v4132_v29  ;;  %v3608_v60 = vor.u32 %v3607_v38, %v3604_v16  ;;  %v4135_v4 = vsel %vm1049_vm5, %v4130_v59, %v4134_v0  ;;  %v3613_v59 = vrot.slane %v9248_v44, 6 }
 0x45d   : > { %4057 = vmatmul.bf16.gmra.mxu2 %v3600_v57  ;;  %v10703_v57 = vld [vmem:[#allocation37_spill] sm:$0xff] }
 0x45f   : > { %4315 = vmatmul.bf16.gmra.mxu3 %v4132_v29 }
 0x460   : > { %v4018_v8 = vpop.f32.mrf.mxu2  ;;  %v9564_v13 = vpop.f32.mrf.mxu1 }
 0x461   : > { %v4019_v14 = vadd.f32 %v4018_v8, %v10700_v21  ;;  %10701 = vst [vmem:[#allocation49_spill] sm:$0xff] %v9564_v13  ;;  %v4516_v53 = vpop.f32.mrf.mxu0  ;;  %v7158_v13 = vld [vmem:[#allocation5 + $0x1a0] sm:$0xff] }
 0x462   : > { %v4276_v50 = vpop.f32.mrf.mxu3  ;;  %v9566_v28 = vadd.f32 %v4516_v53, %v4361_v30  ;;  %5245 = vmatpush.bf16.msra.mxu3 %v7158_v13  ;;  %v4136_v13 = vrot.slane %v9248_v44, 7 }
 0x463   : > { %v4362_v49 = vadd.f32 %v4276_v50, %v4019_v14  ;;  %4753 = vmatmul.bf16.gmra.mxu1 %v10702_v19  ;;  %v3609_v19 = vsel %vm427_vm1, %v3599_v6, %v3608_v60  ;;  %v3616_v6 = vrot.slane %v9251_v41, 7 }
 0x465   : > { %v3617_v0 = vor.u32 %v3616_v6, %v3613_v59 }
 0x468   : > { %v4020_v29 = vpop.f32.mrf.mxu2  ;;  %v9574_v14 = vpop.f32.mrf.mxu1 }
 0x469   : > { %v4021_v8 = vadd.f32 %v4020_v29, %v10703_v57  ;;  %10704 = vst [vmem:[#allocation69_spill] sm:$0xff] %v9574_v14  ;;  %v4519_v30 = vpop.f32.mrf.mxu0 }
 0x46a   : > { %v4278_v21 = vpop.f32.mrf.mxu3  ;;  %v9576_v53 = vadd.f32 %v4519_v30, %v4362_v49  ;;  %v7166_v49 = vld [vmem:[#allocation5 + $0x1e0] sm:$0xff]  ;;  %v10707_v30 = vld [vmem:[#allocation57_spill] sm:$0xff] }
 0x46b   : > { %v4363_v50 = vadd.f32 %v4278_v21, %v4021_v8  ;;  %v7174_v21 = vld [vmem:[#allocation5 + $0x220] sm:$0xff]  ;;  %5525 = vmatpush.bf16.msra.mxu0 %v7166_v49  ;;  %v10709_v49 = vld [vmem:[#allocation47_spill] sm:$0xff] }
 0x46c   : > { %4558 = vmatmul.bf16.gmra.mxu0 %v4135_v4  ;;  %5844 = vmatpush.bf16.msra.mxu1 %v7174_v21 }
 0x46d   : > { %4062 = vmatmul.bf16.gmra.mxu2 %v3609_v19 }
 0x46f   : > { %4320 = vmatmul.bf16.gmra.mxu3 %v4135_v4  ;;  %v4137_v4 = vor.u32 %v4136_v13, %v9251_v41 }
 0x470   : > { %v4023_v16 = vpop.f32.mrf.mxu2  ;;  %v9581_v29 = vpop.f32.mrf.mxu1 }
 0x471   : > { %v4024_v38 = vadd.f32 %v4023_v16, %v10705_v18  ;;  %10706 = vst [vmem:[#allocation71_spill] sm:$0xff] %v9581_v29  ;;  %v4521_v57 = vpop.f32.mrf.mxu0  ;;  %v3618_v29 = vsel %vm427_vm1, %v3608_v60, %v3617_v0  ;;  %v3625_v60 = vrot.slane %v9294_v39, 7 }
 0x472   : > { %v4281_v51 = vpop.f32.mrf.mxu3  ;;  %v9583_v8 = vadd.f32 %v4521_v57, %v4363_v50 }
 0x473   : > { %v4364_v14 = vadd.f32 %v4281_v51, %v4024_v38  ;;  %4758 = vmatmul.bf16.gmra.mxu1 %v10707_v30  ;;  %v4138_v30 = vsel %vm1049_vm5, %v4133_v48, %v4137_v4  ;;  %v4139_v48 = vrot.slane %v9291_v56, 7 }
 0x475   : > { %v4140_v4 = vor.u32 %v4139_v48, %v9294_v39 }
 0x478   : > { %v4025_v19 = vpop.f32.mrf.mxu2  ;;  %v9591_v18 = vpop.f32.mrf.mxu1 }
 0x479   : > { %v4026_v16 = vadd.f32 %v4025_v19, %v9228_v27  ;;  %10708 = vst [vmem:[#allocation70_spill] sm:$0xff] %v9591_v18  ;;  %v4524_v38 = vpop.f32.mrf.mxu0  ;;  %v7173_v18 = vld [vmem:[#allocation5 + $0x218] sm:$0xff] }
 0x47a   : > { %v4283_v50 = vpop.f32.mrf.mxu3  ;;  %v9593_v57 = vadd.f32 %v4524_v38, %v4364_v14  ;;  %v3622_v14 = vrot.slane %v9291_v56, 6  ;;  %5845 = vmatpush.bf16.msra.mxu1 %v7173_v18  ;;  %v3640_v18 = vrot.slane %v9383_v58, 6 }
 0x47b   : > { %v4365_v51 = vadd.f32 %v4283_v50, %v4026_v16  ;;  %v10711_v16 = vld [vmem:[#allocation14_spill] sm:$0xff] }
 0x47c   : > { %4563 = vmatmul.bf16.gmra.mxu0 %v4138_v30 }
 0x47d   : > { %4067 = vmatmul.bf16.gmra.mxu2 %v3618_v29 }
 0x47f   : > { %4325 = vmatmul.bf16.gmra.mxu3 %v4138_v30  ;;  %v3626_v30 = vor.u32 %v3625_v60, %v3622_v14 }
 0x480   : > { %v4028_v44 = vpop.f32.mrf.mxu2  ;;  %v9598_v59 = vpop.f32.mrf.mxu1 }
 0x481   : > { %v4029_v21 = vadd.f32 %v4028_v44, %v10709_v49  ;;  %10710 = vst [vmem:[#allocation68_spill] sm:$0xff] %v9598_v59  ;;  %v4526_v27 = vpop.f32.mrf.mxu0  ;;  %v10712_v59 = vld [vmem:[#allocation74_spill] sm:$0xff] }
 0x482   : > { %v4286_v41 = vpop.f32.mrf.mxu3  ;;  %v9600_v19 = vadd.f32 %v4526_v27, %v4365_v51  ;;  %v4141_v27 = vsel %vm1049_vm5, %v4136_v13, %v4140_v4  ;;  %v3631_v13 = vrot.slane %v9334_v31, 6  ;;  %v3634_v4 = vrot.slane %v9337_v63, 7 }
 0x483   : > { %v4366_v6 = vadd.f32 %v4286_v41, %v4029_v21  ;;  %4763 = vmatmul.bf16.gmra.mxu1 %v10711_v16  ;;  %v3627_v41 = vsel %vm427_vm1, %v3617_v0, %v3626_v30  ;;  %v10714_v0 = vld [vmem:[#allocation18_spill] sm:$0xff] }
 0x488   : > { %v4030_v29 = vpop.f32.mrf.mxu2  ;;  %v3929_v44 = vpop.f32.mrf.mxu1 }
 0x489   : > { %v4031_v50 = vadd.f32 %v4030_v29, %v9271_v26  ;;  %v4529_v49 = vpop.f32.mrf.mxu0 }
 0x48a   : > { %v4288_v38 = vpop.f32.mrf.mxu3  ;;  %v9608_v51 = vadd.f32 %v4529_v49, %v4366_v6  ;;  %v7149_v6 = vld [vmem:[#allocation5 + $0x158] sm:$0xff]  ;;  %v4142_v49 = vrot.slane %v9334_v31, 7 }
 0x48b   : > { %v4367_v21 = vadd.f32 %v4288_v38, %v4031_v50  ;;  %v7157_v38 = vld [vmem:[#allocation5 + $0x198] sm:$0xff]  ;;  %5027 = vmatpush.bf16.msra.mxu2 %v7149_v6 }
 0x48c   : > { %4568 = vmatmul.bf16.gmra.mxu0 %v4141_v27  ;;  %5246 = vmatpush.bf16.msra.mxu3 %v7157_v38 }
 0x48d   : > { %4072 = vmatmul.bf16.gmra.mxu2 %v3627_v41  ;;  %v3635_v41 = vor.u32 %v3634_v4, %v3631_v13  ;;  %v7148_v13 = vld [vmem:[#allocation5 + $0x150] sm:$0xff] }
 0x48e   : > { %v7156_v4 = vld [vmem:[#allocation5 + $0x190] sm:$0xff] }
 0x48f   : > { %4330 = vmatmul.bf16.gmra.mxu3 %v4141_v27  ;;  %v3636_v31 = vsel %vm427_vm1, %v3626_v30, %v3635_v41  ;;  %5028 = vmatpush.bf16.msra.mxu2 %v7148_v13 }
 0x490   : > { %v4033_v56 = vpop.f32.mrf.mxu2  ;;  %v4729_v39 = vpop.f32.mrf.mxu1  ;;  %5247 = vmatpush.bf16.msra.mxu3 %v7156_v4 }
 0x491   : > { %v4034_v14 = vadd.f32 %v4033_v56, %v10712_v59  ;;  %v9614_v26 = vadd.f32 %v4729_v39, %v9457_v7  ;;  %v4531_v29 = vpop.f32.mrf.mxu0  ;;  %v4143_v7 = vor.u32 %v4142_v49, %v9337_v63 }
 0x492   : > { %v4291_v60 = vpop.f32.mrf.mxu3  ;;  %v9616_v50 = vadd.f32 %v4531_v29, %v4367_v21 }
 0x493   : > { %10713 = vst [vmem:[#allocation34_spill] sm:$0xff] %v9614_v26  ;;  %v4368_v44 = vadd.f32 %v4291_v60, %v4034_v14  ;;  %4768 = vmatmul.bf16.gmra.mxu1 %v10714_v0  ;;  %v7165_v26 = vld [vmem:[#allocation5 + $0x1d8] sm:$0xff]  ;;  %v4144_v6 = vsel %vm1049_vm5, %v4139_v48, %v4143_v7  ;;  %v7147_v7 = vld [vmem:[#allocation5 + $0x148] sm:$0xff] }
 0x494   : > { %5526 = vmatpush.bf16.msra.mxu0 %v7165_v26  ;;  %v10715_v48 = vld [vmem:[#allocation61_spill] sm:$0xff]  ;;  %v3643_v26 = vrot.slane %v9386_v1, 7  ;;  %5029 = vmatpush.bf16.msra.mxu2 %v7147_v7 }
 0x498   : > { %v4035_v59 = vpop.f32.mrf.mxu2  ;;  %v4731_v56 = vpop.f32.mrf.mxu1 }
 0x499   : > { %v4036_v27 = vadd.f32 %v4035_v59, %v9314_v22  ;;  %v9625_v14 = vadd.f32 %v4731_v56, %v9481_v5  ;;  %v4534_v60 = vpop.f32.mrf.mxu0  ;;  %v3644_v56 = vor.u32 %v3643_v26, %v3640_v18  ;;  %v3650_v18 = vshll.u32 %v9407_v12, 16 }
 0x49a   : > { %v4293_v21 = vpop.f32.mrf.mxu3  ;;  %v9627_v29 = vadd.f32 %v4534_v60, %v4368_v44 }
 0x49b   : > { %v4369_v39 = vadd.f32 %v4293_v21, %v4036_v27  ;;  %v7155_v21 = vld [vmem:[#allocation5 + $0x188] sm:$0xff]  ;;  %v3645_v4 = vsel %vm427_vm1, %v3635_v41, %v3644_v56 }
 0x49c   : > { %4573 = vmatmul.bf16.gmra.mxu0 %v4144_v6  ;;  %5248 = vmatpush.bf16.msra.mxu3 %v7155_v21 }
 0x49d   : > { %4077 = vmatmul.bf16.gmra.mxu2 %v3636_v31 }
 0x49f   : > { %4335 = vmatmul.bf16.gmra.mxu3 %v4144_v6 }
 0x4a0   : > { %v4038_v22 = vpop.f32.mrf.mxu2  ;;  %v4734_v38 = vpop.f32.mrf.mxu1 }
 0x4a1   : > { %v4039_v63 = vadd.f32 %v4038_v22, %v9330_v25  ;;  %v9633_v44 = vadd.f32 %v4734_v38, %v9491_v3  ;;  %v4536_v59 = vpop.f32.mrf.mxu0  ;;  %v4145_v25 = vrot.slane %v9383_v58, 7  ;;  %v7146_v22 = vld [vmem:[#allocation5 + $0x140] sm:$0xff] }
 0x4a2   : > { %v4296_v5 = vpop.f32.mrf.mxu3  ;;  %v9635_v30 = vadd.f32 %v4536_v59, %v4369_v39  ;;  %5030 = vmatpush.bf16.msra.mxu2 %v7146_v22 }
 0x4a3   : > { %v4370_v27 = vadd.f32 %v4296_v5, %v4039_v63  ;;  %4773 = vmatmul.bf16.gmra.mxu1 %v10715_v48  ;;  %v4146_v60 = vor.u32 %v4145_v25, %v9386_v1  ;;  %v7154_v63 = vld [vmem:[#allocation5 + $0x180] sm:$0xff]  ;;  %v3647_v1 = vshrl.u32 %v9407_v12, 16  ;;  %v7163_v12 = vld [vmem:[#allocation5 + $0x1c8] sm:$0xff] }
 0x4a4   : > { %5249 = vmatpush.bf16.msra.mxu3 %v7154_v63 }
 0x4a5   : > { %v4147_v59 = vsel %vm1049_vm5, %v4142_v49, %v4146_v60  ;;  %v10716_v49 = vld [vmem:[#allocation64_spill] sm:$0xff]  ;;  %v3649_v60 = vrot.slane %v3647_v1, 6  ;;  %v4148_v22 = vrot.slane %v3647_v1, 7 }
 0x4a8   : > { %v4040_v3 = vpop.f32.mrf.mxu2  ;;  %v4736_v6 = vpop.f32.mrf.mxu1 }
 0x4a9   : > { %v4041_v39 = vadd.f32 %v4040_v3, %v9361_v55  ;;  %v9644_v5 = vadd.f32 %v4736_v6, %v9498_v20  ;;  %v4539_v38 = vpop.f32.mrf.mxu0  ;;  %v4400_v6 = vrot.slane %v9426_v23, 7 }
 0x4aa   : > { %v4298_v31 = vpop.f32.mrf.mxu3  ;;  %v9646_v58 = vadd.f32 %v4539_v38, %v4370_v27  ;;  %v7164_v27 = vld [vmem:[#allocation5 + $0x1d0] sm:$0xff] }
 0x4ab   : > { %v4371_v13 = vadd.f32 %v4298_v31, %v4041_v39  ;;  %5527 = vmatpush.bf16.msra.mxu0 %v7164_v27  ;;  %v3652_v31 = vrot.slane %v3650_v18, 7  ;;  %v4403_v38 = vor.u32 %v9429_v10, %v4400_v6 }
 0x4ac   : > { %4578 = vmatmul.bf16.gmra.mxu0 %v4147_v59 }
 0x4ad   : > { %4082 = vmatmul.bf16.gmra.mxu2 %v3645_v4  ;;  %v3653_v63 = vor.u32 %v3652_v31, %v3649_v60  ;;  %v4404_v1 = vsel %vm1049_vm5, %v4145_v25, %v4403_v38 }
 0x4af   : > { %4340 = vmatmul.bf16.gmra.mxu3 %v4147_v59  ;;  %5528 = vmatpush.bf16.msra.mxu0 %v7163_v12  ;;  %v3654_v23 = vsel %vm427_vm1, %v3644_v56, %v3653_v63  ;;  %v10717_v56 = vld [vmem:[#allocation66_spill] sm:$0xff] }
 0x4b0   : > { %v4043_v55 = vpop.f32.mrf.mxu2  ;;  %v4739_v7 = vpop.f32.mrf.mxu1 }
 0x4b1   : > { %v4044_v20 = vadd.f32 %v4043_v55, %v9379_v34  ;;  %v9654_v21 = vadd.f32 %v4739_v7, %v9508_v40  ;;  %v4541_v3 = vpop.f32.mrf.mxu0  ;;  %v7162_v55 = vld [vmem:[#allocation5 + $0x1c0] sm:$0xff] }
 0x4b2   : > { %v4301_v26 = vpop.f32.mrf.mxu3  ;;  %v9656_v39 = vadd.f32 %v4541_v3, %v4371_v13  ;;  %v4149_v13 = vor.u32 %v4148_v22, %v3650_v18  ;;  %v4408_v22 = vrot.slane %v9452_v33, 7  ;;  %v10718_v33 = vld [vmem:[#allocation53_spill] sm:$0xff] }
 0x4b3   : > { %v4372_v41 = vadd.f32 %v4301_v26, %v4044_v20  ;;  %4778 = vmatmul.bf16.gmra.mxu1 %v10716_v49  ;;  %5529 = vmatpush.bf16.msra.mxu0 %v7162_v55 }
 0x4b4   : > { %v4150_v10 = vsel %vm1049_vm5, %v4145_v25, %v4149_v13  ;;  %v4411_v63 = vor.u32 %v9455_v35, %v4408_v22 }
 0x4b6   : > { %v4412_v55 = vsel %vm1049_vm5, %v4400_v6, %v4411_v63 }
 0x4b8   : > { %v4045_v34 = vpop.f32.mrf.mxu2  ;;  %v4741_v59 = vpop.f32.mrf.mxu1 }
 0x4b9   : > { %v4046_v40 = vadd.f32 %v4045_v34, %v9405_v37  ;;  %v9663_v20 = vadd.f32 %v4741_v59, %v9515_v17  ;;  %v4544_v26 = vpop.f32.mrf.mxu0  ;;  %v7172_v34 = vld [vmem:[#allocation5 + $0x210] sm:$0xff] }
 0x4ba   : > { %v4303_v4 = vpop.f32.mrf.mxu3  ;;  %v9665_v27 = vadd.f32 %v4544_v26, %v4372_v41  ;;  %5846 = vmatpush.bf16.msra.mxu1 %v7172_v34  ;;  %v10719_v26 = vld [vmem:[#allocation28_spill] sm:$0xff] }
 0x4bb   : > { %v4373_v7 = vadd.f32 %v4303_v4, %v4046_v40 }
 0x4bc   : > { %4583 = vmatmul.bf16.gmra.mxu0 %v4404_v1 }
 0x4bd   : > { %4087 = vmatmul.bf16.gmra.mxu2 %v3654_v23 }
 0x4bf   : > { %4345 = vmatmul.bf16.gmra.mxu3 %v4150_v10 }
 0x4c0   : > { %v4048_v37 = vpop.f32.mrf.mxu2  ;;  %v4744_v17 = vpop.f32.mrf.mxu1 }
 0x4c1   : > { %v4049_v18 = vadd.f32 %v4048_v37, %v9423_v47  ;;  %v9672_v60 = vadd.f32 %v4744_v17, %v9525_v62  ;;  %v4546_v41 = vpop.f32.mrf.mxu0 }
 0x4c2   : > { %v4306_v3 = vpop.f32.mrf.mxu3  ;;  %v9674_v12 = vadd.f32 %v4546_v41, %v4373_v7 }
 0x4c3   : > { %v4374_v31 = vadd.f32 %v4306_v3, %v4049_v18  ;;  %4783 = vmatmul.bf16.gmra.mxu1 %v10717_v56  ;;  %v10720_v18 = vld [vmem:[#allocation32_spill] sm:$0xff]  ;;  %v5397_v3 = vrot.slane %v10687_v54, 1 }
 0x4c8   : > { %v4050_v25 = vpop.f32.mrf.mxu2  ;;  %v4746_v40 = vpop.f32.mrf.mxu1 }
 0x4c9   : > { %v4051_v47 = vadd.f32 %v4050_v25, %v9449_v2  ;;  %v9681_v62 = vadd.f32 %v4746_v40, %v9532_v61  ;;  %v4549_v4 = vpop.f32.mrf.mxu0 }
 0x4ca   : > { %v4308_v38 = vpop.f32.mrf.mxu3  ;;  %v9683_v13 = vadd.f32 %v4549_v4, %v4374_v31 }
 0x4cb   : > { %v4375_v59 = vadd.f32 %v4308_v38, %v4051_v47  ;;  %v10721_v47 = vld [vmem:[#allocation55_spill] sm:$0xff] }
 0x4cc   : > { %4588 = vmatmul.bf16.gmra.mxu0 %v4412_v55  ;;  %v10722_v55 = vld [vmem:[#allocation41_spill] sm:$0xff] }
 0x4cd   : > { %5031 = vmatmul.bf16.vlgmr.msra.gmra.mxu2 %v10718_v33 }
 0x4cf   : > { %5250 = vmatmul.bf16.vlgmr.msra.gmra.mxu3 %v10719_v26 }
 0x4d0   : > { %v4053_v7 = vpop.f32.mrf.mxu2  ;;  %v4749_v23 = vpop.f32.mrf.mxu1 }
 0x4d1   : > { %v4054_v35 = vadd.f32 %v4053_v7, %v9479_v42  ;;  %v9690_v1 = vadd.f32 %v4749_v23, %v9542_v24  ;;  %v4551_v61 = vpop.f32.mrf.mxu0  ;;  %v5396_v24 = vrot.slane %v10686_v45, 1 }
 0x4d2   : > { %v4311_v2 = vpop.f32.mrf.mxu3  ;;  %v9692_v37 = vadd.f32 %v4551_v61, %v4375_v59 }
 0x4d3   : > { %v4376_v10 = vadd.f32 %v4311_v2, %v4054_v35  ;;  %4788 = vmatmul.bf16.gmra.mxu1 %v10720_v18  ;;  %v5398_v63 = vsel %vm2359_vm10, %v5396_v24, %v5397_v3 }
 0x4d8   : > { %v4055_v6 = vpop.f32.mrf.mxu2  ;;  %v4751_v31 = vpop.f32.mrf.mxu1 }
 0x4d9   : > { %v4056_v17 = vadd.f32 %v4055_v6, %v9489_v43  ;;  %v9698_v42 = vadd.f32 %v4751_v31, %v9549_v9  ;;  %v4554_v22 = vpop.f32.mrf.mxu0  ;;  %v10723_v6 = vld [vmem:[#allocation52_spill] sm:$0xff] }
 0x4da   : > { %v4313_v41 = vpop.f32.mrf.mxu3  ;;  %v9701_v25 = vadd.f32 %v4554_v22, %v4376_v10 }
 0x4db   : > { %v4377_v34 = vadd.f32 %v4313_v41, %v4056_v17 }
 0x4dc   : > { %5530 = vmatmul.bf16.vlgmr.msra.gmra.mxu0 %v5398_v63  ;;  %v10724_v63 = vld [vmem:[#allocation38_spill] sm:$0xff] }
 0x4dd   : > { %5036 = vmatmul.bf16.gmra.mxu2 %v10719_v26  ;;  %v5399_v26 = vrot.slane %v10690_v52, 1 }
 0x4df   : > { %5255 = vmatmul.bf16.gmra.mxu3 %v10721_v47  ;;  %v5400_v10 = vsel %vm2359_vm10, %v5397_v3, %v5399_v26 }
 0x4e0   : > { %v4058_v54 = vpop.f32.mrf.mxu2  ;;  %v4754_v40 = vpop.f32.mrf.mxu1 }
 0x4e1   : > { %v4059_v43 = vadd.f32 %v4058_v54, %v9496_v32  ;;  %v9708_v9 = vadd.f32 %v4754_v40, %v9559_v36  ;;  %v4556_v4 = vpop.f32.mrf.mxu0  ;;  %v10725_v54 = vld [vmem:[#allocation20_spill] sm:$0xff] }
 0x4e2   : > { %v4316_v38 = vpop.f32.mrf.mxu3  ;;  %v9710_v59 = vadd.f32 %v4556_v4, %v4377_v34  ;;  %v7171_v34 = vld [vmem:[#allocation5 + $0x208] sm:$0xff] }
 0x4e3   : > { %v4378_v45 = vadd.f32 %v4316_v38, %v4059_v43  ;;  %4793 = vmatmul.bf16.gmra.mxu1 %v10722_v55 }
 0x4e4   : > { %5847 = vmatpush.bf16.msra.mxu1 %v7171_v34 }
 0x4e8   : > { %v4060_v33 = vpop.f32.mrf.mxu2  ;;  %v4756_v2 = vpop.f32.mrf.mxu1 }
 0x4e9   : > { %v4061_v7 = vadd.f32 %v4060_v33, %v9506_v46  ;;  %v9716_v32 = vadd.f32 %v4756_v2, %v9566_v28  ;;  %v4559_v23 = vpop.f32.mrf.mxu0 }
 0x4ea   : > { %v4318_v35 = vpop.f32.mrf.mxu3  ;;  %v9718_v36 = vadd.f32 %v4559_v23, %v4378_v45 }
 0x4eb   : > { %v4379_v61 = vadd.f32 %v4318_v35, %v4061_v7  ;;  %v10726_v7 = vld [vmem:[#allocation13_spill] sm:$0xff] }
 0x4ec   : > { %5535 = vmatmul.bf16.gmra.mxu0 %v5400_v10 }
 0x4ed   : > { %5041 = vmatmul.bf16.gmra.mxu2 %v10721_v47  ;;  %v5401_v47 = vrot.slane %v10697_v15, 1  ;;  %v10727_v15 = vld [vmem:[#allocation25_spill] sm:$0xff] }
 0x4ef   : > { %5260 = vmatmul.bf16.gmra.mxu3 %v10723_v6  ;;  %v5402_v33 = vsel %vm2359_vm10, %v5399_v26, %v5401_v47 }
 0x4f0   : > { %v4063_v17 = vpop.f32.mrf.mxu2  ;;  %v4759_v41 = vpop.f32.mrf.mxu1 }
 0x4f1   : > { %v4064_v52 = vadd.f32 %v4063_v17, %v9513_v11  ;;  %v9725_v31 = vadd.f32 %v4759_v41, %v9576_v53  ;;  %v4561_v28 = vpop.f32.mrf.mxu0  ;;  %v10729_v41 = vld [vmem:[#allocation56_spill] sm:$0xff] }
 0x4f2   : > { %v4321_v46 = vpop.f32.mrf.mxu3  ;;  %v9727_v24 = vadd.f32 %v4561_v28, %v4379_v61  ;;  %v10730_v28 = vld [vmem:[#allocation23_spill] sm:$0xff] }
 0x4f3   : > { %v4380_v22 = vadd.f32 %v4321_v46, %v4064_v52  ;;  %4798 = vmatmul.bf16.gmra.mxu1 %v10724_v63  ;;  %v10728_v46 = vld [vmem:[#allocation40_spill] sm:$0xff] }
 0x4f8   : > { %v4065_v3 = vpop.f32.mrf.mxu2  ;;  %v4761_v11 = vpop.f32.mrf.mxu1 }
 0x4f9   : > { %v4066_v43 = vadd.f32 %v4065_v3, %v10725_v54  ;;  %v9733_v40 = vadd.f32 %v4761_v11, %v9583_v8  ;;  %v4564_v53 = vpop.f32.mrf.mxu0 }
 0x4fa   : > { %v4323_v38 = vpop.f32.mrf.mxu3  ;;  %v9735_v45 = vadd.f32 %v4564_v53, %v4380_v22  ;;  %v10731_v53 = vld [vmem:[#allocation58_spill] sm:$0xff] }
 0x4fb   : > { %v4381_v4 = vadd.f32 %v4323_v38, %v4066_v43 }
 0x4fc   : > { %5540 = vmatmul.bf16.gmra.mxu0 %v5402_v33  ;;  %v10732_v33 = vld [vmem:[#allocation46_spill] sm:$0xff] }
 0x4fd   : > { %5046 = vmatmul.bf16.gmra.mxu2 %v10723_v6  ;;  %v5403_v6 = vrot.slane %v10729_v41, 1  ;;  %v10735_v41 = vld [vmem:[#allocation48_spill] sm:$0xff] }
 0x4ff   : > { %5265 = vmatmul.bf16.gmra.mxu3 %v10726_v7  ;;  %v5404_v11 = vsel %vm2359_vm10, %v5401_v47, %v5403_v6 }
 0x500   : > { %v4068_v35 = vpop.f32.mrf.mxu2  ;;  %v4764_v61 = vpop.f32.mrf.mxu1 }
 0x501   : > { %v4069_v2 = vadd.f32 %v4068_v35, %v10727_v15  ;;  %v9742_v10 = vadd.f32 %v4764_v61, %v9593_v57  ;;  %v4566_v8 = vpop.f32.mrf.mxu0 }
 0x502   : > { %v4326_v23 = vpop.f32.mrf.mxu3  ;;  %v9744_v52 = vadd.f32 %v4566_v8, %v4381_v4 }
 0x503   : > { %v4382_v17 = vadd.f32 %v4326_v23, %v4069_v2  ;;  %4803 = vmatmul.bf16.gmra.mxu1 %v10728_v46 }
 0x508   : > { %v4070_v26 = vpop.f32.mrf.mxu2  ;;  %v4766_v3 = vpop.f32.mrf.mxu1 }
 0x509   : > { %v4071_v22 = vadd.f32 %v4070_v26, %v10730_v28  ;;  %v9750_v54 = vadd.f32 %v4766_v3, %v9600_v19  ;;  %v4569_v43 = vpop.f32.mrf.mxu0  ;;  %v10734_v26 = vld [vmem:[#allocation57_spill] sm:$0xff] }
 0x50a   : > { %v4328_v34 = vpop.f32.mrf.mxu3  ;;  %v9752_v57 = vadd.f32 %v4569_v43, %v4382_v17  ;;  %v10733_v17 = vld [vmem:[#allocation43_spill] sm:$0xff] }
 0x50b   : > { %v4383_v38 = vadd.f32 %v4328_v34, %v4071_v22 }
 0x50c   : > { %5545 = vmatmul.bf16.gmra.mxu0 %v5404_v11 }
 0x50d   : > { %5051 = vmatmul.bf16.gmra.mxu2 %v10726_v7  ;;  %v5405_v7 = vrot.slane %v10734_v26, 1 }
 0x50f   : > { %5270 = vmatmul.bf16.gmra.mxu3 %v10731_v53 }
 0x510   : > { %v4073_v4 = vpop.f32.mrf.mxu2  ;;  %v4769_v2 = vpop.f32.mrf.mxu1 }
 0x511   : > { %v4074_v35 = vadd.f32 %v4073_v4, %v10732_v33  ;;  %v9759_v23 = vadd.f32 %v4769_v2, %v9608_v51  ;;  %v4571_v19 = vpop.f32.mrf.mxu0  ;;  %v7170_v4 = vld [vmem:[#allocation5 + $0x200] sm:$0xff]  ;;  %v10736_v33 = vld [vmem:[#allocation60_spill] sm:$0xff] }
 0x512   : > { %v4331_v15 = vpop.f32.mrf.mxu3  ;;  %v9761_v8 = vadd.f32 %v4571_v19, %v4383_v38  ;;  %v5406_v38 = vsel %vm2359_vm10, %v5403_v6, %v5405_v7  ;;  %5848 = vmatpush.bf16.msra.mxu1 %v7170_v4 }
 0x513   : > { %v4384_v61 = vadd.f32 %v4331_v15, %v4074_v35  ;;  %4808 = vmatmul.bf16.gmra.mxu1 %v10733_v17  ;;  %v10737_v15 = vld [vmem:[#allocation49_spill] sm:$0xff] }
 0x518   : > { %v4075_v47 = vpop.f32.mrf.mxu2  ;;  %v4771_v34 = vpop.f32.mrf.mxu1 }
 0x519   : > { %v4076_v28 = vadd.f32 %v4075_v47, %v10735_v41  ;;  %v9767_v3 = vadd.f32 %v4771_v34, %v9616_v50  ;;  %v4574_v43 = vpop.f32.mrf.mxu0 }
 0x51a   : > { %v4333_v22 = vpop.f32.mrf.mxu3  ;;  %v9769_v51 = vadd.f32 %v4574_v43, %v4384_v61 }
 0x51b   : > { %v4385_v11 = vadd.f32 %v4333_v22, %v4076_v28  ;;  %v10739_v28 = vld [vmem:[#allocation76_spill] sm:$0xff]  ;;  %v10740_v22 = vld [vmem:[#allocation69_spill] sm:$0xff] }
 0x51c   : > { %5550 = vmatmul.bf16.gmra.mxu0 %v5406_v38 }
 0x51d   : > { %5056 = vmatmul.bf16.gmra.mxu2 %v10731_v53  ;;  %v5407_v53 = vrot.slane %v10711_v16, 1  ;;  %v10743_v16 = vld [vmem:[#allocation71_spill] sm:$0xff] }
 0x51f   : > { %5275 = vmatmul.bf16.gmra.mxu3 %v10736_v33 }
 0x520   : > { %v4078_v35 = vpop.f32.mrf.mxu2  ;;  %v4774_v47 = vpop.f32.mrf.mxu1 }
 0x521   : > { %v4079_v2 = vadd.f32 %v4078_v35, %v10737_v15  ;;  %v9776_v50 = vadd.f32 %v4774_v47, %v9627_v29  ;;  %v4576_v26 = vpop.f32.mrf.mxu0 }
 0x522   : > { %v4336_v19 = vpop.f32.mrf.mxu3  ;;  %v9778_v41 = vadd.f32 %v4576_v26, %v4385_v11  ;;  %v10742_v11 = vld [vmem:[#allocation63_spill] sm:$0xff] }
 0x523   : > { %10738 = vst [vmem:[#allocation33_spill] sm:$0xff] %v9776_v50  ;;  %v4386_v61 = vadd.f32 %v4336_v19, %v4079_v2  ;;  %4813 = vmatmul.bf16.gmra.mxu1 %v10739_v28  ;;  %v5408_v2 = vsel %vm2359_vm10, %v5405_v7, %v5407_v53 }
 0x528   : > { %v4080_v6 = vpop.f32.mrf.mxu2  ;;  %v4776_v4 = vpop.f32.mrf.mxu1 }
 0x529   : > { %v4081_v34 = vadd.f32 %v4080_v6, %v10740_v22  ;;  %v9784_v38 = vadd.f32 %v4776_v4, %v9635_v30  ;;  %v4579_v35 = vpop.f32.mrf.mxu0 }
 0x52a   : > { %v4338_v43 = vpop.f32.mrf.mxu3  ;;  %v9786_v29 = vadd.f32 %v4579_v35, %v4386_v61  ;;  %v10744_v61 = vld [vmem:[#allocation79_spill] sm:$0xff] }
 0x52b   : > { %10741 = vst [vmem:[#allocation11_spill] sm:$0xff] %v9784_v38  ;;  %v4387_v15 = vadd.f32 %v4338_v43, %v4081_v34  ;;  %v10745_v43 = vld [vmem:[#allocation70_spill] sm:$0xff] }
 0x52c   : > { %5555 = vmatmul.bf16.gmra.mxu0 %v5408_v2 }
 0x52d   : > { %5061 = vmatmul.bf16.gmra.mxu2 %v10736_v33  ;;  %v5409_v33 = vrot.slane %v10714_v0, 1  ;;  %v10747_v0 = vld [vmem:[#allocation68_spill] sm:$0xff] }
 0x52f   : > { %5280 = vmatmul.bf16.gmra.mxu3 %v10742_v11 }
 0x530   : > { %v4083_v19 = vpop.f32.mrf.mxu2  ;;  %v4779_v6 = vpop.f32.mrf.mxu1 }
 0x531   : > { %v4084_v47 = vadd.f32 %v4083_v19, %v10743_v16  ;;  %v9793_v22 = vadd.f32 %v4779_v6, %v9646_v58  ;;  %v4581_v30 = vpop.f32.mrf.mxu0 }
 0x532   : > { %v4341_v26 = vpop.f32.mrf.mxu3  ;;  %v9795_v34 = vadd.f32 %v4581_v30, %v4387_v15  ;;  %v10746_v15 = vld [vmem:[#allocation62_spill] sm:$0xff] }
 0x533   : > { %v4388_v4 = vadd.f32 %v4341_v26, %v4084_v47  ;;  %4818 = vmatmul.bf16.gmra.mxu1 %v10744_v61  ;;  %v5410_v47 = vsel %vm2359_vm10, %v5407_v53, %v5409_v33 }
 0x538   : > { %v4085_v7 = vpop.f32.mrf.mxu2  ;;  %v4781_v38 = vpop.f32.mrf.mxu1 }
 0x539   : > { %v4086_v35 = vadd.f32 %v4085_v7, %v10745_v43  ;;  %v9801_v19 = vadd.f32 %v4781_v38, %v9656_v39  ;;  %v4584_v16 = vpop.f32.mrf.mxu0 }
 0x53a   : > { %v4343_v2 = vpop.f32.mrf.mxu3  ;;  %v9803_v58 = vadd.f32 %v4584_v16, %v4388_v4  ;;  %v10749_v4 = vld [vmem:[#allocation81_spill] sm:$0xff] }
 0x53b   : > { %v4389_v50 = vadd.f32 %v4343_v2, %v4086_v35 }
 0x53c   : > { %5560 = vmatmul.bf16.gmra.mxu0 %v5410_v47 }
 0x53d   : > { %5066 = vmatmul.bf16.gmra.mxu2 %v10742_v11  ;;  %v5411_v11 = vrot.slane %v10715_v48, 1 }
 0x53f   : > { %5285 = vmatmul.bf16.gmra.mxu3 %v10746_v15 }
 0x540   : > { %v4088_v26 = vpop.f32.mrf.mxu2  ;;  %v4784_v7 = vpop.f32.mrf.mxu1 }
 0x541   : > { %v4089_v6 = vadd.f32 %v4088_v26, %v10747_v0  ;;  %v9810_v43 = vadd.f32 %v4784_v7, %v9665_v27  ;;  %v4586_v39 = vpop.f32.mrf.mxu0  ;;  %v5412_v27 = vsel %vm2359_vm10, %v5409_v33, %v5411_v11  ;;  %v5413_v33 = vrot.slane %v10716_v49, 1 }
 0x542   : > { %v4346_v30 = vpop.f32.mrf.mxu3  ;;  %v9812_v35 = vadd.f32 %v4586_v39, %v4389_v50  ;;  %v10751_v50 = vld [vmem:[#allocation65_spill] sm:$0xff] }
 0x543   : > { %10748 = vst [vmem:[#allocation37_spill] sm:$0xff] %v9810_v43  ;;  %v4390_v38 = vadd.f32 %v4346_v30, %v4089_v6  ;;  %4823 = vmatmul.bf16.gmra.mxu1 %v10749_v4  ;;  %v10752_v30 = vld [vmem:[#allocation34_spill] sm:$0xff] }
 0x548   : > { %v4090_v53 = vpop.f32.mrf.mxu2  ;;  %v4786_v16 = vpop.f32.mrf.mxu1 }
 0x549   : > { %v9817_v47 = vadd.f32 %v4786_v16, %v9674_v12  ;;  %v4589_v26 = vpop.f32.mrf.mxu0  ;;  %v10753_v16 = vld [vmem:[#allocation82_spill] sm:$0xff] }
 0x54a   : > { %v4348_v2 = vpop.f32.mrf.mxu3  ;;  %v9819_v0 = vadd.f32 %v4589_v26, %v4390_v38 }
 0x54b   : > { %10750 = vst [vmem:[#allocation44_spill] sm:$0xff] %v9817_v47 }
 0x54c   : > { %5565 = vmatmul.bf16.gmra.mxu0 %v5412_v27 }
 0x54d   : > { %5071 = vmatmul.bf16.gmra.mxu2 %v10746_v15 }
 0x54f   : > { %5290 = vmatmul.bf16.gmra.mxu3 %v10751_v50 }
 0x550   : > { %v5032_v6 = vpop.f32.mrf.mxu2  ;;  %v4789_v48 = vpop.f32.mrf.mxu1 }
 0x551   : > { %v5136_v7 = vadd.f32 %v5032_v6, %v10752_v30  ;;  %v9826_v53 = vadd.f32 %v4789_v48, %v9683_v13  ;;  %v4591_v12 = vpop.f32.mrf.mxu0  ;;  %v5414_v13 = vsel %vm2359_vm10, %v5411_v11, %v5413_v33 }
 0x552   : > { %v5251_v39 = vpop.f32.mrf.mxu3 }
 0x553   : > { %v5355_v2 = vadd.f32 %v5251_v39, %v5136_v7  ;;  %4828 = vmatmul.bf16.gmra.mxu1 %v10753_v16  ;;  %v10754_v7 = vld [vmem:[#allocation30_spill] sm:$0xff] }
 0x558   : > { %v5034_v38 = vpop.f32.mrf.mxu2  ;;  %v4791_v27 = vpop.f32.mrf.mxu1 }
 0x559   : > { %v5137_v15 = vadd.f32 %v5034_v38, %v9625_v14  ;;  %v9832_v47 = vadd.f32 %v4791_v27, %v9692_v37  ;;  %v5531_v6 = vpop.f32.mrf.mxu0 }
 0x55a   : > { %v5253_v26 = vpop.f32.mrf.mxu3  ;;  %v9834_v43 = vadd.f32 %v5531_v6, %v5355_v2  ;;  %v10755_v2 = vld [vmem:[#allocation29_spill] sm:$0xff] }
 0x55b   : > { %v5356_v30 = vadd.f32 %v5253_v26, %v5137_v15 }
 0x55c   : > { %5570 = vmatmul.bf16.gmra.mxu0 %v5414_v13 }
 0x55d   : > { %5076 = vmatmul.bf16.gmra.mxu2 %v10751_v50  ;;  %v5415_v50 = vrot.slane %v10717_v56, 1 }
 0x55f   : > { %5295 = vmatmul.bf16.gmra.mxu3 %v10754_v7 }
 0x560   : > { %v5037_v39 = vpop.f32.mrf.mxu2  ;;  %v4794_v48 = vpop.f32.mrf.mxu1 }
 0x561   : > { %v5138_v49 = vadd.f32 %v5037_v39, %v9633_v44  ;;  %v9841_v12 = vadd.f32 %v4794_v48, %v9701_v25  ;;  %v5533_v37 = vpop.f32.mrf.mxu0 }
 0x562   : > { %v5256_v14 = vpop.f32.mrf.mxu3  ;;  %v9843_v15 = vadd.f32 %v5533_v37, %v5356_v30  ;;  %v10756_v30 = vld [vmem:[#allocation35_spill] sm:$0xff] }
 0x563   : > { %v5357_v38 = vadd.f32 %v5256_v14, %v5138_v49  ;;  %5849 = vmatmul.bf16.vlgmr.msra.gmra.mxu1 %v10755_v2  ;;  %v5416_v49 = vsel %vm2359_vm10, %v5413_v33, %v5415_v50 }
 0x568   : > { %v5039_v11 = vpop.f32.mrf.mxu2  ;;  %v4796_v6 = vpop.f32.mrf.mxu1 }
 0x569   : > { %v5139_v26 = vadd.f32 %v5039_v11, %v9644_v5  ;;  %v9849_v44 = vadd.f32 %v4796_v6, %v9710_v59  ;;  %v5536_v13 = vpop.f32.mrf.mxu0 }
 0x56a   : > { %v5258_v27 = vpop.f32.mrf.mxu3  ;;  %v9851_v25 = vadd.f32 %v5536_v13, %v5357_v38  ;;  %v10757_v38 = vld [vmem:[#allocation51_spill] sm:$0xff] }
 0x56b   : > { %v5358_v39 = vadd.f32 %v5258_v27, %v5139_v26 }
 0x56c   : > { %5575 = vmatmul.bf16.gmra.mxu0 %v5416_v49 }
 0x56d   : > { %5081 = vmatmul.bf16.gmra.mxu2 %v10754_v7  ;;  %v5417_v7 = vrot.slane %v10720_v18, 1 }
 0x56f   : > { %5300 = vmatmul.bf16.gmra.mxu3 %v10756_v30 }
 0x570   : > { %v5042_v14 = vpop.f32.mrf.mxu2  ;;  %v4799_v48 = vpop.f32.mrf.mxu1 }
 0x571   : > { %v5140_v56 = vadd.f32 %v5042_v14, %v9654_v21  ;;  %v9858_v37 = vadd.f32 %v4799_v48, %v9718_v36  ;;  %v5538_v59 = vpop.f32.mrf.mxu0  ;;  %v5418_v14 = vsel %vm2359_vm10, %v5415_v50, %v5417_v7 }
 0x572   : > { %v5261_v5 = vpop.f32.mrf.mxu3  ;;  %v9860_v11 = vadd.f32 %v5538_v59, %v5358_v39  ;;  %v10758_v39 = vld [vmem:[#allocation36_spill] sm:$0xff] }
 0x573   : > { %v5359_v2 = vadd.f32 %v5261_v5, %v5140_v56  ;;  %5854 = vmatmul.bf16.gmra.mxu1 %v10757_v38 }
 0x578   : > { %v5044_v33 = vpop.f32.mrf.mxu2  ;;  %v4801_v6 = vpop.f32.mrf.mxu1 }
 0x579   : > { %v5141_v26 = vadd.f32 %v5044_v33, %v9663_v20  ;;  %v9866_v21 = vadd.f32 %v4801_v6, %v9727_v24  ;;  %v5541_v13 = vpop.f32.mrf.mxu0 }
 0x57a   : > { %v5263_v27 = vpop.f32.mrf.mxu3  ;;  %v9868_v36 = vadd.f32 %v5541_v13, %v5359_v2  ;;  %v10759_v2 = vld [vmem:[#allocation54_spill] sm:$0xff] }
 0x57b   : > { %v5360_v49 = vadd.f32 %v5263_v27, %v5141_v26 }
 0x57c   : > { %5580 = vmatmul.bf16.gmra.mxu0 %v5418_v14 }
 0x57d   : > { %5086 = vmatmul.bf16.gmra.mxu2 %v10756_v30  ;;  %v5419_v30 = vrot.slane %v10722_v55, 1 }
 0x57f   : > { %5305 = vmatmul.bf16.gmra.mxu3 %v10758_v39  ;;  %v5420_v14 = vsel %vm2359_vm10, %v5417_v7, %v5419_v30 }
 0x580   : > { %v5047_v56 = vpop.f32.mrf.mxu2  ;;  %v4804_v5 = vpop.f32.mrf.mxu1 }
 0x581   : > { %v5142_v18 = vadd.f32 %v5047_v56, %v9672_v60  ;;  %v9875_v48 = vadd.f32 %v4804_v5, %v9735_v45  ;;  %v5543_v24 = vpop.f32.mrf.mxu0 }
 0x582   : > { %v5266_v20 = vpop.f32.mrf.mxu3  ;;  %v9877_v38 = vadd.f32 %v5543_v24, %v5360_v49  ;;  %v10760_v49 = vld [vmem:[#allocation39_spill] sm:$0xff] }
 0x583   : > { %v5361_v59 = vadd.f32 %v5266_v20, %v5142_v18  ;;  %5859 = vmatmul.bf16.gmra.mxu1 %v10759_v2 }
 0x588   : > { %v5049_v50 = vpop.f32.mrf.mxu2  ;;  %v4806_v27 = vpop.f32.mrf.mxu1 }
 0x589   : > { %v5143_v33 = vadd.f32 %v5049_v50, %v9681_v62  ;;  %v9883_v60 = vadd.f32 %v4806_v27, %v9744_v52  ;;  %v5546_v6 = vpop.f32.mrf.mxu0 }
 0x58a   : > { %v5268_v26 = vpop.f32.mrf.mxu3  ;;  %v9885_v45 = vadd.f32 %v5546_v6, %v5361_v59  ;;  %v10761_v59 = vld [vmem:[#allocation12_spill] sm:$0xff] }
 0x58b   : > { %v5362_v13 = vadd.f32 %v5268_v26, %v5143_v33 }
 0x58c   : > { %5585 = vmatmul.bf16.gmra.mxu0 %v5420_v14 }
 0x58d   : > { %5091 = vmatmul.bf16.gmra.mxu2 %v10758_v39  ;;  %v5421_v39 = vrot.slane %v10724_v63, 1 }
 0x58f   : > { %5310 = vmatmul.bf16.gmra.mxu3 %v10760_v49  ;;  %v5422_v6 = vsel %vm2359_vm10, %v5419_v30, %v5421_v39 }
 0x590   : > { %v5052_v56 = vpop.f32.mrf.mxu2  ;;  %v4809_v18 = vpop.f32.mrf.mxu1 }
 0x591   : > { %v5144_v55 = vadd.f32 %v5052_v56, %v9690_v1  ;;  %v9892_v20 = vadd.f32 %v4809_v18, %v9752_v57  ;;  %v5548_v52 = vpop.f32.mrf.mxu0 }
 0x592   : > { %v5271_v62 = vpop.f32.mrf.mxu3  ;;  %v9894_v24 = vadd.f32 %v5548_v52, %v5362_v13  ;;  %v10762_v13 = vld [vmem:[#allocation42_spill] sm:$0xff]  ;;  %v10763_v52 = vld [vmem:[#allocation15_spill] sm:$0xff] }
 0x593   : > { %v5363_v5 = vadd.f32 %v5271_v62, %v5144_v55  ;;  %5864 = vmatmul.bf16.gmra.mxu1 %v10761_v59 }
 0x598   : > { %v5054_v7 = vpop.f32.mrf.mxu2  ;;  %v4811_v33 = vpop.f32.mrf.mxu1 }
 0x599   : > { %v5145_v2 = vadd.f32 %v5054_v7, %v9698_v42  ;;  %v9900_v1 = vadd.f32 %v4811_v33, %v9761_v8  ;;  %v5551_v26 = vpop.f32.mrf.mxu0 }
 0x59a   : > { %v5273_v50 = vpop.f32.mrf.mxu3  ;;  %v9902_v57 = vadd.f32 %v5551_v26, %v5363_v5  ;;  %v10764_v26 = vld [vmem:[#allocation50_spill] sm:$0xff] }
 0x59b   : > { %v5364_v27 = vadd.f32 %v5273_v50, %v5145_v2 }
 0x59c   : > { %5590 = vmatmul.bf16.gmra.mxu0 %v5422_v6 }
 0x59d   : > { %5096 = vmatmul.bf16.gmra.mxu2 %v10760_v49  ;;  %v5423_v49 = vrot.slane %v10728_v46, 1 }
 0x59f   : > { %5315 = vmatmul.bf16.gmra.mxu3 %v10762_v13  ;;  %v5424_v33 = vsel %vm2359_vm10, %v5421_v39, %v5423_v49 }
 0x5a0   : > { %v5057_v14 = vpop.f32.mrf.mxu2  ;;  %v4814_v56 = vpop.f32.mrf.mxu1 }
 0x5a1   : > { %v5146_v63 = vadd.f32 %v5057_v14, %v9708_v9  ;;  %v9909_v55 = vadd.f32 %v4814_v56, %v9769_v51  ;;  %v5553_v8 = vpop.f32.mrf.mxu0  ;;  %v10765_v56 = vld [vmem:[#allocation21_spill] sm:$0xff] }
 0x5a2   : > { %v5276_v42 = vpop.f32.mrf.mxu3  ;;  %v9911_v18 = vadd.f32 %v5553_v8, %v5364_v27 }
 0x5a3   : > { %v5365_v62 = vadd.f32 %v5276_v42, %v5146_v63  ;;  %5869 = vmatmul.bf16.gmra.mxu1 %v10763_v52 }
 0x5a8   : > { %v5059_v30 = vpop.f32.mrf.mxu2  ;;  %v4816_v7 = vpop.f32.mrf.mxu1 }
 0x5a9   : > { %v5147_v5 = vadd.f32 %v5059_v30, %v9716_v32  ;;  %v9917_v9 = vadd.f32 %v4816_v7, %v9778_v41  ;;  %v5556_v2 = vpop.f32.mrf.mxu0  ;;  %v10766_v7 = vld [vmem:[#allocation77_spill] sm:$0xff] }
 0x5aa   : > { %v5278_v59 = vpop.f32.mrf.mxu3  ;;  %v9919_v51 = vadd.f32 %v5556_v2, %v5365_v62 }
 0x5ab   : > { %v5366_v50 = vadd.f32 %v5278_v59, %v5147_v5 }
 0x5ac   : > { %5595 = vmatmul.bf16.gmra.mxu0 %v5424_v33 }
 0x5ad   : > { %5101 = vmatmul.bf16.gmra.mxu2 %v10762_v13  ;;  %v5425_v13 = vrot.slane %v10733_v17, 1 }
 0x5af   : > { %5320 = vmatmul.bf16.gmra.mxu3 %v10764_v26  ;;  %v5426_v59 = vsel %vm2359_vm10, %v5423_v49, %v5425_v13 }
 0x5b0   : > { %v5062_v27 = vpop.f32.mrf.mxu2  ;;  %v4819_v6 = vpop.f32.mrf.mxu1 }
 0x5b1   : > { %v5148_v46 = vadd.f32 %v5062_v27, %v9725_v31  ;;  %v9926_v14 = vadd.f32 %v4819_v6, %v9786_v29  ;;  %v5558_v41 = vpop.f32.mrf.mxu0 }
 0x5b2   : > { %v5281_v32 = vpop.f32.mrf.mxu3  ;;  %v9928_v42 = vadd.f32 %v5558_v41, %v5366_v50 }
 0x5b3   : > { %v5367_v63 = vadd.f32 %v5281_v32, %v5148_v46  ;;  %5874 = vmatmul.bf16.gmra.mxu1 %v10765_v56  ;;  %v10767_v32 = vld [vmem:[#allocation24_spill] sm:$0xff] }
 0x5b8   : > { %v5064_v39 = vpop.f32.mrf.mxu2  ;;  %v4821_v52 = vpop.f32.mrf.mxu1 }
 0x5b9   : > { %v5149_v8 = vadd.f32 %v5064_v39, %v9733_v40  ;;  %v9934_v31 = vadd.f32 %v4821_v52, %v9795_v34  ;;  %v5561_v30 = vpop.f32.mrf.mxu0 }
 0x5ba   : > { %v5283_v62 = vpop.f32.mrf.mxu3  ;;  %v9936_v29 = vadd.f32 %v5561_v30, %v5367_v63 }
 0x5bb   : > { %v5368_v5 = vadd.f32 %v5283_v62, %v5149_v8  ;;  %v10768_v62 = vld [vmem:[#allocation45_spill] sm:$0xff] }
 0x5bc   : > { %5600 = vmatmul.bf16.gmra.mxu0 %v5426_v59 }
 0x5bd   : > { %5106 = vmatmul.bf16.gmra.mxu2 %v10764_v26  ;;  %v5427_v26 = vrot.slane %v10739_v28, 1 }
 0x5bf   : > { %5325 = vmatmul.bf16.gmra.mxu3 %v10766_v7  ;;  %v5428_v8 = vsel %vm2359_vm10, %v5425_v13, %v5427_v26 }
 0x5c0   : > { %v5067_v2 = vpop.f32.mrf.mxu2  ;;  %v4824_v50 = vpop.f32.mrf.mxu1 }
 0x5c1   : > { %v5150_v17 = vadd.f32 %v5067_v2, %v9742_v10  ;;  %v9943_v33 = vadd.f32 %v4824_v50, %v9803_v58  ;;  %v5563_v34 = vpop.f32.mrf.mxu0 }
 0x5c2   : > { %v5286_v40 = vpop.f32.mrf.mxu3  ;;  %v9945_v46 = vadd.f32 %v5563_v34, %v5368_v5 }
 0x5c3   : > { %v5369_v27 = vadd.f32 %v5286_v40, %v5150_v17  ;;  %5879 = vmatmul.bf16.gmra.mxu1 %v10767_v32  ;;  %v10769_v17 = vld [vmem:[#allocation27_spill] sm:$0xff] }
 0x5c8   : > { %v5069_v49 = vpop.f32.mrf.mxu2  ;;  %v4826_v63 = vpop.f32.mrf.mxu1 }
 0x5c9   : > { %v5151_v6 = vadd.f32 %v5069_v49, %v9750_v54  ;;  %v9951_v10 = vadd.f32 %v4826_v63, %v9812_v35  ;;  %v5566_v56 = vpop.f32.mrf.mxu0  ;;  %v10770_v49 = vld [vmem:[#allocation59_spill] sm:$0xff] }
 0x5ca   : > { %v5288_v41 = vpop.f32.mrf.mxu3  ;;  %v9953_v58 = vadd.f32 %v5566_v56, %v5369_v27 }
 0x5cb   : > { %v5370_v39 = vadd.f32 %v5288_v41, %v5151_v6  ;;  %v10771_v41 = vld [vmem:[#allocation33_spill] sm:$0xff] }
 0x5cc   : > { %5605 = vmatmul.bf16.gmra.mxu0 %v5428_v8 }
 0x5cd   : > { %5111 = vmatmul.bf16.gmra.mxu2 %v10766_v7  ;;  %v5429_v7 = vrot.slane %v10744_v61, 1 }
 0x5cf   : > { %5330 = vmatmul.bf16.gmra.mxu3 %v10768_v62 }
 0x5d0   : > { %v5072_v52 = vpop.f32.mrf.mxu2  ;;  %v4829_v30 = vpop.f32.mrf.mxu1 }
 0x5d1   : > { %v5152_v28 = vadd.f32 %v5072_v52, %v9759_v23  ;;  %v9960_v5 = vadd.f32 %v4829_v30, %v9819_v0  ;;  %v5568_v35 = vpop.f32.mrf.mxu0  ;;  %v5430_v0 = vsel %vm2359_vm10, %v5427_v26, %v5429_v7  ;;  %v9979_v26 = vld [vmem:[%s10244_s4] ss:$0 sm:$0xff] }
 0x5d2   : > { %v5291_v54 = vpop.f32.mrf.mxu3  ;;  %v9962_v2 = vadd.f32 %v5568_v35, %v5370_v39 }
 0x5d3   : > { %v5371_v59 = vadd.f32 %v5291_v54, %v5152_v28  ;;  %5884 = vmatmul.bf16.gmra.mxu1 %v10769_v17  ;;  %v288_v28 = vld [vmem:[%s7671_s11] sm:$0xff]   ;;  %v10773_v17 = vld [vmem:[#allocation11_spill] sm:$0xff] }
 0x5d4   : > { %v6040_v30 = vunpack.c.l.bf16 %v288_v28 }
 0x5d8   : > { %v5074_v13 = vpop.f32.mrf.mxu2  ;;  %v4831_v34 = vpop.f32.mrf.mxu1 }
 0x5d9   : > { %v5153_v40 = vadd.f32 %v5074_v13, %v9767_v3  ;;  %v5571_v27 = vpop.f32.mrf.mxu0  ;;  %v6041_v34 = vunpack.c.h.bf16 %v288_v28 }
 0x5da   : > { %v5293_v50 = vpop.f32.mrf.mxu3  ;;  %v9967_v32 = vadd.f32 %v5571_v27, %v5371_v59  ;;  %v5431_v59 = vrot.slane %v10749_v4, 1 }
 0x5db   : > { %v5372_v23 = vadd.f32 %v5293_v50, %v5153_v40 }
 0x5dc   : > { %5610 = vmatmul.bf16.gmra.mxu0 %v5430_v0 }
 0x5dd   : > { %5116 = vmatmul.bf16.gmra.mxu2 %v10768_v62  ;;  %v10772_v62 = vld [vmem:[#allocation31_spill] sm:$0xff] }
 0x5df   : > { %5335 = vmatmul.bf16.gmra.mxu3 %v10770_v49 }
 0x5e0   : > { %v5077_v6 = vpop.f32.mrf.mxu2  ;;  %v5850_v3 = vpop.f32.mrf.mxu1 }
 0x5e1   : > { %v5154_v63 = vadd.f32 %v5077_v6, %v10771_v41  ;;  %v5573_v56 = vpop.f32.mrf.mxu0  ;;  %v5954_v52 = vadd.f32 %v5850_v3, %v9834_v43 }
 0x5e2   : > { %v5296_v61 = vpop.f32.mrf.mxu3  ;;  %v9973_v8 = vadd.f32 %v5573_v56, %v5372_v23 }
 0x5e3   : > { %v5373_v39 = vadd.f32 %v5296_v61, %v5154_v63  ;;  %5889 = vmatmul.bf16.gmra.mxu1 %v10772_v62  ;;  %v5999_v54 = vadd.f32 %v9979_v26, %v5954_v52  ;;  %v5432_v63 = vsel %vm2359_vm10, %v5429_v7, %v5431_v59  ;;  %v10774_v61 = vld [vmem:[#allocation17_spill] sm:$0xff] }
 0x5e5   : > { %v6081_v6 = vadd.f32 %v6040_v30, %v5999_v54 }
 0x5e8   : > { %v5079_v35 = vpop.f32.mrf.mxu2  ;;  %v5852_v50 = vpop.f32.mrf.mxu1 }
 0x5e9   : > { %v5155_v13 = vadd.f32 %v5079_v35, %v10773_v17  ;;  %v5955_v43 = vadd.f32 %v5852_v50, %v9843_v15  ;;  %v5576_v27 = vpop.f32.mrf.mxu0  ;;  %v6122_v15 = vmax.f32 %v6081_v6, 0.0  ;;  %v10775_v35 = vld [vmem:[#allocation67_spill] sm:$0xff]  ;;  %v5433_v50 = vrot.slane %v10753_v16, 1  ;;  %v10776_v16 = vld [vmem:[#allocation84_spill] sm:$0xff] }
 0x5ea   : > { %v5298_v40 = vpop.f32.mrf.mxu3  ;;  %v9988_v0 = vadd.f32 %v5576_v27, %v5373_v39  ;;  %v290_v17 = vld [vmem:[%s7671_s11 + $0x8] sm:$0xff]  }
 0x5eb   : > { %v5374_v23 = vadd.f32 %v5298_v40, %v5155_v13  ;;  %v6000_v41 = vadd.f32 %v9979_v26, %v5955_v43  ;;  %v6042_v40 = vunpack.c.l.bf16 %v290_v17  ;;  %v6043_v6 = vunpack.c.h.bf16 %v290_v17 }
 0x5ec   : > { %5615 = vmatmul.bf16.gmra.mxu0 %v5432_v63 }
 0x5ed   : > { %5121 = vmatmul.bf16.gmra.mxu2 %v10770_v49  ;;  %v6082_v4 = vadd.f32 %v6041_v34, %v6000_v41 }
 0x5ef   : > { %5340 = vmatmul.bf16.gmra.mxu3 %v10774_v61  ;;  %v6123_v3 = vmax.f32 %v6082_v4, 0.0 }
 0x5f0   : > { %v5082_v56 = vpop.f32.mrf.mxu2  ;;  %v5855_v62 = vpop.f32.mrf.mxu1 }
 0x5f1   : > { %v5156_v39 = vadd.f32 %v5082_v56, %v9793_v22  ;;  %v7182_v28 = vpack.c.bf16 %v6123_v3, %v6122_v15  ;;  %v5578_v54 = vpop.f32.mrf.mxu0  ;;  %v5956_v49 = vadd.f32 %v5855_v62, %v9851_v25  ;;  %v5434_v3 = vsel %vm2359_vm10, %v5431_v59, %v5433_v50 }
 0x5f2   : > { %v5301_v52 = vpop.f32.mrf.mxu3  ;;  %v9997_v7 = vadd.f32 %v5578_v54, %v5374_v23 }
 0x5f3   : > { %v5375_v30 = vadd.f32 %v5301_v52, %v5156_v39  ;;  %7183 = vst [vmem:[%s9999_s18] sm:$0xff] %v7182_v28   ;;  %5894 = vmatmul.bf16.gmra.mxu1 %v10775_v35  ;;  %v6001_v13 = vadd.f32 %v9979_v26, %v5956_v49  ;;  %v10778_v28 = vld [vmem:[#allocation37_spill] sm:$0xff] }
 0x5f5   : > { %v6083_v25 = vadd.f32 %v6042_v40, %v6001_v13  ;;  %v10779_v40 = vld [vmem:[#allocation73_spill] sm:$0xff] }
 0x5f7   : > { %v6124_v39 = vmax.f32 %v6083_v25, 0.0 }
 0x5f8   : > { %v5084_v22 = vpop.f32.mrf.mxu2  ;;  %v5857_v27 = vpop.f32.mrf.mxu1 }
 0x5f9   : > { %v5157_v43 = vadd.f32 %v5084_v22, %v9801_v19  ;;  %v5957_v23 = vadd.f32 %v5857_v27, %v9860_v11  ;;  %v5581_v41 = vpop.f32.mrf.mxu0  ;;  %v4957_v19 = vsel %vm8441_vm11, %v10776_v16, 0  ;;  %v292_v22 = vld [vmem:[%s7671_s11 + $0x10] sm:$0xff]  }
 0x5fa   : > { %v5303_v34 = vpop.f32.mrf.mxu3  ;;  %v10009_v4 = vadd.f32 %v5581_v41, %v5375_v30 }
 0x5fb   : > { %v5376_v63 = vadd.f32 %v5303_v34, %v5157_v43  ;;  %v6002_v15 = vadd.f32 %v9979_v26, %v5957_v23  ;;  %v6044_v34 = vunpack.c.l.bf16 %v292_v22  ;;  %v10780_v23 = vld [vmem:[#allocation44_spill] sm:$0xff] }
 0x5fc   : > { %5620 = vmatmul.bf16.gmra.mxu0 %v5434_v3  ;;  %v6045_v3 = vunpack.c.h.bf16 %v292_v22 }
 0x5fd   : > { %5126 = vmatmul.bf16.gmra.mxu2 %v10774_v61  ;;  %v6084_v11 = vadd.f32 %v6043_v6, %v6002_v15 }
 0x5ff   : > { %5345 = vmatmul.bf16.gmra.mxu3 %v4957_v19  ;;  %v6125_v52 = vmax.f32 %v6084_v11, 0.0 }
 0x600   : > { %v5087_v62 = vpop.f32.mrf.mxu2  ;;  %v5860_v49 = vpop.f32.mrf.mxu1 }
 0x601   : > { %v5158_v54 = vadd.f32 %v5087_v62, %v10778_v28  ;;  %v7187_v35 = vpack.c.bf16 %v6125_v52, %v6124_v39  ;;  %v5583_v59 = vpop.f32.mrf.mxu0  ;;  %v5958_v61 = vadd.f32 %v5860_v49, %v9868_v36  ;;  %v10781_v52 = vmov 0  }
 0x602   : > { %v5306_v30 = vpop.f32.mrf.mxu3  ;;  %v10018_v13 = vadd.f32 %v5583_v59, %v5376_v63 }
 0x603   : > { %v5377_v17 = vadd.f32 %v5306_v30, %v5158_v54  ;;  %7279 = vst [vmem:[%s9999_s18 + $0x8] sm:$0xff] %v7187_v35   ;;  %5899 = vmatmul.bf16.gmra.mxu1 %v10779_v40  ;;  %v6003_v43 = vadd.f32 %v9979_v26, %v5958_v61  ;;  %v294_v40 = vld [vmem:[%s7671_s11 + $0x18] sm:$0xff]  }
 0x605   : > { %v6085_v11 = vadd.f32 %v6044_v34, %v6003_v43  ;;  %v6046_v43 = vunpack.c.l.bf16 %v294_v40 }
 0x607   : > { %v6126_v62 = vmax.f32 %v6085_v11, 0.0 }
 0x608   : > { %v5089_v27 = vpop.f32.mrf.mxu2  ;;  %v5862_v25 = vpop.f32.mrf.mxu1 }
 0x609   : > { %v5159_v6 = vadd.f32 %v5089_v27, %v10780_v23  ;;  %v5959_v15 = vadd.f32 %v5862_v25, %v9877_v38  ;;  %v5586_v16 = vpop.f32.mrf.mxu0 }
 0x60a   : > { %v5308_v41 = vpop.f32.mrf.mxu3  ;;  %v10027_v56 = vadd.f32 %v5586_v16, %v5377_v17 }
 0x60b   : > { %v5378_v63 = vadd.f32 %v5308_v41, %v5159_v6  ;;  %v6004_v36 = vadd.f32 %v9979_v26, %v5959_v15  ;;  %v6047_v41 = vunpack.c.h.bf16 %v294_v40 }
 0x60c   : > { %6979 = vmatmul.msk.bf16.gmra.mxu0 %vm2418_vm13, %v5433_v50  ;;  %v10782_v50 = vld [vmem:[#allocation16_spill] sm:$0xff] }
 0x60d   : > { %5131 = vmatmul.bf16.gmra.mxu2 %v4957_v19  ;;  %v6086_v39 = vadd.f32 %v6045_v3, %v6004_v36 }
 0x60f   : > { %5350 = vmatmul.bf16.gmra.mxu3 %v10781_v52  ;;  %v6127_v28 = vmax.f32 %v6086_v39, 0.0 }
 0x610   : > { %v5092_v54 = vpop.f32.mrf.mxu2  ;;  %v5865_v49 = vpop.f32.mrf.mxu1 }
 0x611   : > { %v5160_v38 = vadd.f32 %v5092_v54, %v9826_v53  ;;  %v7192_v35 = vpack.c.bf16 %v6127_v28, %v6126_v62  ;;  %v5588_v59 = vpop.f32.mrf.mxu0  ;;  %v5960_v19 = vadd.f32 %v5865_v49, %v9885_v45 }
 0x612   : > { %v5311_v30 = vpop.f32.mrf.mxu3  ;;  %v10033_v61 = vadd.f32 %v5588_v59, %v5378_v63  ;;  %v296_v59 = vld [vmem:[%s7671_s11 + $0x20] sm:$0xff]  }
 0x613   : > { %v5379_v17 = vadd.f32 %v5311_v30, %v5160_v38  ;;  %7280 = vst [vmem:[%s9999_s18 + $0x10] sm:$0xff] %v7192_v35   ;;  %5904 = vmatmul.bf16.gmra.mxu1 %v10782_v50  ;;  %v6005_v22 = vadd.f32 %v9979_v26, %v5960_v19  ;;  %v10783_v35 = vld [vmem:[#allocation19_spill] sm:$0xff]  ;;  %v6048_v19 = vunpack.c.l.bf16 %v296_v59 }
 0x615   : > { %v6087_v45 = vadd.f32 %v6046_v43, %v6005_v22 }
 0x617   : > { %v6128_v11 = vmax.f32 %v6087_v45, 0.0 }
 0x618   : > { %v5094_v34 = vpop.f32.mrf.mxu2  ;;  %v5867_v23 = vpop.f32.mrf.mxu1 }
 0x619   : > { %v5161_v27 = vadd.f32 %v5094_v34, %v9832_v47  ;;  %v5961_v6 = vadd.f32 %v5867_v23, %v9894_v24  ;;  %v5591_v25 = vpop.f32.mrf.mxu0  ;;  %v6049_v34 = vunpack.c.h.bf16 %v296_v59 }
 0x61a   : > { %v5313_v53 = vpop.f32.mrf.mxu3  ;;  %v10042_v3 = vadd.f32 %v5591_v25, %v5379_v17 }
 0x61b   : > { %v5380_v15 = vadd.f32 %v5313_v53, %v5161_v27  ;;  %v6006_v16 = vadd.f32 %v9979_v26, %v5961_v6 }
 0x61c   : > { %5630 = vmatmul.bf16.gmra.mxu0 %v10781_v52 }
 0x61d   : > { %v6088_v63 = vadd.f32 %v6047_v41, %v6006_v16 }
 0x61f   : > { %v6129_v36 = vmax.f32 %v6088_v63, 0.0 }
 0x620   : > { %v5097_v47 = vpop.f32.mrf.mxu2  ;;  %v5870_v24 = vpop.f32.mrf.mxu1 }
 0x621   : > { %v5162_v39 = vadd.f32 %v5097_v47, %v9841_v12  ;;  %v7197_v28 = vpack.c.bf16 %v6129_v36, %v6128_v11  ;;  %v5593_v54 = vpop.f32.mrf.mxu0  ;;  %v5962_v49 = vadd.f32 %v5870_v24, %v9902_v57  ;;  %v298_v24 = vld [vmem:[%s7671_s11 + $0x28] sm:$0xff]  }
 0x622   : > { %v5316_v62 = vpop.f32.mrf.mxu3  ;;  %v10047_v30 = vadd.f32 %v5593_v54, %v5380_v15  ;;  %v6050_v54 = vunpack.c.l.bf16 %v298_v24 }
 0x623   : > { %v5381_v38 = vadd.f32 %v5316_v62, %v5162_v39  ;;  %7281 = vst [vmem:[%s9999_s18 + $0x18] sm:$0xff] %v7197_v28   ;;  %5909 = vmatmul.bf16.gmra.mxu1 %v10783_v35  ;;  %v6007_v17 = vadd.f32 %v9979_v26, %v5962_v49  ;;  %v10784_v62 = vld [vmem:[#allocation22_spill] sm:$0xff] }
 0x625   : > { %v6089_v57 = vadd.f32 %v6048_v19, %v6007_v17  ;;  %v6051_v17 = vunpack.c.h.bf16 %v298_v24 }
 0x627   : > { %v6130_v25 = vmax.f32 %v6089_v57, 0.0 }
 0x628   : > { %v5099_v50 = vpop.f32.mrf.mxu2  ;;  %v5872_v22 = vpop.f32.mrf.mxu1 }
 0x629   : > { %v5163_v40 = vadd.f32 %v5099_v50, %v9849_v44  ;;  %v5963_v43 = vadd.f32 %v5872_v22, %v9911_v18  ;;  %v5596_v27 = vpop.f32.mrf.mxu0 }
 0x62a   : > { %v5318_v12 = vpop.f32.mrf.mxu3  ;;  %v10056_v23 = vadd.f32 %v5596_v27, %v5381_v38 }
 0x62b   : > { %v5382_v53 = vadd.f32 %v5318_v12, %v5163_v40  ;;  %v6008_v6 = vadd.f32 %v9979_v26, %v5963_v43 }
 0x62d   : > { %v6090_v41 = vadd.f32 %v6049_v34, %v6008_v6 }
 0x62f   : > { %v6131_v15 = vmax.f32 %v6090_v41, 0.0 }
 0x630   : > { %v5102_v45 = vpop.f32.mrf.mxu2  ;;  %v5875_v63 = vpop.f32.mrf.mxu1 }
 0x631   : > { %v5164_v44 = vadd.f32 %v5102_v45, %v9858_v37  ;;  %v7202_v11 = vpack.c.bf16 %v6131_v15, %v6130_v25  ;;  %v5598_v18 = vpop.f32.mrf.mxu0  ;;  %v5964_v39 = vadd.f32 %v5875_v63, %v9919_v51  ;;  %v10785_v45 = vld [vmem:[#allocation75_spill] sm:$0xff] }
 0x632   : > { %v5321_v16 = vpop.f32.mrf.mxu3  ;;  %v10060_v47 = vadd.f32 %v5598_v18, %v5382_v53 }
 0x633   : > { %v5383_v36 = vadd.f32 %v5321_v16, %v5164_v44  ;;  %7282 = vst [vmem:[%s9999_s18 + $0x20] sm:$0xff] %v7202_v11   ;;  %5914 = vmatmul.bf16.gmra.mxu1 %v10784_v62  ;;  %v6009_v28 = vadd.f32 %v9979_v26, %v5964_v39  ;;  %v300_v44 = vld [vmem:[%s7671_s11 + $0x30] sm:$0xff]  }
 0x634   : > { %v6052_v63 = vunpack.c.l.bf16 %v300_v44  ;;  %v6053_v62 = vunpack.c.h.bf16 %v300_v44 }
 0x635   : > { %v6091_v51 = vadd.f32 %v6050_v54, %v6009_v28 }
 0x637   : > { %v6132_v43 = vmax.f32 %v6091_v51, 0.0 }
 0x638   : > { %v5104_v38 = vpop.f32.mrf.mxu2  ;;  %v5877_v35 = vpop.f32.mrf.mxu1 }
 0x639   : > { %v5165_v49 = vadd.f32 %v5104_v38, %v9866_v21  ;;  %v5965_v59 = vadd.f32 %v5877_v35, %v9928_v42  ;;  %v5601_v19 = vpop.f32.mrf.mxu0 }
 0x63a   : > { %v5323_v37 = vpop.f32.mrf.mxu3  ;;  %v10069_v40 = vadd.f32 %v5601_v19, %v5383_v36 }
 0x63b   : > { %v5384_v50 = vadd.f32 %v5323_v37, %v5165_v49  ;;  %v6010_v12 = vadd.f32 %v9979_v26, %v5965_v59 }
 0x63d   : > { %v6092_v22 = vadd.f32 %v6051_v17, %v6010_v12 }
 0x63f   : > { %v6133_v34 = vmax.f32 %v6092_v22, 0.0 }
 0x640   : > { %v5107_v27 = vpop.f32.mrf.mxu2  ;;  %v5880_v57 = vpop.f32.mrf.mxu1 }
 0x641   : > { %v5166_v21 = vadd.f32 %v5107_v27, %v9875_v48  ;;  %v7207_v6 = vpack.c.bf16 %v6133_v34, %v6132_v43  ;;  %v5603_v42 = vpop.f32.mrf.mxu0  ;;  %v5966_v15 = vadd.f32 %v5880_v57, %v9936_v29  ;;  %v10786_v43 = vld [vmem:[#allocation78_spill] sm:$0xff]  ;;  %v302_v34 = vld [vmem:[%s7671_s11 + $0x38] sm:$0xff]  }
 0x642   : > { %v5326_v53 = vpop.f32.mrf.mxu3  ;;  %v10073_v25 = vadd.f32 %v5603_v42, %v5384_v50 }
 0x643   : > { %v5385_v41 = vadd.f32 %v5326_v53, %v5166_v21  ;;  %7283 = vst [vmem:[%s9999_s18 + $0x28] sm:$0xff] %v7207_v6   ;;  %5919 = vmatmul.bf16.gmra.mxu1 %v10785_v45  ;;  %v6011_v16 = vadd.f32 %v9979_v26, %v5966_v15  ;;  %v6054_v21 = vunpack.c.l.bf16 %v302_v34 }
 0x645   : > { %v6093_v29 = vadd.f32 %v6052_v63, %v6011_v16 }
 0x647   : > { %v6134_v37 = vmax.f32 %v6093_v29, 0.0 }
 0x648   : > { %v5109_v11 = vpop.f32.mrf.mxu2  ;;  %v5882_v36 = vpop.f32.mrf.mxu1 }
 0x649   : > { %v5167_v18 = vadd.f32 %v5109_v11, %v9883_v60  ;;  %v5967_v39 = vadd.f32 %v5882_v36, %v9945_v46  ;;  %v5606_v24 = vpop.f32.mrf.mxu0 }
 0x64a   : > { %v5328_v48 = vpop.f32.mrf.mxu3  ;;  %v10082_v54 = vadd.f32 %v5606_v24, %v5385_v41  ;;  %v6055_v41 = vunpack.c.h.bf16 %v302_v34 }
 0x64b   : > { %v5386_v28 = vadd.f32 %v5328_v48, %v5167_v18  ;;  %v6012_v38 = vadd.f32 %v9979_v26, %v5967_v39 }
 0x64d   : > { %v6094_v49 = vadd.f32 %v6053_v62, %v6012_v38  ;;  %v10787_v38 = vld [vmem:[#allocation80_spill] sm:$0xff] }
 0x64f   : > { %v6135_v35 = vmax.f32 %v6094_v49, 0.0  ;;  %v304_v49 = vld [vmem:[%s7671_s11 + $0x40] sm:$0xff]  }
 0x650   : > { %v5112_v59 = vpop.f32.mrf.mxu2  ;;  %v5885_v19 = vpop.f32.mrf.mxu1 }
 0x651   : > { %v5168_v60 = vadd.f32 %v5112_v59, %v9892_v20  ;;  %v7212_v50 = vpack.c.bf16 %v6135_v35, %v6134_v37  ;;  %v5608_v46 = vpop.f32.mrf.mxu0  ;;  %v5968_v22 = vadd.f32 %v5885_v19, %v9953_v58  ;;  %v6056_v35 = vunpack.c.l.bf16 %v304_v49 }
 0x652   : > { %v5331_v17 = vpop.f32.mrf.mxu3  ;;  %v10086_v12 = vadd.f32 %v5608_v46, %v5386_v28 }
 0x653   : > { %v5387_v51 = vadd.f32 %v5331_v17, %v5168_v60  ;;  %7284 = vst [vmem:[%s9999_s18 + $0x30] sm:$0xff] %v7212_v50   ;;  %5924 = vmatmul.bf16.gmra.mxu1 %v10786_v43  ;;  %v6013_v27 = vadd.f32 %v9979_v26, %v5968_v22  ;;  %v6057_v50 = vunpack.c.h.bf16 %v304_v49 }
 0x655   : > { %v6095_v58 = vadd.f32 %v6054_v21, %v6013_v27 }
 0x657   : > { %v6136_v11 = vmax.f32 %v6095_v58, 0.0  ;;  %v306_v58 = vld [vmem:[%s7671_s11 + $0x48] sm:$0xff]  }
 0x658   : > { %v5114_v53 = vpop.f32.mrf.mxu2  ;;  %v5887_v6 = vpop.f32.mrf.mxu1 }
 0x659   : > { %v5169_v57 = vadd.f32 %v5114_v53, %v9900_v1  ;;  %v5969_v42 = vadd.f32 %v5887_v6, %v9962_v2  ;;  %v5611_v15 = vpop.f32.mrf.mxu0 }
 0x65a   : > { %v5333_v20 = vpop.f32.mrf.mxu3  ;;  %v10095_v44 = vadd.f32 %v5611_v15, %v5387_v51 }
 0x65b   : > { %v5388_v45 = vadd.f32 %v5333_v20, %v5169_v57  ;;  %v6014_v16 = vadd.f32 %v9979_v26, %v5969_v42 }
 0x65d   : > { %v6096_v63 = vadd.f32 %v6055_v41, %v6014_v16 }
 0x65f   : > { %v6137_v18 = vmax.f32 %v6096_v63, 0.0  ;;  %v6058_v63 = vunpack.c.l.bf16 %v306_v58 }
 0x660   : > { %v5117_v48 = vpop.f32.mrf.mxu2  ;;  %v5890_v39 = vpop.f32.mrf.mxu1 }
 0x661   : > { %v5170_v1 = vadd.f32 %v5117_v48, %v9909_v55  ;;  %v7217_v62 = vpack.c.bf16 %v6137_v18, %v6136_v11  ;;  %v5613_v2 = vpop.f32.mrf.mxu0  ;;  %v5970_v29 = vadd.f32 %v5890_v39, %v9967_v32 }
 0x662   : > { %v5336_v36 = vpop.f32.mrf.mxu3  ;;  %v10099_v28 = vadd.f32 %v5613_v2, %v5388_v45  ;;  %v10788_v45 = vld [vmem:[#allocation83_spill] sm:$0xff] }
 0x663   : > { %v5389_v24 = vadd.f32 %v5336_v36, %v5170_v1  ;;  %7285 = vst [vmem:[%s9999_s18 + $0x38] sm:$0xff] %v7217_v62   ;;  %5929 = vmatmul.bf16.gmra.mxu1 %v10787_v38  ;;  %v6015_v37 = vadd.f32 %v9979_v26, %v5970_v29  ;;  %v6059_v36 = vunpack.c.h.bf16 %v306_v58 }
 0x665   : > { %v6097_v32 = vadd.f32 %v6056_v35, %v6015_v37 }
 0x667   : > { %v6138_v27 = vmax.f32 %v6097_v32, 0.0 }
 0x668   : > { %v5119_v59 = vpop.f32.mrf.mxu2  ;;  %v5892_v17 = vpop.f32.mrf.mxu1 }
 0x669   : > { %v5171_v60 = vadd.f32 %v5119_v59, %v9917_v9  ;;  %v5971_v19 = vadd.f32 %v5892_v17, %v9973_v8  ;;  %v5616_v46 = vpop.f32.mrf.mxu0 }
 0x66a   : > { %v5338_v55 = vpop.f32.mrf.mxu3  ;;  %v10108_v22 = vadd.f32 %v5616_v46, %v5389_v24  ;;  %v308_v46 = vld [vmem:[%s7671_s11 + $0x50] sm:$0xff]  }
 0x66b   : > { %v5390_v51 = vadd.f32 %v5338_v55, %v5171_v60  ;;  %v6016_v43 = vadd.f32 %v9979_v26, %v5971_v19  ;;  %v6060_v32 = vunpack.c.l.bf16 %v308_v46 }
 0x66d   : > { %v6098_v34 = vadd.f32 %v6057_v50, %v6016_v43  ;;  %v10789_v50 = vld [vmem:[#allocation86_spill] sm:$0xff] }
 0x66f   : > { %v6139_v21 = vmax.f32 %v6098_v34, 0.0 }
 0x670   : > { %v5122_v53 = vpop.f32.mrf.mxu2  ;;  %v5895_v20 = vpop.f32.mrf.mxu1 }
 0x671   : > { %v5172_v9 = vadd.f32 %v5122_v53, %v9926_v14  ;;  %v7222_v6 = vpack.c.bf16 %v6139_v21, %v6138_v27  ;;  %v5618_v8 = vpop.f32.mrf.mxu0  ;;  %v5972_v15 = vadd.f32 %v5895_v20, %v9988_v0  ;;  %v6061_v53 = vunpack.c.h.bf16 %v308_v46 }
 0x672   : > { %v5341_v57 = vpop.f32.mrf.mxu3  ;;  %v10112_v41 = vadd.f32 %v5618_v8, %v5390_v51 }
 0x673   : > { %v5391_v42 = vadd.f32 %v5341_v57, %v5172_v9  ;;  %7286 = vst [vmem:[%s9999_s18 + $0x40] sm:$0xff] %v7222_v6   ;;  %5934 = vmatmul.bf16.gmra.mxu1 %v10788_v45  ;;  %v6017_v16 = vadd.f32 %v9979_v26, %v5972_v15 }
 0x675   : > { %v6099_v0 = vadd.f32 %v6058_v63, %v6017_v16 }
 0x677   : > { %v6140_v38 = vmax.f32 %v6099_v0, 0.0 }
 0x678   : > { %v5124_v11 = vpop.f32.mrf.mxu2  ;;  %v5897_v48 = vpop.f32.mrf.mxu1 }
 0x679   : > { %v5173_v18 = vadd.f32 %v5124_v11, %v9934_v31  ;;  %v5973_v1 = vadd.f32 %v5897_v48, %v9997_v7  ;;  %v5621_v39 = vpop.f32.mrf.mxu0  ;;  %v316_v48 = vld [vmem:[%s7671_s11 + $0x70] sm:$0xff]  }
 0x67a   : > { %v5343_v14 = vpop.f32.mrf.mxu3  ;;  %v10121_v2 = vadd.f32 %v5621_v39, %v5391_v42  ;;  %v310_v39 = vld [vmem:[%s7671_s11 + $0x58] sm:$0xff]  }
 0x67b   : > { %v5392_v62 = vadd.f32 %v5343_v14, %v5173_v18  ;;  %v6018_v24 = vadd.f32 %v9979_v26, %v5973_v1  ;;  %v10790_v14 = vld [vmem:[#allocation85_spill] sm:$0xff]  ;;  %v6062_v0 = vunpack.c.l.bf16 %v310_v39 }
 0x67c   : > { %v5775_v1 = vsel %vm9020_vm15, %v10790_v14, 0 }
 0x67d   : > { %v6100_v29 = vadd.f32 %v6059_v36, %v6018_v24 }
 0x67f   : > { %v6141_v49 = vmax.f32 %v6100_v29, 0.0 }
 0x680   : > { %v5127_v37 = vpop.f32.mrf.mxu2  ;;  %v5900_v59 = vpop.f32.mrf.mxu1 }
 0x681   : > { %v5174_v31 = vadd.f32 %v5127_v37, %v9943_v33  ;;  %v7227_v60 = vpack.c.bf16 %v6141_v49, %v6140_v38  ;;  %v5623_v7 = vpop.f32.mrf.mxu0  ;;  %v5974_v19 = vadd.f32 %v5900_v59, %v10009_v4  ;;  %v6063_v49 = vunpack.c.h.bf16 %v310_v39 }
 0x682   : > { %v5346_v35 = vpop.f32.mrf.mxu3  ;;  %v10125_v17 = vadd.f32 %v5623_v7, %v5392_v62 }
 0x683   : > { %v5393_v55 = vadd.f32 %v5346_v35, %v5174_v31  ;;  %7287 = vst [vmem:[%s9999_s18 + $0x48] sm:$0xff] %v7227_v60   ;;  %5939 = vmatmul.bf16.gmra.mxu1 %v10789_v50  ;;  %v6019_v51 = vadd.f32 %v9979_v26, %v5974_v19 }
 0x685   : > { %v6101_v4 = vadd.f32 %v6060_v32, %v6019_v51 }
 0x687   : > { %v6142_v42 = vmax.f32 %v6101_v4, 0.0 }
 0x688   : > { %v5129_v43 = vpop.f32.mrf.mxu2  ;;  %v5902_v27 = vpop.f32.mrf.mxu1 }
 0x689   : > { %v5175_v34 = vadd.f32 %v5129_v43, %v9951_v10  ;;  %v5975_v21 = vadd.f32 %v5902_v27, %v10018_v13  ;;  %v5626_v9 = vpop.f32.mrf.mxu0 }
 0x68a   : > { %v5348_v33 = vpop.f32.mrf.mxu3  ;;  %v10134_v20 = vadd.f32 %v5626_v9, %v5393_v55 }
 0x68b   : > { %v5394_v57 = vadd.f32 %v5348_v33, %v5175_v34  ;;  %v6020_v6 = vadd.f32 %v9979_v26, %v5975_v21 }
 0x68d   : > { %v6102_v8 = vadd.f32 %v6061_v53, %v6020_v6 }
 0x68f   : > { %v6143_v15 = vmax.f32 %v6102_v8, 0.0 }
 0x690   : > { %v5132_v45 = vpop.f32.mrf.mxu2  ;;  %v5905_v58 = vpop.f32.mrf.mxu1 }
 0x691   : > { %v5176_v10 = vadd.f32 %v5132_v45, %v9960_v5  ;;  %v7232_v63 = vpack.c.bf16 %v6143_v15, %v6142_v42  ;;  %v5628_v13 = vpop.f32.mrf.mxu0  ;;  %v5976_v36 = vadd.f32 %v5905_v58, %v10027_v56 }
 0x692   : > { %v5351_v16 = vpop.f32.mrf.mxu3  ;;  %v10138_v18 = vadd.f32 %v5628_v13, %v5394_v57 }
 0x693   : > { %v5395_v11 = vadd.f32 %v5351_v16, %v5176_v10  ;;  %7288 = vst [vmem:[%s9999_s18 + $0x50] sm:$0xff] %v7232_v63   ;;  %5944 = vmatmul.bf16.gmra.mxu1 %v5775_v1  ;;  %v6021_v62 = vadd.f32 %v9979_v26, %v5976_v36  ;;  %v6068_v36 = vunpack.c.l.bf16 %v316_v48 }
 0x695   : > { %v6103_v35 = vadd.f32 %v6062_v0, %v6021_v62  ;;  %v6069_v62 = vunpack.c.h.bf16 %v316_v48 }
 0x697   : > { %v6144_v60 = vmax.f32 %v6103_v35, 0.0  ;;  %v318_v35 = vld [vmem:[%s7671_s11 + $0x78] sm:$0xff]  }
 0x698   : > { %v5134_v5 = vpop.f32.mrf.mxu2  ;;  %v5907_v24 = vpop.f32.mrf.mxu1 }
 0x699   : > { %v5977_v38 = vadd.f32 %v5907_v24, %v10033_v61  ;;  %v5631_v37 = vpop.f32.mrf.mxu0  ;;  %v312_v61 = vld [vmem:[%s7671_s11 + $0x60] sm:$0xff]  }
 0x69a   : > { %v5353_v29 = vpop.f32.mrf.mxu3  ;;  %v10148_v31 = vadd.f32 %v5631_v37, %v5395_v11  ;;  %v6064_v32 = vunpack.c.l.bf16 %v312_v61  ;;  %v6065_v33 = vunpack.c.h.bf16 %v312_v61 }
 0x69b   : > { %v6022_v59 = vadd.f32 %v9979_v26, %v5977_v38 }
 0x69d   : > { %v6104_v56 = vadd.f32 %v6063_v49, %v6022_v59 }
 0x69f   : > { %v6145_v7 = vmax.f32 %v6104_v56, 0.0  ;;  %v6070_v56 = vunpack.c.l.bf16 %v318_v35 }
 0x6a0   : > { %v5910_v55 = vpop.f32.mrf.mxu1 }
 0x6a1   : > { %v7237_v19 = vpack.c.bf16 %v6145_v7, %v6144_v60  ;;  %v5633_v50 = vpop.f32.mrf.mxu0  ;;  %v5978_v46 = vadd.f32 %v5910_v55, %v10042_v3  ;;  %v314_v3 = vld [vmem:[%s7671_s11 + $0x68] sm:$0xff]   ;;  %v6071_v7 = vunpack.c.h.bf16 %v318_v35 }
 0x6a2   : > { %v6066_v42 = vunpack.c.l.bf16 %v314_v3  ;;  %v6067_v45 = vunpack.c.h.bf16 %v314_v3 }
 0x6a3   : > { %7289 = vst [vmem:[%s9999_s18 + $0x58] sm:$0xff] %v7237_v19   ;;  %5949 = vmatmul.bf16.gmra.mxu1 %v10781_v52  ;;  %v6023_v51 = vadd.f32 %v9979_v26, %v5978_v46 }
 0x6a5   : > { %v6105_v27 = vadd.f32 %v6064_v32, %v6023_v51 }
 0x6a7   : > { %v6146_v9 = vmax.f32 %v6105_v27, 0.0 }
 0x6a8   : > { %v5912_v43 = vpop.f32.mrf.mxu1 }
 0x6a9   : > { %v5979_v34 = vadd.f32 %v5912_v43, %v10047_v30  ;;  %v320_v43 = vld [vmem:[%s7671_s11 + $0x80] sm:$0xff]  }
 0x6ab   : > { %v6024_v21 = vadd.f32 %v9979_v26, %v5979_v34 }
 0x6ad   : > { %v6106_v53 = vadd.f32 %v6065_v33, %v6024_v21  ;;  %v6072_v33 = vunpack.c.l.bf16 %v320_v43  ;;  %v6073_v21 = vunpack.c.h.bf16 %v320_v43 }
 0x6af   : > { %v6147_v57 = vmax.f32 %v6106_v53, 0.0 }
 0x6b0   : > { %v5915_v4 = vpop.f32.mrf.mxu1 }
 0x6b1   : > { %v7242_v6 = vpack.c.bf16 %v6147_v57, %v6146_v9  ;;  %v5980_v52 = vadd.f32 %v5915_v4, %v10056_v23 }
 0x6b3   : > { %7290 = vst [vmem:[%s9999_s18 + $0x60] sm:$0xff] %v7242_v6   ;;  %v6025_v8 = vadd.f32 %v9979_v26, %v5980_v52 }
 0x6b5   : > { %v6107_v10 = vadd.f32 %v6066_v42, %v6025_v8  ;;  %v322_v8 = vld [vmem:[%s7671_s11 + $0x88] sm:$0xff]  }
 0x6b7   : > { %v6148_v63 = vmax.f32 %v6107_v10, 0.0 }
 0x6b8   : > { %v5917_v15 = vpop.f32.mrf.mxu1 }
 0x6b9   : > { %v5981_v30 = vadd.f32 %v5917_v15, %v10060_v47  ;;  %v6074_v15 = vunpack.c.l.bf16 %v322_v8 }
 0x6bb   : > { %v6026_v58 = vadd.f32 %v9979_v26, %v5981_v30 }
 0x6bd   : > { %v6108_v16 = vadd.f32 %v6067_v45, %v6026_v58  ;;  %v6075_v45 = vunpack.c.h.bf16 %v322_v8 }
 0x6bf   : > { %v6149_v13 = vmax.f32 %v6108_v16, 0.0 }
 0x6c0   : > { %v5920_v11 = vpop.f32.mrf.mxu1 }
 0x6c1   : > { %v7247_v14 = vpack.c.bf16 %v6149_v13, %v6148_v63  ;;  %v5982_v23 = vadd.f32 %v5920_v11, %v10069_v40 }
 0x6c3   : > { %7291 = vst [vmem:[%s9999_s18 + $0x68] sm:$0xff] %v7247_v14   ;;  %v6027_v1 = vadd.f32 %v9979_v26, %v5982_v23  ;;  %v324_v23 = vld [vmem:[%s7671_s11 + $0x90] sm:$0xff]  }
 0x6c5   : > { %v6109_v0 = vadd.f32 %v6068_v36, %v6027_v1  ;;  %v6076_v1 = vunpack.c.l.bf16 %v324_v23 }
 0x6c7   : > { %v6150_v29 = vmax.f32 %v6109_v0, 0.0 }
 0x6c8   : > { %v5922_v39 = vpop.f32.mrf.mxu1 }
 0x6c9   : > { %v5983_v47 = vadd.f32 %v5922_v39, %v10073_v25  ;;  %v6077_v39 = vunpack.c.h.bf16 %v324_v23 }
 0x6cb   : > { %v6028_v5 = vadd.f32 %v9979_v26, %v5983_v47 }
 0x6cd   : > { %v6110_v24 = vadd.f32 %v6069_v62, %v6028_v5 }
 0x6cf   : > { %v6151_v38 = vmax.f32 %v6110_v24, 0.0 }
 0x6d0   : > { %v5925_v49 = vpop.f32.mrf.mxu1 }
 0x6d1   : > { %v7252_v37 = vpack.c.bf16 %v6151_v38, %v6150_v29  ;;  %v5984_v40 = vadd.f32 %v5925_v49, %v10082_v54 }
 0x6d3   : > { %7292 = vst [vmem:[%s9999_s18 + $0x70] sm:$0xff] %v7252_v37   ;;  %v6029_v59 = vadd.f32 %v9979_v26, %v5984_v40  ;;  %v7414_v37 = vld [vmem:[%s7671_s11 + $0x98] sm:$0xf] }
 0x6d4   : > { %v6078_v40 = vunpack.c.l.bf16 %v7414_v37 }
 0x6d5   : > { %v6111_v55 = vadd.f32 %v6070_v56, %v6029_v59  ;;  %v7415_v59 = vld [vmem:[%s7671_s11 + $0x9c] sm:$0xf] }
 0x6d6   : > { %v6079_v56 = vunpack.c.l.bf16 %v7415_v59 }
 0x6d7   : > { %v6152_v46 = vmax.f32 %v6111_v55, 0.0 }
 0x6d8   : > { %v5927_v60 = vpop.f32.mrf.mxu1 }
 0x6d9   : > { %v5985_v25 = vadd.f32 %v5927_v60, %v10086_v12 }
 0x6db   : > { %v6030_v19 = vadd.f32 %v9979_v26, %v5985_v25 }
 0x6dd   : > { %v6112_v50 = vadd.f32 %v6071_v7, %v6030_v19 }
 0x6df   : > { %v6153_v61 = vmax.f32 %v6112_v50, 0.0 }
 0x6e0   : > { %v5930_v51 = vpop.f32.mrf.mxu1 }
 0x6e1   : > { %v7257_v32 = vpack.c.bf16 %v6153_v61, %v6152_v46  ;;  %v5986_v54 = vadd.f32 %v5930_v51, %v10095_v44  ;;  %v7416_v61 = vld [vmem:[%s7671_s11 + $0xa0] sm:$0xf]  ;;  %s7491_s11 = sshra.s32 %s6261_s9, 4  ;;  %s7492_s11 = int_to_ptr.hbm [resolvable:$true] %s7491_s11 }
 0x6e2   : > { %v6080_v51 = vunpack.c.l.bf16 %v7416_v61  ;;  %s7493_s10 = scalar_lea.hbm %s7492_s11, 164  ;;  %p7498_p3 = scmp.lt.s32.totalorder %s7492_s11, %s10246_s6 }
 0x6e3   : > { %7293 = vst [vmem:[%s9999_s18 + $0x78] sm:$0xff] %v7257_v32   ;;  %v6031_v34 = vadd.f32 %v9979_v26, %v5986_v54  ;;  %p7494_p0 = scmp.ne.s32.totalorder %s7492_s11, %s7493_s10  ;;  %p7499_p4 = scmp.lt.s32.totalorder %s7497_s14, %s7493_s10 }
 0x6e5   : > { %v6113_v53 = vadd.f32 %v6072_v33, %v6031_v34  ;;  %p7495_p1 = pnand %p7494_p0, %p7629_p5  ;;  %p7500_p7 = por %p7499_p4, %p7498_p3 }
 0x6e7   : > { %v6154_v4 = vmax.f32 %v6113_v53, 0.0  ;;  %p7496_p2 = pneg %p7495_p1 }
 0x6e8   : > { %v5932_v27 = vpop.f32.mrf.mxu1 }
 0x6e9   : > { %v5987_v12 = vadd.f32 %v5932_v27, %v10099_v28  ;;  %p7501_p8 = pnand %p7500_p7, %p7496_p2 }
 0x6eb   : > { %v6032_v9 = vadd.f32 %v9979_v26, %v5987_v12 }
 0x6ed   : > { %v6114_v57 = vadd.f32 %v6073_v21, %v6032_v9 }
 0x6ef   : > { %v6155_v6 = vmax.f32 %v6114_v57, 0.0 }
 0x6f0   : > { %v5935_v52 = vpop.f32.mrf.mxu1 }
 0x6f1   : > { %v7262_v3 = vpack.c.bf16 %v6155_v6, %v6154_v4  ;;  %v5988_v44 = vadd.f32 %v5935_v52, %v10108_v22 }
 0x6f3   : > { %7294 = vst [vmem:[%s9999_s18 + $0x80] sm:$0xff] %v7262_v3   ;;  %v6033_v42 = vadd.f32 %v9979_v26, %v5988_v44 }
 0x6f5   : > { %v6115_v10 = vadd.f32 %v6074_v15, %v6033_v42 }
 0x6f7   : > { %v6156_v63 = vmax.f32 %v6115_v10, 0.0 }
 0x6f8   : > { %v5937_v30 = vpop.f32.mrf.mxu1 }
 0x6f9   : > { %v5989_v28 = vadd.f32 %v5937_v30, %v10112_v41 }
 0x6fb   : > { %v6034_v58 = vadd.f32 %v9979_v26, %v5989_v28 }
 0x6fd   : > { %v6116_v16 = vadd.f32 %v6075_v45, %v6034_v58 }
 0x6ff   : > { %v6157_v13 = vmax.f32 %v6116_v16, 0.0 }
 0x700   : > { %v5940_v11 = vpop.f32.mrf.mxu1 }
 0x701   : > { %v7267_v14 = vpack.c.bf16 %v6157_v13, %v6156_v63  ;;  %v5990_v22 = vadd.f32 %v5940_v11, %v10121_v2 }
 0x703   : > { %7295 = vst [vmem:[%s9999_s18 + $0x88] sm:$0xff] %v7267_v14   ;;  %v6035_v48 = vadd.f32 %v9979_v26, %v5990_v22 }
 0x705   : > { %v6117_v47 = vadd.f32 %v6076_v1, %v6035_v48 }
 0x707   : > { %v6158_v5 = vmax.f32 %v6117_v47, 0.0 }
 0x708   : > { %v5942_v36 = vpop.f32.mrf.mxu1 }
 0x709   : > { %v5991_v41 = vadd.f32 %v5942_v36, %v10125_v17 }
 0x70b   : > { %v6036_v62 = vadd.f32 %v9979_v26, %v5991_v41 }
 0x70d   : > { %v6118_v0 = vadd.f32 %v6077_v39, %v6036_v62 }
 0x70f   : > { %v6159_v24 = vmax.f32 %v6118_v0, 0.0 }
 0x710   : > { %v5945_v29 = vpop.f32.mrf.mxu1 }
 0x711   : > { %v7272_v38 = vpack.c.bf16 %v6159_v24, %v6158_v5  ;;  %v5992_v2 = vadd.f32 %v5945_v29, %v10134_v20 }
 0x713   : > { %7296 = vst [vmem:[%s9999_s18 + $0x90] sm:$0xff] %v7272_v38   ;;  %v6037_v49 = vadd.f32 %v9979_v26, %v5992_v2 }
 0x715   : > { %v6119_v60 = vadd.f32 %v6078_v40, %v6037_v49 }
 0x717   : > { %v6160_v55 = vmax.f32 %v6119_v60, 0.0 }
 0x718   : > { %v5947_v17 = vpop.f32.mrf.mxu1 }
 0x719   : > { %v5993_v35 = vadd.f32 %v5947_v17, %v10138_v18 }
 0x71b   : > { %v6038_v25 = vadd.f32 %v9979_v26, %v5993_v35 }
 0x71d   : > { %v6120_v7 = vadd.f32 %v6079_v56, %v6038_v25 }
 0x71f   : > { %v6161_v19 = vmax.f32 %v6120_v7, 0.0 }
 0x720   : > { %v5950_v20 = vpop.f32.mrf.mxu1 }
 0x721   : > { %v7277_v50 = vpack.c.bf16 %v6161_v19, %v6160_v55  ;;  %v5994_v46 = vadd.f32 %v5950_v20, %v10148_v31 }
 0x723   : > { %7297 = vst [vmem:[%s9999_s18 + $0x98] sm:$0xff] %v7277_v50   ;;  %v6039_v18 = vadd.f32 %v9979_v26, %v5994_v46 }
 0x725   : > { %v6121_v32 = vadd.f32 %v6080_v51, %v6039_v18 }
 0x727   : > { %v6162_v54 = vmax.f32 %v6121_v32, 0.0 }
 0x728   : > { %v5952_v43 = vpop.f32.mrf.mxu1 }
 0x729   : > { %v6203_v34 = vpack.c.bf16 %v6162_v54, %v6162_v54 }
 0x72b   : > { %6244 = vst [vmem:[%s9999_s18 + $0xa0] sm:$0xf] %v6203_v34 }
 0x72c   : > { %7504 = shalt.err (!%p7501_p8)
}
 0x72d   : > { %s7554_s16 = smov 64   ;;  %s7555_s18 = smov 4  }
 0x72e   : > { %7323 = dma.vmem_to_hbm [thread:$0]  (%p7629_p5), %s6259_s29, 2624, %s6261_s9, %s6246_s25, %s7554_s16, %s7554_s16, %s7555_s18  }
 0x72f PF: > { %p7340_p9 = scmp.ge.s32.totalorder %s7547_s24, 2  ;;  %s6275_s19 = sand.u32 1, %s7535_s21  }
 0x730   : > { %s6276_s20 = scalar_lea.sflag [#allocation4], %s6275_s19 }
 0x731   : > { %p7333_p10 = pnand %p7340_p9, %p7633_p6 }
 0x733   : > { %p7334_p11 = pneg %p7333_p10 }
 0x735   : > { %7530 = dma.done.wait (%p7334_p11), %s6276_s20, 2624  }
 0x736   : > { %7532 = vsyncadd (%p7334_p11), %s6276_s20, 4294964672  ;;  %p18_p12 = scmp.ge.s32.totalorder %s7616_s27, 4   ;;  %s10792_s21 = smov %s7539_s22 }
 0x737   : > { %s10793_s22 = smov %s7543_s23  ;;  %s10794_s23 = smov %s7627_s30 }
 0x738   : > { %s10795_s24 = smov %s7616_s27  ;;  %20 = sbr.rel (!%p18_p12) target bundleno = 5 (0x5), region = 104 }
 0x73d   :  { %6282 = vsyncpa [#allocation3], 1 }
 0x73e   :  { %6284 = vsyncpa [#allocation3 + $0x1], 1 }
 0x73f   :  { %6285 = vsyncpa [#allocation6], 1 }
 0x740   :  { %6286 = vsyncpa [#allocation4], 1 }
 0x741   :  { %6288 = vsyncpa [#allocation4 + $0x1], 1 }

</bundles_post_ra>
